<compile_context>
chip_gen: v6e
topology: v6e:2x2x1
jax: 0.10.0
libtpu: 0.0.40
codegen_flags: <defaults>
</compile_context>

<pallas_src>
import jax
import jax.numpy as jnp
from jax.experimental import pallas as pl
from jax.experimental.pallas import tpu as pltpu


def _round_up(x, m):
    return (x + m - 1) // m * m


def gru_predictor_kernel(x_ref, wi_ref, wh_ref, bx_ref, bhn_ref, fcw_ref, fcb_ref,
                         out_ref, h_ref):
    """One grid step processes one chunk of Tc timesteps.

    x_ref:   (Bp, Tc, D)  bf16  batch-first x chunk (no wrapper transpose)
    wi_ref:  (D, 3*Hp)    bf16  fused input->hidden weights,  gates [r | z | n],
                                each gate padded to Hp (128-multiple) lanes
    wh_ref:  (Hp, 3*Hp)   bf16  fused hidden->hidden weights, same layout
    bx_ref:  (1, 3*Hp)    f32   pre-folded biases [b_ir+b_hr | b_iz+b_hz | b_in]
    bhn_ref: (1, Hp)      f32   b_hn (must stay inside r * (...))
    fcw_ref: (1, Hp) f32, fcb_ref: (1, 1) f32
    out_ref: (1, Bp)      f32   lane-dense sigmoid output (written on last chunk)
    h_ref:   (Bp, Hp)     f32   VMEM scratch: hidden state carried across chunks
    """
    Bp, Tc, D = x_ref.shape
    Hp = wh_ref.shape[0]
    chunk = pl.program_id(0)

    @pl.when(chunk == 0)
    def _init():
        h_ref[...] = jnp.zeros_like(h_ref)

    # (1) Whole-chunk input projection: ONE bf16 MXU pass with f32 accumulation,
    #     input (and r/z hidden) biases folded in.
    xb = x_ref[...]                                            # (Bp, Tc, D) bf16
    xp = (jnp.dot(xb.reshape(Bp * Tc, D), wi_ref[...],
                  preferred_element_type=jnp.float32)
          + bx_ref[...])                                       # (Bp*Tc, 3Hp) f32
    xp = xp.reshape(Bp, Tc, 3 * Hp)

    wh = wh_ref[...]                                           # (Hp, 3Hp) bf16
    bhn = jnp.broadcast_to(bhn_ref[...], (Bp, Hp))             # hoisted broadcast

    # (2) Recurrence over the chunk, fully unrolled (Tc small & static); gate
    #     slices are lane-aligned whole vregs thanks to the Hp (128) padding.
    h = h_ref[...]                                             # (Bp, Hp) f32
    for t in range(Tc):
        xp_t = xp[:, t, :]                                     # (Bp, 3Hp)
        g = jnp.dot(h.astype(jnp.bfloat16), wh,
                    preferred_element_type=jnp.float32)        # (Bp, 3Hp) f32
        r = jax.nn.sigmoid(xp_t[:, 0:Hp] + g[:, 0:Hp])
        z = jax.nn.sigmoid(xp_t[:, Hp:2 * Hp] + g[:, Hp:2 * Hp])
        n = jnp.tanh(xp_t[:, 2 * Hp:3 * Hp] + r * (g[:, 2 * Hp:3 * Hp] + bhn))
        h = (1.0 - z) * n + z * h
    h_ref[...] = h                                             # carry to next chunk

    # (3) Head on the final hidden state, emitted lane-dense as (1, Bp).
    @pl.when(chunk == pl.num_programs(0) - 1)
    def _final():
        logits = jax.lax.dot_general(                          # fcw @ h^T -> (1, Bp)
            fcw_ref[...], h, (((1,), (1,)), ((), ())),
            preferred_element_type=jnp.float32) + fcb_ref[...]
        out_ref[...] = jax.nn.sigmoid(logits)


def predictor_forward(x_btd, kparams, *, t_chunk=8):
    """x_btd: (B, T, D) float32 (PyTorch batch_first layout). Returns (B, 1)."""
    B, T, D = x_btd.shape
    Hp = kparams["b_hn"].shape[1]
    Bp = _round_up(B, 8)                       # sublane-aligned batch

    # T cannot be zero-padded (extra GRU steps would change h); fall back to a
    # single chunk if t_chunk does not tile T cleanly / sublane-align.
    if T % t_chunk != 0 or (t_chunk % 8 != 0 and t_chunk != T):
        t_chunk = T
    Tc = t_chunk
    n_chunks = T // Tc

    # Batch pad + bf16 cast. At production these are no-ops / produced upstream
    # (x already bf16, B already a multiple of 8).
    x_p = x_btd.astype(jnp.bfloat16)
    if Bp != B:
        x_p = jnp.pad(x_p, ((0, Bp - B), (0, 0), (0, 0)))

    flops = 2 * T * Bp * D * 3 * Hp + 2 * T * Bp * Hp * 3 * Hp + 2 * Bp * Hp
    bytes_accessed = (x_p.size * 2
                      + (kparams["w_i"].size + kparams["w_h"].size) * 2
                      + (kparams["b_x"].size + kparams["b_hn"].size
                         + kparams["fc_w"].size + 1) * 4
                      + Bp * 4)
    cost = pl.CostEstimate(flops=flops, transcendentals=3 * T * Bp * Hp,
                           bytes_accessed=bytes_accessed)

    grid_spec = pltpu.PrefetchScalarGridSpec(
        num_scalar_prefetch=0,
        grid=(n_chunks,),
        in_specs=[
            pl.BlockSpec((Bp, Tc, D), lambda c: (0, c, 0)),    # x chunk (pipelined)
            pl.BlockSpec((D, 3 * Hp), lambda c: (0, 0)),       # weights stay resident
            pl.BlockSpec((Hp, 3 * Hp), lambda c: (0, 0)),
            pl.BlockSpec((1, 3 * Hp), lambda c: (0, 0)),
            pl.BlockSpec((1, Hp), lambda c: (0, 0)),
            pl.BlockSpec((1, Hp), lambda c: (0, 0)),
            pl.BlockSpec((1, 1), lambda c: (0, 0)),
        ],
        out_specs=pl.BlockSpec((1, Bp), lambda c: (0, 0)),
        scratch_shapes=[pltpu.VMEM((Bp, Hp), jnp.float32)],    # carried hidden state
    )

    out = pl.pallas_call(
        gru_predictor_kernel,
        out_shape=jax.ShapeDtypeStruct((1, Bp), jnp.float32),
        grid_spec=grid_spec,
        compiler_params=pltpu.CompilerParams(
            dimension_semantics=("arbitrary",),        # serial recurrence over chunks
            vmem_limit_bytes=48 * 1024 * 1024,         # sized against v7x's 64 MiB VMEM
        ),
        cost_estimate=cost,
    )(x_p, kparams["w_i"], kparams["w_h"], kparams["b_x"], kparams["b_hn"],
      kparams["fc_w"], kparams["fc_b"])
    return out[0, :B].reshape(B, 1)


def init_params(key, input_dim, hidden_dim):
    """Deterministic init with PyTorch GRU/Linear parameter shapes & gate order.

    GRU: weight_ih_l0 (3H, D), weight_hh_l0 (3H, H), bias_ih_l0 (3H,),
         bias_hh_l0 (3H,), gate (row) order [r, z, n].
    Linear: weight (1, H), bias (1,).
    """
    ks = jax.random.split(key, 6)
    bound = float(1.0 / (hidden_dim ** 0.5))
    return {
        "weight_ih_l0": jax.random.uniform(ks[0], (3 * hidden_dim, input_dim),
                                           jnp.float32, -bound, bound),
        "weight_hh_l0": jax.random.uniform(ks[1], (3 * hidden_dim, hidden_dim),
                                           jnp.float32, -bound, bound),
        "bias_ih_l0": jax.random.uniform(ks[2], (3 * hidden_dim,), jnp.float32,
                                         -bound, bound),
        "bias_hh_l0": jax.random.uniform(ks[3], (3 * hidden_dim,), jnp.float32,
                                         -bound, bound),
        "fc_weight": jax.random.uniform(ks[4], (1, hidden_dim), jnp.float32,
                                        -bound, bound),
        "fc_bias": jax.random.uniform(ks[5], (1,), jnp.float32, -bound, bound),
    }


def pack_for_kernel(tp):
    """Repack PyTorch-format params into the fused, gate-padded kernel layout.

    Each gate block is padded to Hp = round_up(H, 128) lanes (zero padding) so
    in-kernel gate slices are lane-aligned; padded hidden units stay exactly 0
    through the recurrence (zero wi/wh columns+rows, zero biases, zero fc_w).
    """
    H = tp["weight_hh_l0"].shape[1]
    Hp = _round_up(H, 128)
    b_ih, b_hh = tp["bias_ih_l0"], tp["bias_hh_l0"]

    def pad_cols(w):       # (rows, H) -> (rows, Hp)
        return jnp.pad(w, ((0, 0), (0, Hp - H)))

    def pad_vec(v):        # (H,) -> (Hp,)
        return jnp.pad(v, (0, Hp - H))

    w_ih_t = tp["weight_ih_l0"].T                       # (D, 3H)
    w_hh_t = tp["weight_hh_l0"].T                       # (H, 3H)
    w_i = jnp.concatenate([pad_cols(w_ih_t[:, 0:H]),
                           pad_cols(w_ih_t[:, H:2 * H]),
                           pad_cols(w_ih_t[:, 2 * H:3 * H])], axis=1)   # (D, 3Hp)
    w_h = jnp.concatenate([pad_cols(w_hh_t[:, 0:H]),
                           pad_cols(w_hh_t[:, H:2 * H]),
                           pad_cols(w_hh_t[:, 2 * H:3 * H])], axis=1)   # (H, 3Hp)
    w_h = jnp.pad(w_h, ((0, Hp - H), (0, 0)))                           # (Hp, 3Hp)

    # Pre-fold biases: b_ih everywhere; b_hh for r/z only (b_hn stays separate
    # because it sits inside r * (W_hn h + b_hn)).
    b_x = jnp.concatenate([pad_vec(b_ih[0:H] + b_hh[0:H]),
                           pad_vec(b_ih[H:2 * H] + b_hh[H:2 * H]),
                           pad_vec(b_ih[2 * H:3 * H])]).reshape(1, 3 * Hp)
    b_hn = pad_vec(b_hh[2 * H:3 * H]).reshape(1, Hp)
    fc_w = jnp.pad(tp["fc_weight"], ((0, 0), (0, Hp - H)))              # (1, Hp)

    return {
        "w_i": w_i.astype(jnp.bfloat16),
        "w_h": w_h.astype(jnp.bfloat16),
        "b_x": b_x.astype(jnp.float32),
        "b_hn": b_hn.astype(jnp.float32),
        "fc_w": fc_w.astype(jnp.float32),
        "fc_b": tp["fc_bias"].reshape(1, 1).astype(jnp.float32),
    }


def reference_forward(x_btd, tp):
    """Pure-JAX f32 reference implementing PyTorch GRU + Linear + sigmoid exactly,
    straight from the PyTorch-format parameters (gate order [r, z, n])."""
    B, T, D = x_btd.shape
    H = tp["weight_hh_l0"].shape[1]
    w_ih, w_hh = tp["weight_ih_l0"], tp["weight_hh_l0"]
    b_ih, b_hh = tp["bias_ih_l0"], tp["bias_hh_l0"]
    wir, wiz, win = w_ih[0:H], w_ih[H:2 * H], w_ih[2 * H:]
    whr, whz, whn = w_hh[0:H], w_hh[H:2 * H], w_hh[2 * H:]
    bir, biz, bin_ = b_ih[0:H], b_ih[H:2 * H], b_ih[2 * H:]
    bhr, bhz, bhn = b_hh[0:H], b_hh[H:2 * H], b_hh[2 * H:]

    h = jnp.zeros((B, H), jnp.float32)
    for t in range(T):
        x_t = x_btd[:, t, :]
        r = jax.nn.sigmoid(x_t @ wir.T + bir + h @ whr.T + bhr)
        z = jax.nn.sigmoid(x_t @ wiz.T + biz + h @ whz.T + bhz)
        n = jnp.tanh(x_t @ win.T + bin_ + r * (h @ whn.T + bhn))
        h = (1.0 - z) * n + z * h
    return jax.nn.sigmoid(h @ tp["fc_weight"].T + tp["fc_bias"])


if __name__ == "__main__":
    B, T, D, H = 2, 16, 32, 32          # T=16 with Tc=8 -> 2 pipelined chunks
    key = jax.random.PRNGKey(0)
    k_x, k_p = jax.random.split(key)
    x = jax.random.normal(k_x, (B, T, D), dtype=jnp.float32)

    torch_params = init_params(k_p, D, H)
    kernel_params = pack_for_kernel(torch_params)

    out = predictor_forward(x, kernel_params, t_chunk=8)
    out = jax.block_until_ready(out)

    ref = reference_forward(x, torch_params)
    assert out.shape == (B, 1)
    # bf16 MXU operands -> loosened tolerance vs. the f32 reference (expected drift).
    assert jnp.allclose(out, ref, atol=2e-2, rtol=2e-2), (out, ref)
    print("KERNEL_OK")
</pallas_src>

<mosaic_0001>
module attributes {stable_mosaic.version = 11 : i64} {
  func.func @gru_predictor_kernel(%arg0: i32, %arg1: memref<8x8x32xbf16, #tpu.memory_space<vmem>>, %arg2: memref<32x384xbf16, #tpu.memory_space<vmem>>, %arg3: memref<128x384xbf16, #tpu.memory_space<vmem>>, %arg4: memref<1x384xf32, #tpu.memory_space<vmem>>, %arg5: memref<1x128xf32, #tpu.memory_space<vmem>>, %arg6: memref<1x128xf32, #tpu.memory_space<vmem>>, %arg7: memref<1x1xf32, #tpu.memory_space<vmem>>, %arg8: memref<1x8xf32, #tpu.memory_space<vmem>>, %arg9: memref<8x128xf32, #tpu.memory_space<vmem>>) attributes {dimension_semantics = [#tpu.dimension_semantics<arbitrary>], iteration_bounds = array<i64: 2>, scalar_prefetch = 0 : i64, scratch_operands = 1 : i64, tpu.core_type = #tpu.core_type<tc>, window_params = [{transform_indices = @transform_0, window_bounds = array<i64: 8, 8, 32>}, {pipeline_mode = #tpu.pipeline_mode<synchronous>, transform_indices = @transform_1, window_bounds = array<i64: 32, 384>}, {pipeline_mode = #tpu.pipeline_mode<synchronous>, transform_indices = @transform_2, window_bounds = array<i64: 128, 384>}, {pipeline_mode = #tpu.pipeline_mode<synchronous>, transform_indices = @transform_3, window_bounds = array<i64: 1, 384>}, {pipeline_mode = #tpu.pipeline_mode<synchronous>, transform_indices = @transform_4, window_bounds = array<i64: 1, 128>}, {pipeline_mode = #tpu.pipeline_mode<synchronous>, transform_indices = @transform_5, window_bounds = array<i64: 1, 128>}, {pipeline_mode = #tpu.pipeline_mode<synchronous>, transform_indices = @transform_6, window_bounds = array<i64: 1, 1>}, {pipeline_mode = #tpu.pipeline_mode<synchronous>, transform_indices = @transform_7, window_bounds = array<i64: 1, 8>}]} {
    %c0_i32 = arith.constant 0 : i32
    %0 = arith.cmpi eq, %arg0, %c0_i32 : i32
    %1 = arith.extui %0 : i1 to i32
    %c0_i32_0 = arith.constant 0 : i32
    %2 = arith.cmpi ne, %1, %c0_i32_0 : i32
    scf.if %2 {
      %cst_48 = arith.constant 0.000000e+00 : f32
      %268 = vector.broadcast %cst_48 : f32 to vector<8x128xf32>
      %c0_49 = arith.constant 0 : index
      %c0_50 = arith.constant 0 : index
      %269 = vector.load %arg9[%c0_49, %c0_50] : memref<8x128xf32, #tpu.memory_space<vmem>>, vector<8x128xf32>
      tpu.vector_store %arg9[%c0_49, %c0_50], %268 {strides = array<i32>} : memref<8x128xf32, #tpu.memory_space<vmem>>, vector<8x128xf32>,
    } else {
    }
    %c0 = arith.constant 0 : index
    %c0_1 = arith.constant 0 : index
    %c0_2 = arith.constant 0 : index
    %3 = vector.load %arg1[%c0, %c0_1, %c0_2] : memref<8x8x32xbf16, #tpu.memory_space<vmem>>, vector<8x8x32xbf16>
    %4 = vector.shape_cast %3 : vector<8x8x32xbf16> to vector<64x32xbf16>
    %c0_3 = arith.constant 0 : index
    %c0_4 = arith.constant 0 : index
    %5 = vector.load %arg2[%c0_3, %c0_4] : memref<32x384xbf16, #tpu.memory_space<vmem>>, vector<32x384xbf16>
    %cst = arith.constant dense<0.000000e+00> : vector<64x384xf32>
    %6 = tpu.matmul %4, %5, %cst {dimension_numbers = #tpu.dot_dimension_numbers<[1], [0], [0], [1], [0, 0, 1, 1], [], []>} : vector<64x32xbf16>, vector<32x384xbf16>, vector<64x384xf32> -> vector<64x384xf32>
    %c0_5 = arith.constant 0 : index
    %c0_6 = arith.constant 0 : index
    %7 = vector.load %arg4[%c0_5, %c0_6] : memref<1x384xf32, #tpu.memory_space<vmem>>, vector<1x384xf32>
    %8 = vector.broadcast %7 : vector<1x384xf32> to vector<64x384xf32>
    %9 = arith.addf %6, %8 : vector<64x384xf32>
    %10 = vector.shape_cast %9 : vector<64x384xf32> to vector<8x8x384xf32>
    %c0_7 = arith.constant 0 : index
    %c0_8 = arith.constant 0 : index
    %11 = vector.load %arg3[%c0_7, %c0_8] : memref<128x384xbf16, #tpu.memory_space<vmem>>, vector<128x384xbf16>
    %c0_9 = arith.constant 0 : index
    %c0_10 = arith.constant 0 : index
    %12 = vector.load %arg5[%c0_9, %c0_10] : memref<1x128xf32, #tpu.memory_space<vmem>>, vector<1x128xf32>
    %13 = vector.shape_cast %12 : vector<1x128xf32> to vector<1x128xf32>
    %14 = vector.broadcast %13 : vector<1x128xf32> to vector<8x128xf32>
    %c0_11 = arith.constant 0 : index
    %c0_12 = arith.constant 0 : index
    %15 = vector.load %arg9[%c0_11, %c0_12] : memref<8x128xf32, #tpu.memory_space<vmem>>, vector<8x128xf32>
    %16 = vector.extract_strided_slice %10 {offsets = [0, 0, 0], sizes = [8, 1, 384], strides = [1, 1, 1]} : vector<8x8x384xf32> to vector<8x1x384xf32>
    %17 = vector.shape_cast %16 : vector<8x1x384xf32> to vector<8x384xf32>
    %18 = arith.truncf %15 : vector<8x128xf32> to vector<8x128xbf16>
    %cst_13 = arith.constant dense<0.000000e+00> : vector<8x384xf32>
    %19 = tpu.matmul %18, %11, %cst_13 {dimension_numbers = #tpu.dot_dimension_numbers<[1], [0], [0], [1], [0, 0, 1, 1], [], []>} : vector<8x128xbf16>, vector<128x384xbf16>, vector<8x384xf32> -> vector<8x384xf32>
    %20 = vector.extract_strided_slice %17 {offsets = [0, 0], sizes = [8, 128], strides = [1, 1]} : vector<8x384xf32> to vector<8x128xf32>
    %21 = vector.extract_strided_slice %19 {offsets = [0, 0], sizes = [8, 128], strides = [1, 1]} : vector<8x384xf32> to vector<8x128xf32>
    %22 = arith.addf %20, %21 : vector<8x128xf32>
    %23 = arith.negf %22 : vector<8x128xf32>
    %24 = math.exp %23 : vector<8x128xf32>
    %cst_14 = arith.constant 1.000000e+00 : f32
    %25 = vector.broadcast %cst_14 : f32 to vector<8x128xf32>
    %26 = arith.addf %25, %24 : vector<8x128xf32>
    %27 = arith.divf %25, %26 : vector<8x128xf32>
    %28 = vector.extract_strided_slice %17 {offsets = [0, 128], sizes = [8, 128], strides = [1, 1]} : vector<8x384xf32> to vector<8x128xf32>
    %29 = vector.extract_strided_slice %19 {offsets = [0, 128], sizes = [8, 128], strides = [1, 1]} : vector<8x384xf32> to vector<8x128xf32>
    %30 = arith.addf %28, %29 : vector<8x128xf32>
    %31 = arith.negf %30 : vector<8x128xf32>
    %32 = math.exp %31 : vector<8x128xf32>
    %cst_15 = arith.constant 1.000000e+00 : f32
    %33 = vector.broadcast %cst_15 : f32 to vector<8x128xf32>
    %34 = arith.addf %33, %32 : vector<8x128xf32>
    %35 = arith.divf %33, %34 : vector<8x128xf32>
    %36 = vector.extract_strided_slice %17 {offsets = [0, 256], sizes = [8, 128], strides = [1, 1]} : vector<8x384xf32> to vector<8x128xf32>
    %37 = vector.extract_strided_slice %19 {offsets = [0, 256], sizes = [8, 128], strides = [1, 1]} : vector<8x384xf32> to vector<8x128xf32>
    %38 = arith.addf %37, %14 : vector<8x128xf32>
    %39 = arith.mulf %27, %38 : vector<8x128xf32>
    %40 = arith.addf %36, %39 : vector<8x128xf32>
    %41 = math.tanh %40 : vector<8x128xf32>
    %cst_16 = arith.constant 1.000000e+00 : f32
    %42 = vector.broadcast %cst_16 : f32 to vector<8x128xf32>
    %43 = arith.subf %42, %35 : vector<8x128xf32>
    %44 = arith.mulf %43, %41 : vector<8x128xf32>
    %45 = arith.mulf %35, %15 : vector<8x128xf32>
    %46 = arith.addf %44, %45 : vector<8x128xf32>
    %47 = vector.extract_strided_slice %10 {offsets = [0, 1, 0], sizes = [8, 1, 384], strides = [1, 1, 1]} : vector<8x8x384xf32> to vector<8x1x384xf32>
    %48 = vector.shape_cast %47 : vector<8x1x384xf32> to vector<8x384xf32>
    %49 = arith.truncf %46 : vector<8x128xf32> to vector<8x128xbf16>
    %cst_17 = arith.constant dense<0.000000e+00> : vector<8x384xf32>
    %50 = tpu.matmul %49, %11, %cst_17 {dimension_numbers = #tpu.dot_dimension_numbers<[1], [0], [0], [1], [0, 0, 1, 1], [], []>} : vector<8x128xbf16>, vector<128x384xbf16>, vector<8x384xf32> -> vector<8x384xf32>
    %51 = vector.extract_strided_slice %48 {offsets = [0, 0], sizes = [8, 128], strides = [1, 1]} : vector<8x384xf32> to vector<8x128xf32>
    %52 = vector.extract_strided_slice %50 {offsets = [0, 0], sizes = [8, 128], strides = [1, 1]} : vector<8x384xf32> to vector<8x128xf32>
    %53 = arith.addf %51, %52 : vector<8x128xf32>
    %54 = arith.negf %53 : vector<8x128xf32>
    %55 = math.exp %54 : vector<8x128xf32>
    %cst_18 = arith.constant 1.000000e+00 : f32
    %56 = vector.broadcast %cst_18 : f32 to vector<8x128xf32>
    %57 = arith.addf %56, %55 : vector<8x128xf32>
    %58 = arith.divf %56, %57 : vector<8x128xf32>
    %59 = vector.extract_strided_slice %48 {offsets = [0, 128], sizes = [8, 128], strides = [1, 1]} : vector<8x384xf32> to vector<8x128xf32>
    %60 = vector.extract_strided_slice %50 {offsets = [0, 128], sizes = [8, 128], strides = [1, 1]} : vector<8x384xf32> to vector<8x128xf32>
    %61 = arith.addf %59, %60 : vector<8x128xf32>
    %62 = arith.negf %61 : vector<8x128xf32>
    %63 = math.exp %62 : vector<8x128xf32>
    %cst_19 = arith.constant 1.000000e+00 : f32
    %64 = vector.broadcast %cst_19 : f32 to vector<8x128xf32>
    %65 = arith.addf %64, %63 : vector<8x128xf32>
    %66 = arith.divf %64, %65 : vector<8x128xf32>
    %67 = vector.extract_strided_slice %48 {offsets = [0, 256], sizes = [8, 128], strides = [1, 1]} : vector<8x384xf32> to vector<8x128xf32>
    %68 = vector.extract_strided_slice %50 {offsets = [0, 256], sizes = [8, 128], strides = [1, 1]} : vector<8x384xf32> to vector<8x128xf32>
    %69 = arith.addf %68, %14 : vector<8x128xf32>
    %70 = arith.mulf %58, %69 : vector<8x128xf32>
    %71 = arith.addf %67, %70 : vector<8x128xf32>
    %72 = math.tanh %71 : vector<8x128xf32>
    %cst_20 = arith.constant 1.000000e+00 : f32
    %73 = vector.broadcast %cst_20 : f32 to vector<8x128xf32>
    %74 = arith.subf %73, %66 : vector<8x128xf32>
    %75 = arith.mulf %74, %72 : vector<8x128xf32>
    %76 = arith.mulf %66, %46 : vector<8x128xf32>
    %77 = arith.addf %75, %76 : vector<8x128xf32>
    %78 = vector.extract_strided_slice %10 {offsets = [0, 2, 0], sizes = [8, 1, 384], strides = [1, 1, 1]} : vector<8x8x384xf32> to vector<8x1x384xf32>
    %79 = vector.shape_cast %78 : vector<8x1x384xf32> to vector<8x384xf32>
    %80 = arith.truncf %77 : vector<8x128xf32> to vector<8x128xbf16>
    %cst_21 = arith.constant dense<0.000000e+00> : vector<8x384xf32>
    %81 = tpu.matmul %80, %11, %cst_21 {dimension_numbers = #tpu.dot_dimension_numbers<[1], [0], [0], [1], [0, 0, 1, 1], [], []>} : vector<8x128xbf16>, vector<128x384xbf16>, vector<8x384xf32> -> vector<8x384xf32>
    %82 = vector.extract_strided_slice %79 {offsets = [0, 0], sizes = [8, 128], strides = [1, 1]} : vector<8x384xf32> to vector<8x128xf32>
    %83 = vector.extract_strided_slice %81 {offsets = [0, 0], sizes = [8, 128], strides = [1, 1]} : vector<8x384xf32> to vector<8x128xf32>
    %84 = arith.addf %82, %83 : vector<8x128xf32>
    %85 = arith.negf %84 : vector<8x128xf32>
    %86 = math.exp %85 : vector<8x128xf32>
    %cst_22 = arith.constant 1.000000e+00 : f32
    %87 = vector.broadcast %cst_22 : f32 to vector<8x128xf32>
    %88 = arith.addf %87, %86 : vector<8x128xf32>
    %89 = arith.divf %87, %88 : vector<8x128xf32>
    %90 = vector.extract_strided_slice %79 {offsets = [0, 128], sizes = [8, 128], strides = [1, 1]} : vector<8x384xf32> to vector<8x128xf32>
    %91 = vector.extract_strided_slice %81 {offsets = [0, 128], sizes = [8, 128], strides = [1, 1]} : vector<8x384xf32> to vector<8x128xf32>
    %92 = arith.addf %90, %91 : vector<8x128xf32>
    %93 = arith.negf %92 : vector<8x128xf32>
    %94 = math.exp %93 : vector<8x128xf32>
    %cst_23 = arith.constant 1.000000e+00 : f32
    %95 = vector.broadcast %cst_23 : f32 to vector<8x128xf32>
    %96 = arith.addf %95, %94 : vector<8x128xf32>
    %97 = arith.divf %95, %96 : vector<8x128xf32>
    %98 = vector.extract_strided_slice %79 {offsets = [0, 256], sizes = [8, 128], strides = [1, 1]} : vector<8x384xf32> to vector<8x128xf32>
    %99 = vector.extract_strided_slice %81 {offsets = [0, 256], sizes = [8, 128], strides = [1, 1]} : vector<8x384xf32> to vector<8x128xf32>
    %100 = arith.addf %99, %14 : vector<8x128xf32>
    %101 = arith.mulf %89, %100 : vector<8x128xf32>
    %102 = arith.addf %98, %101 : vector<8x128xf32>
    %103 = math.tanh %102 : vector<8x128xf32>
    %cst_24 = arith.constant 1.000000e+00 : f32
    %104 = vector.broadcast %cst_24 : f32 to vector<8x128xf32>
    %105 = arith.subf %104, %97 : vector<8x128xf32>
    %106 = arith.mulf %105, %103 : vector<8x128xf32>
    %107 = arith.mulf %97, %77 : vector<8x128xf32>
    %108 = arith.addf %106, %107 : vector<8x128xf32>
    %109 = vector.extract_strided_slice %10 {offsets = [0, 3, 0], sizes = [8, 1, 384], strides = [1, 1, 1]} : vector<8x8x384xf32> to vector<8x1x384xf32>
    %110 = vector.shape_cast %109 : vector<8x1x384xf32> to vector<8x384xf32>
    %111 = arith.truncf %108 : vector<8x128xf32> to vector<8x128xbf16>
    %cst_25 = arith.constant dense<0.000000e+00> : vector<8x384xf32>
    %112 = tpu.matmul %111, %11, %cst_25 {dimension_numbers = #tpu.dot_dimension_numbers<[1], [0], [0], [1], [0, 0, 1, 1], [], []>} : vector<8x128xbf16>, vector<128x384xbf16>, vector<8x384xf32> -> vector<8x384xf32>
    %113 = vector.extract_strided_slice %110 {offsets = [0, 0], sizes = [8, 128], strides = [1, 1]} : vector<8x384xf32> to vector<8x128xf32>
    %114 = vector.extract_strided_slice %112 {offsets = [0, 0], sizes = [8, 128], strides = [1, 1]} : vector<8x384xf32> to vector<8x128xf32>
    %115 = arith.addf %113, %114 : vector<8x128xf32>
    %116 = arith.negf %115 : vector<8x128xf32>
    %117 = math.exp %116 : vector<8x128xf32>
    %cst_26 = arith.constant 1.000000e+00 : f32
    %118 = vector.broadcast %cst_26 : f32 to vector<8x128xf32>
    %119 = arith.addf %118, %117 : vector<8x128xf32>
    %120 = arith.divf %118, %119 : vector<8x128xf32>
    %121 = vector.extract_strided_slice %110 {offsets = [0, 128], sizes = [8, 128], strides = [1, 1]} : vector<8x384xf32> to vector<8x128xf32>
    %122 = vector.extract_strided_slice %112 {offsets = [0, 128], sizes = [8, 128], strides = [1, 1]} : vector<8x384xf32> to vector<8x128xf32>
    %123 = arith.addf %121, %122 : vector<8x128xf32>
    %124 = arith.negf %123 : vector<8x128xf32>
    %125 = math.exp %124 : vector<8x128xf32>
    %cst_27 = arith.constant 1.000000e+00 : f32
    %126 = vector.broadcast %cst_27 : f32 to vector<8x128xf32>
    %127 = arith.addf %126, %125 : vector<8x128xf32>
    %128 = arith.divf %126, %127 : vector<8x128xf32>
    %129 = vector.extract_strided_slice %110 {offsets = [0, 256], sizes = [8, 128], strides = [1, 1]} : vector<8x384xf32> to vector<8x128xf32>
    %130 = vector.extract_strided_slice %112 {offsets = [0, 256], sizes = [8, 128], strides = [1, 1]} : vector<8x384xf32> to vector<8x128xf32>
    %131 = arith.addf %130, %14 : vector<8x128xf32>
    %132 = arith.mulf %120, %131 : vector<8x128xf32>
    %133 = arith.addf %129, %132 : vector<8x128xf32>
    %134 = math.tanh %133 : vector<8x128xf32>
    %cst_28 = arith.constant 1.000000e+00 : f32
    %135 = vector.broadcast %cst_28 : f32 to vector<8x128xf32>
    %136 = arith.subf %135, %128 : vector<8x128xf32>
    %137 = arith.mulf %136, %134 : vector<8x128xf32>
    %138 = arith.mulf %128, %108 : vector<8x128xf32>
    %139 = arith.addf %137, %138 : vector<8x128xf32>
    %140 = vector.extract_strided_slice %10 {offsets = [0, 4, 0], sizes = [8, 1, 384], strides = [1, 1, 1]} : vector<8x8x384xf32> to vector<8x1x384xf32>
    %141 = vector.shape_cast %140 : vector<8x1x384xf32> to vector<8x384xf32>
    %142 = arith.truncf %139 : vector<8x128xf32> to vector<8x128xbf16>
    %cst_29 = arith.constant dense<0.000000e+00> : vector<8x384xf32>
    %143 = tpu.matmul %142, %11, %cst_29 {dimension_numbers = #tpu.dot_dimension_numbers<[1], [0], [0], [1], [0, 0, 1, 1], [], []>} : vector<8x128xbf16>, vector<128x384xbf16>, vector<8x384xf32> -> vector<8x384xf32>
    %144 = vector.extract_strided_slice %141 {offsets = [0, 0], sizes = [8, 128], strides = [1, 1]} : vector<8x384xf32> to vector<8x128xf32>
    %145 = vector.extract_strided_slice %143 {offsets = [0, 0], sizes = [8, 128], strides = [1, 1]} : vector<8x384xf32> to vector<8x128xf32>
    %146 = arith.addf %144, %145 : vector<8x128xf32>
    %147 = arith.negf %146 : vector<8x128xf32>
    %148 = math.exp %147 : vector<8x128xf32>
    %cst_30 = arith.constant 1.000000e+00 : f32
    %149 = vector.broadcast %cst_30 : f32 to vector<8x128xf32>
    %150 = arith.addf %149, %148 : vector<8x128xf32>
    %151 = arith.divf %149, %150 : vector<8x128xf32>
    %152 = vector.extract_strided_slice %141 {offsets = [0, 128], sizes = [8, 128], strides = [1, 1]} : vector<8x384xf32> to vector<8x128xf32>
    %153 = vector.extract_strided_slice %143 {offsets = [0, 128], sizes = [8, 128], strides = [1, 1]} : vector<8x384xf32> to vector<8x128xf32>
    %154 = arith.addf %152, %153 : vector<8x128xf32>
    %155 = arith.negf %154 : vector<8x128xf32>
    %156 = math.exp %155 : vector<8x128xf32>
    %cst_31 = arith.constant 1.000000e+00 : f32
    %157 = vector.broadcast %cst_31 : f32 to vector<8x128xf32>
    %158 = arith.addf %157, %156 : vector<8x128xf32>
    %159 = arith.divf %157, %158 : vector<8x128xf32>
    %160 = vector.extract_strided_slice %141 {offsets = [0, 256], sizes = [8, 128], strides = [1, 1]} : vector<8x384xf32> to vector<8x128xf32>
    %161 = vector.extract_strided_slice %143 {offsets = [0, 256], sizes = [8, 128], strides = [1, 1]} : vector<8x384xf32> to vector<8x128xf32>
    %162 = arith.addf %161, %14 : vector<8x128xf32>
    %163 = arith.mulf %151, %162 : vector<8x128xf32>
    %164 = arith.addf %160, %163 : vector<8x128xf32>
    %165 = math.tanh %164 : vector<8x128xf32>
    %cst_32 = arith.constant 1.000000e+00 : f32
    %166 = vector.broadcast %cst_32 : f32 to vector<8x128xf32>
    %167 = arith.subf %166, %159 : vector<8x128xf32>
    %168 = arith.mulf %167, %165 : vector<8x128xf32>
    %169 = arith.mulf %159, %139 : vector<8x128xf32>
    %170 = arith.addf %168, %169 : vector<8x128xf32>
    %171 = vector.extract_strided_slice %10 {offsets = [0, 5, 0], sizes = [8, 1, 384], strides = [1, 1, 1]} : vector<8x8x384xf32> to vector<8x1x384xf32>
    %172 = vector.shape_cast %171 : vector<8x1x384xf32> to vector<8x384xf32>
    %173 = arith.truncf %170 : vector<8x128xf32> to vector<8x128xbf16>
    %cst_33 = arith.constant dense<0.000000e+00> : vector<8x384xf32>
    %174 = tpu.matmul %173, %11, %cst_33 {dimension_numbers = #tpu.dot_dimension_numbers<[1], [0], [0], [1], [0, 0, 1, 1], [], []>} : vector<8x128xbf16>, vector<128x384xbf16>, vector<8x384xf32> -> vector<8x384xf32>
    %175 = vector.extract_strided_slice %172 {offsets = [0, 0], sizes = [8, 128], strides = [1, 1]} : vector<8x384xf32> to vector<8x128xf32>
    %176 = vector.extract_strided_slice %174 {offsets = [0, 0], sizes = [8, 128], strides = [1, 1]} : vector<8x384xf32> to vector<8x128xf32>
    %177 = arith.addf %175, %176 : vector<8x128xf32>
    %178 = arith.negf %177 : vector<8x128xf32>
    %179 = math.exp %178 : vector<8x128xf32>
    %cst_34 = arith.constant 1.000000e+00 : f32
    %180 = vector.broadcast %cst_34 : f32 to vector<8x128xf32>
    %181 = arith.addf %180, %179 : vector<8x128xf32>
    %182 = arith.divf %180, %181 : vector<8x128xf32>
    %183 = vector.extract_strided_slice %172 {offsets = [0, 128], sizes = [8, 128], strides = [1, 1]} : vector<8x384xf32> to vector<8x128xf32>
    %184 = vector.extract_strided_slice %174 {offsets = [0, 128], sizes = [8, 128], strides = [1, 1]} : vector<8x384xf32> to vector<8x128xf32>
    %185 = arith.addf %183, %184 : vector<8x128xf32>
    %186 = arith.negf %185 : vector<8x128xf32>
    %187 = math.exp %186 : vector<8x128xf32>
    %cst_35 = arith.constant 1.000000e+00 : f32
    %188 = vector.broadcast %cst_35 : f32 to vector<8x128xf32>
    %189 = arith.addf %188, %187 : vector<8x128xf32>
    %190 = arith.divf %188, %189 : vector<8x128xf32>
    %191 = vector.extract_strided_slice %172 {offsets = [0, 256], sizes = [8, 128], strides = [1, 1]} : vector<8x384xf32> to vector<8x128xf32>
    %192 = vector.extract_strided_slice %174 {offsets = [0, 256], sizes = [8, 128], strides = [1, 1]} : vector<8x384xf32> to vector<8x128xf32>
    %193 = arith.addf %192, %14 : vector<8x128xf32>
    %194 = arith.mulf %182, %193 : vector<8x128xf32>
    %195 = arith.addf %191, %194 : vector<8x128xf32>
    %196 = math.tanh %195 : vector<8x128xf32>
    %cst_36 = arith.constant 1.000000e+00 : f32
    %197 = vector.broadcast %cst_36 : f32 to vector<8x128xf32>
    %198 = arith.subf %197, %190 : vector<8x128xf32>
    %199 = arith.mulf %198, %196 : vector<8x128xf32>
    %200 = arith.mulf %190, %170 : vector<8x128xf32>
    %201 = arith.addf %199, %200 : vector<8x128xf32>
    %202 = vector.extract_strided_slice %10 {offsets = [0, 6, 0], sizes = [8, 1, 384], strides = [1, 1, 1]} : vector<8x8x384xf32> to vector<8x1x384xf32>
    %203 = vector.shape_cast %202 : vector<8x1x384xf32> to vector<8x384xf32>
    %204 = arith.truncf %201 : vector<8x128xf32> to vector<8x128xbf16>
    %cst_37 = arith.constant dense<0.000000e+00> : vector<8x384xf32>
    %205 = tpu.matmul %204, %11, %cst_37 {dimension_numbers = #tpu.dot_dimension_numbers<[1], [0], [0], [1], [0, 0, 1, 1], [], []>} : vector<8x128xbf16>, vector<128x384xbf16>, vector<8x384xf32> -> vector<8x384xf32>
    %206 = vector.extract_strided_slice %203 {offsets = [0, 0], sizes = [8, 128], strides = [1, 1]} : vector<8x384xf32> to vector<8x128xf32>
    %207 = vector.extract_strided_slice %205 {offsets = [0, 0], sizes = [8, 128], strides = [1, 1]} : vector<8x384xf32> to vector<8x128xf32>
    %208 = arith.addf %206, %207 : vector<8x128xf32>
    %209 = arith.negf %208 : vector<8x128xf32>
    %210 = math.exp %209 : vector<8x128xf32>
    %cst_38 = arith.constant 1.000000e+00 : f32
    %211 = vector.broadcast %cst_38 : f32 to vector<8x128xf32>
    %212 = arith.addf %211, %210 : vector<8x128xf32>
    %213 = arith.divf %211, %212 : vector<8x128xf32>
    %214 = vector.extract_strided_slice %203 {offsets = [0, 128], sizes = [8, 128], strides = [1, 1]} : vector<8x384xf32> to vector<8x128xf32>
    %215 = vector.extract_strided_slice %205 {offsets = [0, 128], sizes = [8, 128], strides = [1, 1]} : vector<8x384xf32> to vector<8x128xf32>
    %216 = arith.addf %214, %215 : vector<8x128xf32>
    %217 = arith.negf %216 : vector<8x128xf32>
    %218 = math.exp %217 : vector<8x128xf32>
    %cst_39 = arith.constant 1.000000e+00 : f32
    %219 = vector.broadcast %cst_39 : f32 to vector<8x128xf32>
    %220 = arith.addf %219, %218 : vector<8x128xf32>
    %221 = arith.divf %219, %220 : vector<8x128xf32>
    %222 = vector.extract_strided_slice %203 {offsets = [0, 256], sizes = [8, 128], strides = [1, 1]} : vector<8x384xf32> to vector<8x128xf32>
    %223 = vector.extract_strided_slice %205 {offsets = [0, 256], sizes = [8, 128], strides = [1, 1]} : vector<8x384xf32> to vector<8x128xf32>
    %224 = arith.addf %223, %14 : vector<8x128xf32>
    %225 = arith.mulf %213, %224 : vector<8x128xf32>
    %226 = arith.addf %222, %225 : vector<8x128xf32>
    %227 = math.tanh %226 : vector<8x128xf32>
    %cst_40 = arith.constant 1.000000e+00 : f32
    %228 = vector.broadcast %cst_40 : f32 to vector<8x128xf32>
    %229 = arith.subf %228, %221 : vector<8x128xf32>
    %230 = arith.mulf %229, %227 : vector<8x128xf32>
    %231 = arith.mulf %221, %201 : vector<8x128xf32>
    %232 = arith.addf %230, %231 : vector<8x128xf32>
    %233 = vector.extract_strided_slice %10 {offsets = [0, 7, 0], sizes = [8, 1, 384], strides = [1, 1, 1]} : vector<8x8x384xf32> to vector<8x1x384xf32>
    %234 = vector.shape_cast %233 : vector<8x1x384xf32> to vector<8x384xf32>
    %235 = arith.truncf %232 : vector<8x128xf32> to vector<8x128xbf16>
    %cst_41 = arith.constant dense<0.000000e+00> : vector<8x384xf32>
    %236 = tpu.matmul %235, %11, %cst_41 {dimension_numbers = #tpu.dot_dimension_numbers<[1], [0], [0], [1], [0, 0, 1, 1], [], []>} : vector<8x128xbf16>, vector<128x384xbf16>, vector<8x384xf32> -> vector<8x384xf32>
    %237 = vector.extract_strided_slice %234 {offsets = [0, 0], sizes = [8, 128], strides = [1, 1]} : vector<8x384xf32> to vector<8x128xf32>
    %238 = vector.extract_strided_slice %236 {offsets = [0, 0], sizes = [8, 128], strides = [1, 1]} : vector<8x384xf32> to vector<8x128xf32>
    %239 = arith.addf %237, %238 : vector<8x128xf32>
    %240 = arith.negf %239 : vector<8x128xf32>
    %241 = math.exp %240 : vector<8x128xf32>
    %cst_42 = arith.constant 1.000000e+00 : f32
    %242 = vector.broadcast %cst_42 : f32 to vector<8x128xf32>
    %243 = arith.addf %242, %241 : vector<8x128xf32>
    %244 = arith.divf %242, %243 : vector<8x128xf32>
    %245 = vector.extract_strided_slice %234 {offsets = [0, 128], sizes = [8, 128], strides = [1, 1]} : vector<8x384xf32> to vector<8x128xf32>
    %246 = vector.extract_strided_slice %236 {offsets = [0, 128], sizes = [8, 128], strides = [1, 1]} : vector<8x384xf32> to vector<8x128xf32>
    %247 = arith.addf %245, %246 : vector<8x128xf32>
    %248 = arith.negf %247 : vector<8x128xf32>
    %249 = math.exp %248 : vector<8x128xf32>
    %cst_43 = arith.constant 1.000000e+00 : f32
    %250 = vector.broadcast %cst_43 : f32 to vector<8x128xf32>
    %251 = arith.addf %250, %249 : vector<8x128xf32>
    %252 = arith.divf %250, %251 : vector<8x128xf32>
    %253 = vector.extract_strided_slice %234 {offsets = [0, 256], sizes = [8, 128], strides = [1, 1]} : vector<8x384xf32> to vector<8x128xf32>
    %254 = vector.extract_strided_slice %236 {offsets = [0, 256], sizes = [8, 128], strides = [1, 1]} : vector<8x384xf32> to vector<8x128xf32>
    %255 = arith.addf %254, %14 : vector<8x128xf32>
    %256 = arith.mulf %244, %255 : vector<8x128xf32>
    %257 = arith.addf %253, %256 : vector<8x128xf32>
    %258 = math.tanh %257 : vector<8x128xf32>
    %cst_44 = arith.constant 1.000000e+00 : f32
    %259 = vector.broadcast %cst_44 : f32 to vector<8x128xf32>
    %260 = arith.subf %259, %252 : vector<8x128xf32>
    %261 = arith.mulf %260, %258 : vector<8x128xf32>
    %262 = arith.mulf %252, %232 : vector<8x128xf32>
    %263 = arith.addf %261, %262 : vector<8x128xf32>
    %c0_45 = arith.constant 0 : index
    %c0_46 = arith.constant 0 : index
    %264 = vector.load %arg9[%c0_45, %c0_46] : memref<8x128xf32, #tpu.memory_space<vmem>>, vector<8x128xf32>
    tpu.vector_store %arg9[%c0_45, %c0_46], %263 {strides = array<i32>} : memref<8x128xf32, #tpu.memory_space<vmem>>, vector<8x128xf32>,
    %c1_i32 = arith.constant 1 : i32
    %265 = arith.cmpi eq, %arg0, %c1_i32 : i32
    %266 = arith.extui %265 : i1 to i32
    %c0_i32_47 = arith.constant 0 : i32
    %267 = arith.cmpi ne, %266, %c0_i32_47 : i32
    scf.if %267 {
      %c0_48 = arith.constant 0 : index
      %c0_49 = arith.constant 0 : index
      %268 = vector.load %arg6[%c0_48, %c0_49] : memref<1x128xf32, #tpu.memory_space<vmem>>, vector<1x128xf32>
      %cst_50 = arith.constant dense<0.000000e+00> : vector<1x8xf32>
      %269 = tpu.matmul %268, %263, %cst_50 {dimension_numbers = #tpu.dot_dimension_numbers<[1], [1], [0], [0], [0, 0, 1, 0], [], []>} : vector<1x128xf32>, vector<8x128xf32>, vector<1x8xf32> -> vector<1x8xf32>
      %c0_51 = arith.constant 0 : index
      %c0_52 = arith.constant 0 : index
      %270 = vector.load %arg7[%c0_51, %c0_52] : memref<1x1xf32, #tpu.memory_space<vmem>>, vector<1x1xf32>
      %271 = vector.broadcast %270 : vector<1x1xf32> to vector<1x8xf32>
      %272 = arith.addf %269, %271 : vector<1x8xf32>
      %273 = arith.negf %272 : vector<1x8xf32>
      %274 = math.exp %273 : vector<1x8xf32>
      %cst_53 = arith.constant 1.000000e+00 : f32
      %275 = vector.broadcast %cst_53 : f32 to vector<1x8xf32>
      %276 = arith.addf %275, %274 : vector<1x8xf32>
      %277 = arith.divf %275, %276 : vector<1x8xf32>
      %c0_54 = arith.constant 0 : index
      %c0_55 = arith.constant 0 : index
      %278 = vector.load %arg8[%c0_54, %c0_55] : memref<1x8xf32, #tpu.memory_space<vmem>>, vector<1x8xf32>
      tpu.vector_store %arg8[%c0_54, %c0_55], %277 {strides = array<i32>} : memref<1x8xf32, #tpu.memory_space<vmem>>, vector<1x8xf32>,
    } else {
    }
    return
  }
  func.func @transform_0(%arg0: i32) -> (i32, i32, i32) {
    %c0_i32 = arith.constant 0 : i32
    %c0_i32_0 = arith.constant 0 : i32
    %c0_i32_1 = arith.constant 0 : i32
    return %c0_i32, %arg0, %c0_i32_0 : i32, i32, i32
  }
  func.func @transform_1(%arg0: i32) -> (i32, i32) {
    %c0_i32 = arith.constant 0 : i32
    %c0_i32_0 = arith.constant 0 : i32
    %c0_i32_1 = arith.constant 0 : i32
    return %c0_i32, %c0_i32_0 : i32, i32
  }
  func.func @transform_2(%arg0: i32) -> (i32, i32) {
    %c0_i32 = arith.constant 0 : i32
    %c0_i32_0 = arith.constant 0 : i32
    %c0_i32_1 = arith.constant 0 : i32
    return %c0_i32, %c0_i32_0 : i32, i32
  }
  func.func @transform_3(%arg0: i32) -> (i32, i32) {
    %c0_i32 = arith.constant 0 : i32
    %c0_i32_0 = arith.constant 0 : i32
    %c0_i32_1 = arith.constant 0 : i32
    return %c0_i32, %c0_i32_0 : i32, i32
  }
  func.func @transform_4(%arg0: i32) -> (i32, i32) {
    %c0_i32 = arith.constant 0 : i32
    %c0_i32_0 = arith.constant 0 : i32
    %c0_i32_1 = arith.constant 0 : i32
    return %c0_i32, %c0_i32_0 : i32, i32
  }
  func.func @transform_5(%arg0: i32) -> (i32, i32) {
    %c0_i32 = arith.constant 0 : i32
    %c0_i32_0 = arith.constant 0 : i32
    %c0_i32_1 = arith.constant 0 : i32
    return %c0_i32, %c0_i32_0 : i32, i32
  }
  func.func @transform_6(%arg0: i32) -> (i32, i32) {
    %c0_i32 = arith.constant 0 : i32
    %c0_i32_0 = arith.constant 0 : i32
    %c0_i32_1 = arith.constant 0 : i32
    return %c0_i32, %c0_i32_0 : i32, i32
  }
  func.func @transform_7(%arg0: i32) -> (i32, i32) {
    %c0_i32 = arith.constant 0 : i32
    %c0_i32_0 = arith.constant 0 : i32
    %c0_i32_1 = arith.constant 0 : i32
    return %c0_i32, %c0_i32_0 : i32, i32
  }
}

</mosaic_0001>

<bundles_post_ra>
// kernel: tpu_custom_call.1
= control target key start
LH: loop header
LB: loop body
LE: loop exit
PB: predicated region body
PF: predicated region fallthrough
CT: control target
= control target key end

     0   :  { %s6629_s0 = inlined_call_operand.hbm [shape: bf16[8,16,32], index: 0, kind: input, shape index: {}]   ;;  %s6630_s1 = inlined_call_operand.hbm [shape: bf16[32,384], index: 1, kind: input, shape index: {}]   ;;  %s6631_s2 = inlined_call_operand.hbm [shape: bf16[128,384], index: 2, kind: input, shape index: {}]   ;;  %s6632_s3 = inlined_call_operand.vmem [shape: f32[1,384], index: 3, kind: input, shape index: {}]   ;;  %s6633_s4 = inlined_call_operand.vmem [shape: f32[1,128], index: 4, kind: input, shape index: {}]   ;;  %s6634_s5 = inlined_call_operand.vmem [shape: f32[1,128], index: 5, kind: input, shape index: {}]   ;;  %s6635_s6 = inlined_call_operand.<no memory space> [shape: f32[1,1], index: 6, kind: input, shape index: {}]   ;;  %s6636_s7 = inlined_call_operand.hbm [shape: f32[1,8], index: 7, kind: output, shape index: {}]  }
   0x1   :  { %v12_v0 = vstv %s6635_s6 }
   0x2   :  { %13 = vst [vmem:[#allocation3] sm:$0x1] %v12_v0 }
   0x3   :  { %14 = vsyncpa [#allocation5], 0 }
   0x4   :  { %16 = vsyncpa [#allocation5 + $0x1], 0 }
   0x5   :  { %17 = vsyncpa [#allocation8], 0 }
   0x6   :  { %18 = vsyncpa [#allocation6], 0  ;;  %s5285_s26 = smov 0   ;;  %s5287_s27 = smov 0  }
   0x7   :  { %s5289_s28 = smov 0   ;;  %s5291_s29 = smov 0  }
   0x8 LB: > { %s5304_s6 = sadd.s32 4294967295, %s5224_s29   ;;  %s5307_s30 = sadd.s32 1, %s5224_s29   ;;  %s5224_s29 = sphi %s5291_s29, %s6869_s29   ;;  %s5220_s28 = sphi %s5289_s28, %s6868_s28   ;;  %s5216_s27 = sphi %s5287_s27, %s6867_s27   ;;  %s5212_s26 = sphi %s5285_s26, %s6866_s26  }
   0x9   : > { %s28_s8 = ssub.s32 %s5224_s29, %s5307_s30  ;;  %s31_s9 = sadd.s32 1, %s5220_s28 }
   0xa   : > { %p29_p0 = scmp.eq.s32.totalorder %s28_s8, 0  ;;  %p38_p1 = scmp.ne.s32.totalorder %s5220_s28, %s5216_s27 }
   0xb   : > { %p39_p2 = scmp.eq.s32.totalorder %s5224_s29, 0  ;;  %p44_p3 = scmp.ne.s32.totalorder %s5216_s27, %s5212_s26 }
   0xc   : > { %s5317_s10 = scalar_select %p29_p0, %s5220_s28, %s31_s9  }
   0xd   : > { %p5319_p4 = por %p39_p2, %p38_p1  ;;  %p6637_p5 = scmp.eq.s32.totalorder %s5304_s6, 0 }
   0xe   : > { %p3791_p6 = scmp.ge.s32.totalorder %s5224_s29, 1  ;;  %p202_p7 = scmp.lt.s32.totalorder %s5224_s29, 3 }
   0xf   : > { %p5328_p8 = por %p6637_p5, %p44_p3  ;;  %s5226_s14 = smov [#allocation7]  }
  0x10   : > { %p5333_p10 = pnand %p3791_p6, %p202_p7  ;;  %s214_s15 = sshll.u32 %s5226_s14, 4  ;;  %s215_s15 = int_to_ptr.vmem [resolvable:$true] %s214_s15 }
  0x11   : > { %s6729_s12 = scalar_select %p5328_p8, 1, 0 }
  0x12   : > { %s6730_s13 = scalar_select %p5333_p10, 1, 0 }
  0x13   : > { %p4250_p11 = pneg %p5333_p10  ;;  %p4263_p13 = scmp.lt.s32.totalorder %s5224_s29, 2 }
  0x14   : > { %s253_s17 = sand.u32 1, %s5220_s28   ;;  %s5089_s19 = scalar_lea.vmem %s215_s15, 768 }
  0x15   : > { %p5341_p12 = pnand %p4250_p11, %p6637_p5  ;;  %p5349_p0 = pnand %p4263_p13, %p5319_p4 }
  0x16   : > { %p5090_p2 = scmp.ne.s32.totalorder %s215_s15, %s5089_s19  ;;  %p5097_p7 = scmp.lt.s32.totalorder %s215_s15, %s215_s15 }
  0x17   : > { %p5080_p1 = pneg %p5341_p12  ;;  %p5098_p11 = scmp.lt.s32.totalorder %s5089_s19, %s5089_s19 }
  0x19   : > { %p5092_p3 = pnand %p5090_p2, %p5080_p1  ;;  %p5099_p9 = por %p5098_p11, %p5097_p7 }
  0x1b   : > { %p5093_p6 = pneg %p5092_p3 }
  0x1d   : > { %p5100_p5 = pnand %p5099_p9, %p5093_p6 }
  0x1f   : > { %5103 = shalt.err (!%p5100_p5)
}
  0x20   : > { %s5227_s20 = smov 192   ;;  %s5228_s21 = smov 12  }
  0x21   : > { %4253 = dma.hbm_to_vmem [thread:$0]  (!%p5341_p12), %s6630_s1, 768, %s215_s15, [#allocation8], %s5227_s20, %s5227_s20, %s5228_s21  }
  0x22   : > { %s5229_s24 = smov [#allocation9]  }
  0x23   : > { %s227_s25 = sshll.u32 %s5229_s24, 4  ;;  %s228_s25 = int_to_ptr.vmem [resolvable:$true] %s227_s25 }
  0x24   : > { %s5115_s26 = scalar_lea.vmem %s228_s25, 3072  ;;  %p5123_p9 = scmp.lt.s32.totalorder %s228_s25, %s228_s25 }
  0x25   : > { %p5116_p4 = scmp.ne.s32.totalorder %s228_s25, %s5115_s26  ;;  %p5124_p5 = scmp.lt.s32.totalorder %s5115_s26, %s5115_s26 }
  0x27   : > { %p5118_p13 = pnand %p5116_p4, %p5080_p1  ;;  %p5125_p3 = por %p5124_p5, %p5123_p9 }
  0x29   : > { %p5119_p2 = pneg %p5118_p13 }
  0x2b   : > { %p5126_p6 = pnand %p5125_p3, %p5119_p2 }
  0x2d   : > { %5129 = shalt.err (!%p5126_p6)
}
  0x2e   : > { %4256 = dma.hbm_to_vmem [thread:$0]  (!%p5341_p12), %s6631_s2, 3072, %s228_s25, [#allocation8], %s5227_s20, %s5227_s20, %s5228_s21  }
  0x2f   : > { %s3795_s11 = sshll.u32 %s253_s17, 5  ;;  %s3796_s14 = sshll.u32 %s5224_s29, 6 }
  0x30   : > { %s5377_s22 = scalar_lea.hbm %s6629_s0, %s3796_s14  ;;  %s257_s16 = scalar_lea.vmem [#allocation4], %s3795_s11 }
  0x31   : > { %s263_s23 = sshll.u32 %s257_s16, 4  ;;  %s5383_s24 = scalar_lea.sflag [#allocation5], %s253_s17  ;;  %s5379_s23 = int_to_ptr.vmem [resolvable:$true] %s263_s23 }
  0x32   : > { %s5130_s26 = scalar_lea.hbm %s5377_s22, 512  ;;  %p5132_p1 = pneg %p5349_p0 }
  0x33   : > { %p5131_p12 = scmp.ne.s32.totalorder %s5377_s22, %s5130_s26  ;;  %s5135_s21 = scalar_lea.hbm %s6629_s0, 1024 }
  0x34   : > { %p5136_p4 = scmp.lt.s32.totalorder %s5377_s22, %s6629_s0  ;;  %p5137_p13 = scmp.lt.s32.totalorder %s5135_s21, %s5130_s26 }
  0x35   : > { %p5133_p7 = pnand %p5132_p1, %p5131_p12 }
  0x36   : > { %p5138_p2 = por %p5137_p13, %p5136_p4 }
  0x37   : > { %p5134_p11 = pneg %p5133_p7 }
  0x39   : > { %p5139_p9 = pnand %p5138_p2, %p5134_p11 }
  0x3b   : > { %5142 = shalt.err (!%p5139_p9)
}
  0x3c   : > { %s5143_s17 = scalar_lea.vmem %s5379_s23, 512  ;;  %s5230_s9 = smov [#allocation4]  }
  0x3d   : > { %p5144_p5 = scmp.ne.s32.totalorder %s5379_s23, %s5143_s17  ;;  %s5148_s11 = sshll.u32 %s5230_s9, 4  ;;  %s5149_s11 = int_to_ptr.vmem [resolvable:$false] %s5148_s11 }
  0x3e   : > { %s5150_s14 = scalar_lea.vmem %s5149_s11, 1024  ;;  %p5151_p12 = scmp.lt.s32.totalorder %s5379_s23, %s5149_s11 }
  0x3f   : > { %p5146_p3 = pnand %p5144_p5, %p5132_p1  ;;  %p5152_p7 = scmp.lt.s32.totalorder %s5150_s14, %s5143_s17 }
  0x41   : > { %p5147_p6 = pneg %p5146_p3  ;;  %p5153_p8 = por %p5152_p7, %p5151_p12 }
  0x43   : > { %p5154_p10 = pnand %p5153_p8, %p5147_p6 }
  0x45   : > { %5157 = shalt.err (!%p5154_p10)
}
  0x46   : > { %s5231_s15 = smov 128   ;;  %s5232_s19 = smov 64  }
  0x47   : > { %s5233_s16 = smov 4   ;;  %p6733_p1 = scmp.ne.s32.totalorder %s6730_s13, 0 }
  0x48   : > { %4260 = dma.hbm_to_vmem [thread:$0]  (!%p5349_p0), %s5377_s22, 512, %s5379_s23, %s5383_s24, %s5231_s15, %s5232_s19, %s5233_s16  }
  0x49   : > { %275 = sbr.rel (%p6733_p1) target bundleno = 2530 (0x9e2), region = 48 }
  0x4e   : > { %s277_s26 = sand.u32 1, %s5216_s27   ;;  %p6734_p8 = scmp.ne.s32.totalorder %s6729_s12, 0 }
  0x4f   : > { %s3798_s29 = sshll.u32 %s277_s26, 5  ;;  %s278_s20 = scalar_lea.sflag [#allocation5], %s277_s26 }
  0x50   : > { %s5407_s21 = scalar_lea.vmem [#allocation4], %s3798_s29 }
  0x51   : > { %5199 = dma.done.wait (%p6734_p8), %s278_s20, 512  }
  0x52   : > { %5201 = vsyncadd (%p6734_p8), %s278_s20, 4294966784  ;;  %p6735_p10 = scmp.eq.s32.totalorder %s5304_s6, 0 }
  0x54   : > { %5203 = dma.done.wait (%p6735_p10), [#allocation8], 3840   ;;  %p6736_p0 = pmov %p6735_p10 }
  0x55   : > { %p6737_p11 = scmp.ne.s32.totalorder %s5304_s6, 0 }
  0x56   : > { %5205 = vsyncadd (%p6736_p0), [#allocation8], 4294963456 }
  0x57   : > { %319 = sbr.rel (%p6737_p11) target bundleno = 94 (0x5e), region = 64 }
  0x5c   : > { %v5234_v1 = vmov 0.0  }
  0x5d   : > { %320 = vst [vmem:[#allocation2] sm:$0xff] %v5234_v1 }
  0x5e PF: > { %v4315_v2 = vld [vmem:[#allocation7 + $0x1c] ss:$12 sps:$4 sm:$0xff]   ;;  %v4317_v3 = vld [vmem:[#allocation7 + $0x18] ss:$12 sps:$4 sm:$0xff]   ;;  %v6641_v4 = vmov 0   ;;  %vm406_vm0 = vcmask 261120   ;;  %v339_v47 = vlaneseq }
  0x5f   : > { %451 = vmatprep.mubr.bf16.mxu0 %v6641_v4  ;;  %431 = vmatprep.subr.bf16.mxu0 %v4315_v2  ;;  %v4318_v5 = vld [vmem:[#allocation7 + $0x4] ss:$12 sps:$4 sm:$0xff]   ;;  %v4320_v6 = vld [vmem:[#allocation7] ss:$12 sps:$4 sm:$0xff]   ;;  %v5421_v8 = vld [vmem:[#allocation9 + $0xac] ss:$12 sps:$4 sm:$0xff]  }
  0x60   : > { %432 = vmatpush1.bf16.msra.mxu0 %v4317_v3  ;;  %v4321_v7 = vld [vmem:[%s5407_s21] sm:$0xff]   ;;  %6738 = vst [vmem:[#allocation14_spill] sm:$0xff] %v5421_v8  ;;  %v5435_v12 = vld [vmem:[#allocation9 + $0x7c] ss:$12 sps:$4 sm:$0xff]   ;;  %v5438_v15 = vld [vmem:[#allocation9 + $0x78] ss:$12 sps:$4 sm:$0xff]  }
  0x61   : > { %433 = vmatprep.subr.bf16.mxu0 %v4318_v5  ;;  %4063 = vmatprep.mubr.msk.bf16.mxu1 %vm406_vm0, %v4321_v7  ;;  %v5424_v9 = vld [vmem:[#allocation9 + $0xa8] ss:$12 sps:$4 sm:$0xff]   ;;  %v5431_v11 = vld [vmem:[#allocation9 + $0x90] ss:$12 sps:$4 sm:$0xff]   ;;  %v4343_v16 = vld [vmem:[#allocation7 + $0x8] ss:$12 sps:$4 sm:$0xff]  }
  0x62   : > { %v5427_v10 = vld [vmem:[#allocation9 + $0x94] ss:$12 sps:$4 sm:$0xff]   ;;  %v4339_v13 = vld [vmem:[#allocation7 + $0x20] ss:$12 sps:$4 sm:$0xff]   ;;  %v5450_v19 = vld [vmem:[#allocation9 + $0x4c] ss:$12 sps:$4 sm:$0xff]  }
  0x63   : > { %v4328_v14 = vld [vmem:[%s5407_s21 + $0x8] sm:$0xff]   ;;  %4059 = vmatprep.subr.bf16.mxu1 %v4339_v13  ;;  %v5442_v17 = vld [vmem:[#allocation9 + $0x64] ss:$12 sps:$4 sm:$0xff]   ;;  %v5446_v18 = vld [vmem:[#allocation9 + $0x60] ss:$12 sps:$4 sm:$0xff]   ;;  %v6643_v22 = vmov 0.0  }
  0x64   : > { %434 = vmatpush1.bf16.msra.mxu0 %v4320_v6  ;;  %4060 = vmatpush3.bf16.msra.mxu1 %v4339_v13  ;;  %v5452_v20 = vld [vmem:[#allocation9 + $0xb0] ss:$12 sps:$4 sm:$0xff]   ;;  %v4335_v21 = vld [vmem:[%s5407_s21 + $0x10] sm:$0xff]   ;;  %v5456_v23 = vld [vmem:[#allocation9 + $0x48] ss:$12 sps:$4 sm:$0xff]   ;;  %vm5237_vm1 = vmmov 0  }
  0x65   : > { %726 = vmatprep.subr.bf16.mxu0 %v5421_v8  ;;  %4061 = vmatprep.subr.bf16.mxu1 %v4343_v16  ;;  %v5459_v24 = vld [vmem:[#allocation9 + $0x34] ss:$12 sps:$4 sm:$0xff]   ;;  %v5464_v25 = vld [vmem:[#allocation9 + $0x98] ss:$12 sps:$4 sm:$0xff]   ;;  %v5470_v26 = vld [vmem:[#allocation9 + $0x30] ss:$12 sps:$4 sm:$0xff]  }
  0x66   : > { %v5474_v27 = vld [vmem:[#allocation9 + $0x1c] ss:$12 sps:$4 sm:$0xff]   ;;  %v5477_v28 = vld [vmem:[#allocation9 + $0x80] ss:$12 sps:$4 sm:$0xff]   ;;  %v5482_v30 = vld [vmem:[#allocation9 + $0x18] ss:$12 sps:$4 sm:$0xff]  }
  0x67   : > { %3812 = vmatmul.mubr.msk.bf16.vlgmr.msra.gmra.mxu0 %vm406_vm0, %v4321_v7  ;;  %6739 = vst [vmem:[#allocation15_spill] sm:$0xff] %v5474_v27  ;;  %v4344_v29 = vld [vmem:[%s5407_s21 + $0x18] sm:$0xff]   ;;  %6740 = vst [vmem:[#allocation16_spill] sm:$0xff] %v5482_v30  ;;  %v5486_v31 = vld [vmem:[#allocation9 + $0x4] ss:$12 sps:$4 sm:$0xff]   ;;  %v5561_v51 = vshrl.u32 %v339_v47, 7 }
  0x68   : > { %727 = vmatpush1.bf16.msra.mxu0 %v5424_v9  ;;  %461 = vmatprep.mubr.bf16.mxu0 %v6641_v4  ;;  %6741 = vst [vmem:[#allocation17_spill] sm:$0xff] %v5486_v31  ;;  %v5489_v32 = vld [vmem:[#allocation9 + $0x68] ss:$12 sps:$4 sm:$0xff]   ;;  %v5496_v33 = vld [vmem:[#allocation9] ss:$12 sps:$4 sm:$0xff]   ;;  %vm1065_vm2 = vcmask 1041409  }
  0x69   : > { %728 = vmatprep.subr.bf16.mxu0 %v5427_v10  ;;  %4062 = vmatpush3.bf16.msra.mxu1 %v4343_v16  ;;  %6742 = vst [vmem:[#allocation18_spill] sm:$0xff] %v5496_v33  ;;  %v5499_v34 = vld [vmem:[#allocation2] sm:$0xff]  ;;  %v5503_v35 = vld [vmem:[#allocation9 + $0x50] ss:$12 sps:$4 sm:$0xff]   ;;  %6745 = vst [vmem:[#allocation21_spill] sm:$0xff] %v5561_v51  ;;  %v6640_v55 = vsub.s32 0, %v5561_v51 }
  0x6a   : > { %4071 = vmatprep.subr.bf16.mxu1 %v6643_v22  ;;  %v597_v36 = vpack.c.bf16 %v5499_v34, %v5499_v34  ;;  %v5510_v37 = vld [vmem:[#allocation9 + $0x38] ss:$12 sps:$4 sm:$0xff]   ;;  %v5517_v38 = vld [vmem:[#allocation9 + $0x20] ss:$12 sps:$4 sm:$0xff]   ;;  %v5523_v39 = vld [vmem:[#allocation9 + $0x8] ss:$12 sps:$4 sm:$0xff]  }
  0x6b   : > { %6743 = vst [vmem:[#allocation19_spill] sm:$0xff] %v5517_v38  ;;  %6744 = vst [vmem:[#allocation20_spill] sm:$0xff] %v5523_v39  ;;  %v345_v56 = vsub.s32 1, %v5561_v51  ;;  %v5570_v57 = vld [vmem:[%s6632_s3] sm:$0x7]  ;;  %vm1068_vm3 = vcmask 1042434  }
  0x6c   : > { %729 = vmatpush1.bf16.msra.mxu0 %v5431_v11  ;;  %4064 = vmatmul.mubr.msk.bf16.vlgmr.msra.gmra.mxu1 %vm406_vm0, %v4328_v14  ;;  %v342_v61 = vrot.slane %v5570_v57, %v6640_v55  ;;  %vm1071_vm4 = vcmask 1043459   ;;  %vm1074_vm5 = vcmask 1044484   ;;  %vm1077_vm6 = vcmask 1045509   ;;  %p3973_p4 = scmp.ne.s32.totalorder %s5304_s6, 1 }
  0x6d   : > { %730 = vmatprep.subr.bf16.mxu0 %v5435_v12  ;;  %4072 = vmatpush3.bf16.msra.mxu1 %v5452_v20  ;;  %v5578_v62 = vrot.slane %v5570_v57, %v345_v56  ;;  %vm1080_vm7 = vcmask 1046534   ;;  %vm1083_vm8 = vcmask 1047559  }
  0x6e   : > { %4073 = vmatprep.subr.bf16.mxu1 %v6643_v22  ;;  %4067 = vmatprep.mubr.msk.bf16.mxu1 %vm406_vm0, %v4335_v21 }
  0x6f   : > { %3813 = vmatmul.mubr.msk.bf16.gmra.mxu0 %vm406_vm0, %v4328_v14 }
  0x70   : > { %731 = vmatpush1.bf16.msra.mxu0 %v5438_v15  ;;  %471 = vmatprep.mubr.bf16.mxu0 %v6641_v4 }
  0x71   : > { %732 = vmatprep.subr.bf16.mxu0 %v5442_v17  ;;  %4074 = vmatpush3.bf16.msra.mxu1 %v5464_v25 }
  0x72   : > { %4075 = vmatprep.subr.bf16.mxu1 %v6643_v22 }
  0x74   : > { %733 = vmatpush1.bf16.msra.mxu0 %v5446_v18  ;;  %4068 = vmatmul.mubr.msk.bf16.gmra.mxu1 %vm406_vm0, %v4344_v29 }
  0x75   : > { %734 = vmatprep.subr.bf16.mxu0 %v5450_v19  ;;  %4076 = vmatpush3.bf16.msra.mxu1 %v5477_v28 }
  0x76   : > { %4077 = vmatprep.subr.bf16.mxu1 %v6643_v22  ;;  %4087 = vmatprep.mubr.msk.bf16.mxu1 %vm5237_vm1, %v6643_v22 }
  0x77   : > { %3814 = vmatmul.mubr.msk.bf16.gmra.mxu0 %vm406_vm0, %v4335_v21 }
  0x78   : > { %735 = vmatpush1.bf16.msra.mxu0 %v5456_v23  ;;  %481 = vmatprep.mubr.bf16.mxu0 %v6641_v4 }
  0x79   : > { %736 = vmatprep.subr.bf16.mxu0 %v5459_v24  ;;  %4078 = vmatpush3.bf16.msra.mxu1 %v5489_v32 }
  0x7a   : > { %4079 = vmatprep.subr.bf16.mxu1 %v6643_v22 }
  0x7c   : > { %737 = vmatpush1.bf16.msra.mxu0 %v5470_v26 }
  0x7d   : > { %738 = vmatprep.subr.bf16.mxu0 %v5474_v27  ;;  %4080 = vmatpush3.bf16.msra.mxu1 %v5503_v35 }
  0x7e   : > { %4081 = vmatprep.subr.bf16.mxu1 %v6643_v22 }
  0x7f   : > { %3815 = vmatmul.mubr.msk.bf16.gmra.mxu0 %vm406_vm0, %v4344_v29 }
  0x80   : > { %739 = vmatpush1.bf16.msra.mxu0 %v5482_v30  ;;  %758 = vmatprep.mubr.bf16.mxu0 %v6641_v4 }
  0x81   : > { %740 = vmatprep.subr.bf16.mxu0 %v5486_v31  ;;  %4082 = vmatpush3.bf16.msra.mxu1 %v5510_v37 }
  0x82   : > { %4083 = vmatprep.subr.bf16.mxu1 %v6643_v22 }
  0x84   : > { %741 = vmatpush1.bf16.msra.mxu0 %v5496_v33 }
  0x85   : > { %1087 = vmatprep.subr.bf16.mxu0 %v5421_v8  ;;  %4084 = vmatpush3.bf16.msra.mxu1 %v5517_v38 }
  0x86   : > { %4085 = vmatprep.subr.bf16.mxu1 %v6643_v22 }
  0x87   : > { %759 = vmatmul.mubr.bf16.vlgmr.msra.gmra.mxu0 %v597_v36 }
  0x88   : > { %1088 = vmatpush1.bf16.msra.mxu0 %v5424_v9  ;;  %1119 = vmatprep.mubr.bf16.mxu0 %v6641_v4 }
  0x89   : > { %1089 = vmatprep.subr.bf16.mxu0 %v5427_v10  ;;  %4086 = vmatpush3.bf16.msra.mxu1 %v5523_v39 }
  0x8a   : > { %4091 = vmatprep.subr.bf16.mxu1 %v6643_v22 }
  0x8c   : > { %1090 = vmatpush1.bf16.msra.mxu0 %v5431_v11  ;;  %4088 = vmatmul.mubr.bf16.vlgmr.msra.gmra.mxu1 %v597_v36 }
  0x8d   : > { %1091 = vmatprep.subr.bf16.mxu0 %v5435_v12  ;;  %4092 = vmatpush3.bf16.msra.mxu1 %v5452_v20 }
  0x8e   : > { %4093 = vmatprep.subr.bf16.mxu1 %v6643_v22  ;;  %4107 = vmatprep.mubr.msk.bf16.mxu1 %vm5237_vm1, %v6643_v22 }
  0x90   : > { %1092 = vmatpush1.bf16.msra.mxu0 %v5438_v15 }
  0x91   : > { %1093 = vmatprep.subr.bf16.mxu0 %v5442_v17  ;;  %4094 = vmatpush3.bf16.msra.mxu1 %v5464_v25 }
  0x92   : > { %4095 = vmatprep.subr.bf16.mxu1 %v6643_v22 }
  0x94   : > { %1094 = vmatpush1.bf16.msra.mxu0 %v5446_v18 }
  0x95   : > { %1095 = vmatprep.subr.bf16.mxu0 %v5450_v19  ;;  %4096 = vmatpush3.bf16.msra.mxu1 %v5477_v28 }
  0x96   : > { %4097 = vmatprep.subr.bf16.mxu1 %v6643_v22 }
  0x98   : > { %1096 = vmatpush1.bf16.msra.mxu0 %v5456_v23 }
  0x99   : > { %1097 = vmatprep.subr.bf16.mxu0 %v5459_v24  ;;  %4098 = vmatpush3.bf16.msra.mxu1 %v5489_v32 }
  0x9a   : > { %4099 = vmatprep.subr.bf16.mxu1 %v6643_v22 }
  0x9c   : > { %1098 = vmatpush1.bf16.msra.mxu0 %v5470_v26 }
  0x9d   : > { %1099 = vmatprep.subr.bf16.mxu0 %v5474_v27  ;;  %4100 = vmatpush3.bf16.msra.mxu1 %v5503_v35 }
  0x9e   : > { %4101 = vmatprep.subr.bf16.mxu1 %v6643_v22 }
  0xa0   : > { %1100 = vmatpush1.bf16.msra.mxu0 %v5482_v30 }
  0xa1   : > { %1101 = vmatprep.subr.bf16.mxu0 %v5486_v31  ;;  %4102 = vmatpush3.bf16.msra.mxu1 %v5510_v37 }
  0xa2   : > { %4103 = vmatprep.subr.bf16.mxu1 %v6643_v22 }
  0xa4   : > { %1102 = vmatpush1.bf16.msra.mxu0 %v5496_v33 }
  0xa5   : > { %1449 = vmatprep.subr.bf16.mxu0 %v5421_v8  ;;  %4104 = vmatpush3.bf16.msra.mxu1 %v5517_v38 }
  0xa6   : > { %4105 = vmatprep.subr.bf16.mxu1 %v6643_v22 }
  0xa9   : > { %4106 = vmatpush3.bf16.msra.mxu1 %v5523_v39 }
  0xaa   : > { %4111 = vmatprep.subr.bf16.mxu1 %v6643_v22 }
 0x127   : > { %v453_v40 = vpop.f32.mrf.mxu0 }
 0x128   : > { %v5582_v2 = vadd.f32 %v453_v40, %v342_v61 }
 0x129   : > { %v455_v41 = vpop.f32.mrf.mxu0 }
 0x12a   : > { %6746 = vst [vmem:[#allocation22_spill] sm:$0xff] %v5582_v2  ;;  %v5585_v3 = vadd.f32 %v455_v41, %v5578_v62 }
 0x12b   : > { %v457_v42 = vpop.f32.mrf.mxu0 }
 0x12c   : > { %v5559_v49 = vpop.f32.mrf.mxu1  ;;  %6747 = vst [vmem:[#allocation23_spill] sm:$0xff] %v5585_v3  ;;  %v5587_v5 = vadd.f32 %v457_v42, %v342_v61 }
 0x12d   : > { %v459_v43 = vpop.f32.mrf.mxu0 }
 0x12e   : > { %v5563_v53 = vpop.f32.mrf.mxu1  ;;  %v5592_v7 = vadd.f32 %v459_v43, %v5578_v62 }
 0x12f   : > { %v463_v44 = vpop.f32.mrf.mxu0 }
 0x130   : > { %v5572_v59 = vpop.f32.mrf.mxu1  ;;  %v5594_v13 = vadd.f32 %v463_v44, %v342_v61 }
 0x131   : > { %v465_v45 = vpop.f32.mrf.mxu0 }
 0x132   : > { %v5580_v0 = vpop.f32.mrf.mxu1  ;;  %6748 = vst [vmem:[#allocation24_spill] sm:$0xff] %v5594_v13  ;;  %v5597_v14 = vadd.f32 %v465_v45, %v5578_v62 }
 0x133   : > { %v467_v46 = vpop.f32.mrf.mxu0 }
 0x134   : > { %v5589_v6 = vpop.f32.mrf.mxu1  ;;  %v5599_v16 = vadd.f32 %v467_v46, %v342_v61 }
 0x135   : > { %v469_v48 = vpop.f32.mrf.mxu0 }
 0x136   : > { %6749 = vst [vmem:[#allocation25_spill] sm:$0xff] %v5599_v16  ;;  %v5602_v29 = vadd.f32 %v469_v48, %v5578_v62  ;;  %v5621_v55 = vpop.f32.mrf.mxu1 }
 0x137   : > { %v473_v50 = vpop.f32.mrf.mxu0 }
 0x138   : > { %v5604_v36 = vadd.f32 %v473_v50, %v342_v61 }
 0x139   : > { %v475_v52 = vpop.f32.mrf.mxu0 }
 0x13a   : > { %6750 = vst [vmem:[#allocation26_spill] sm:$0xff] %v5604_v36  ;;  %v5607_v40 = vadd.f32 %v475_v52, %v5578_v62 }
 0x13b   : > { %v477_v54 = vpop.f32.mrf.mxu0 }
 0x13c   : > { %v5609_v41 = vadd.f32 %v477_v54, %v342_v61 }
 0x13d   : > { %v479_v58 = vpop.f32.mrf.mxu0 }
 0x13e   : > { %6751 = vst [vmem:[#allocation27_spill] sm:$0xff] %v5609_v41  ;;  %v5612_v42 = vadd.f32 %v479_v58, %v5578_v62 }
 0x13f   : > { %v483_v60 = vpop.f32.mrf.mxu0 }
 0x140   : > { %v5614_v43 = vadd.f32 %v483_v60, %v342_v61 }
 0x141   : > { %v485_v63 = vpop.f32.mrf.mxu0 }
 0x142   : > { %v5617_v44 = vadd.f32 %v485_v63, %v5578_v62 }
 0x143   : > { %v487_v1 = vpop.f32.mrf.mxu0 }
 0x144   : > { %v5619_v45 = vadd.f32 %v487_v1, %v342_v61 }
 0x145   : > { %v489_v21 = vpop.f32.mrf.mxu0 }
 0x147   : > { %v760_v46 = vpop.f32.mrf.mxu0 }
 0x148   : > { %v808_v47 = vrot.slane %v760_v46, 1  ;;  %v809_v48 = vrot.slane %v760_v46, 2  ;;  %v810_v50 = vrot.slane %v760_v46, 3  ;;  %v811_v56 = vrot.slane %v760_v46, 4 }
 0x149   : > { %v812_v52 = vrot.slane %v760_v46, 5  ;;  %v813_v54 = vrot.slane %v760_v46, 6  ;;  %v814_v4 = vrot.slane %v760_v46, 7  ;;  %v823_v58 = vadd.f32 %v760_v46, %v5582_v2  ;;  %v762_v22 = vpop.f32.mrf.mxu0 }
 0x14a   : > { %v824_v60 = vadd.f32 %v808_v47, %v5587_v5  ;;  %v825_v63 = vadd.f32 %v809_v48, %v5594_v13  ;;  %v826_v61 = vadd.f32 %v810_v50, %v5599_v16  ;;  %v827_v1 = vadd.f32 %v811_v56, %v5604_v36  ;;  %v5632_v47 = vpop.f32.mrf.mxu1 }
 0x14b   : > { %v828_v8 = vadd.f32 %v812_v52, %v5609_v41  ;;  %v829_v39 = vadd.f32 %v813_v54, %v5614_v43  ;;  %v830_v33 = vadd.f32 %v814_v4, %v5619_v45  ;;  %v3845_v31 = vmul.f32 -1.442695, %v823_v58  ;;  %v764_v38 = vpop.f32.mrf.mxu0 }
 0x14c   : > { %v3846_v30 = vmul.f32 -1.442695, %v824_v60  ;;  %v3847_v27 = vmul.f32 -1.442695, %v825_v63  ;;  %v3848_v46 = vmul.f32 -1.442695, %v826_v61  ;;  %v895_v2 = vadd.f32 %v762_v22, %v5585_v3  ;;  %v5635_v3 = vpop.f32.mrf.mxu1 }
 0x14d   : > { %4359 = vpow2.f32 %v3845_v31  ;;  %v3849_v48 = vmul.f32 -1.442695, %v827_v1  ;;  %v3850_v50 = vmul.f32 -1.442695, %v828_v8  ;;  %v3851_v16 = vmul.f32 -1.442695, %v829_v39  ;;  %v765_v56 = vpop.f32.mrf.mxu0 }
 0x14e   : > { %4361 = vpow2.f32 %v3846_v30  ;;  %v3852_v52 = vmul.f32 -1.442695, %v830_v33  ;;  %v880_v41 = vrot.slane %v762_v22, 1  ;;  %v881_v54 = vrot.slane %v762_v22, 2  ;;  %v801_v56 = vpop.f32.mrf.mxu1 }
 0x14f   : > { %4363 = vpow2.f32 %v3847_v27  ;;  %v882_v4 = vrot.slane %v762_v22, 3  ;;  %v883_v58 = vrot.slane %v762_v22, 4  ;;  %v884_v38 = vrot.slane %v762_v22, 5 }
 0x150   : > { %4365 = vpow2.f32 %v3848_v46  ;;  %v885_v60 = vrot.slane %v762_v22, 6  ;;  %v886_v63 = vrot.slane %v762_v22, 7  ;;  %v896_v61 = vadd.f32 %v880_v41, %v5592_v7 }
 0x151   : > { %4367 = vpow2.f32 %v3849_v48  ;;  %v897_v8 = vadd.f32 %v881_v54, %v5597_v14  ;;  %v898_v31 = vadd.f32 %v882_v4, %v5602_v29  ;;  %v899_v30 = vadd.f32 %v883_v58, %v5607_v40 }
 0x152   : > { %v5641_v33 = vadd.f32 %v489_v21, %v5578_v62  ;;  %4369 = vpow2.f32 %v3850_v50  ;;  %v900_v27 = vadd.f32 %v884_v38, %v5612_v42  ;;  %v901_v39 = vadd.f32 %v885_v60, %v5617_v44  ;;  %v4089_v62 = vpop.f32.mrf.mxu1 }
 0x153   : > { %4371 = vpow2.f32 %v3851_v16  ;;  %v3853_v22 = vmul.f32 -1.442695, %v895_v2  ;;  %v3854_v41 = vmul.f32 -1.442695, %v896_v61  ;;  %v3855_v1 = vmul.f32 -1.442695, %v897_v8 }
 0x154   : > { %6752 = vst [vmem:[#allocation28_spill] sm:$0xff] %v5641_v33  ;;  %4373 = vpow2.f32 %v3852_v52  ;;  %v902_v46 = vadd.f32 %v886_v63, %v5641_v33  ;;  %v3856_v48 = vmul.f32 -1.442695, %v898_v31  ;;  %v3857_v54 = vmul.f32 -1.442695, %v899_v30  ;;  %v804_v58 = vpop.f32.mrf.mxu1 }
 0x155   : > { %4375 = vpow2.f32 %v3853_v22  ;;  %v3858_v4 = vmul.f32 -1.442695, %v900_v27  ;;  %v3859_v21 = vmul.f32 -1.442695, %v901_v39 }
 0x156   : > { %4377 = vpow2.f32 %v3854_v41  ;;  %v3860_v50 = vmul.f32 -1.442695, %v902_v46  ;;  %v4090_v2 = vpop.f32.mrf.mxu1  ;;  %v349_v46 = vsub.s32 2, %v5561_v51 }
 0x157   : > { %4379 = vpow2.f32 %v3855_v1 }
 0x158   : > { %4381 = vpow2.f32 %v3856_v48 }
 0x159   : > { %4383 = vpow2.f32 %v3857_v54  ;;  %v5650_v54 = vld [vmem:[%s6633_s4] ss:$0 sm:$0xff] }
 0x15a   : > { %v4360_v16 = vpop.eup %4359  ;;  %4385 = vpow2.f32 %v3858_v4  ;;  %6753 = vst [vmem:[#allocation29_spill] sm:$0xff] %v5650_v54  ;;  %v951_v2 = vadd.f32 %v5650_v54, %v801_v56 }
 0x15b   : > { %v4362_v38 = vpop.eup %4361  ;;  %v855_v52 = vadd.f32 1.0, %v4360_v16  ;;  %4387 = vpow2.f32 %v3859_v21 }
 0x15c   : > { %v4364_v60 = vpop.eup %4363  ;;  %v856_v63 = vadd.f32 1.0, %v4362_v38  ;;  %4389 = vpow2.f32 %v3860_v50  ;;  %v954_v56 = vrot.slane %v951_v2, 2 }
 0x15d   : > { %v4366_v61 = vpop.eup %4365  ;;  %v857_v8 = vadd.f32 1.0, %v4364_v60  ;;  %4391 = vrcp.f32 %v855_v52  ;;  %v350_v52 = vrot.slane %v5570_v57, %v349_v46 }
 0x15e   : > { %v4368_v31 = vpop.eup %4367  ;;  %v858_v30 = vadd.f32 1.0, %v4366_v61  ;;  %4393 = vrcp.f32 %v856_v63 }
 0x15f   : > { %v4370_v27 = vpop.eup %4369  ;;  %v859_v39 = vadd.f32 1.0, %v4368_v31  ;;  %4395 = vrcp.f32 %v857_v8  ;;  %v5658_v57 = vadd.f32 %v5563_v53, %v350_v52  ;;  %v958_v53 = vrot.slane %v951_v2, 6 }
 0x160   : > { %v4372_v22 = vpop.eup %4371  ;;  %v860_v41 = vadd.f32 1.0, %v4370_v27  ;;  %4397 = vrcp.f32 %v858_v30  ;;  %v5669_v51 = vadd.f32 %v5621_v55, %v350_v52 }
 0x161   : > { %v4374_v1 = vpop.eup %4373  ;;  %v861_v48 = vadd.f32 1.0, %v4372_v22  ;;  %4399 = vrcp.f32 %v859_v39  ;;  %v953_v39 = vrot.slane %v951_v2, 1  ;;  %6755 = vst [vmem:[#allocation31_spill] sm:$0xff] %v5658_v57 }
 0x162   : > { %v4376_v4 = vpop.eup %4375  ;;  %v862_v62 = vadd.f32 1.0, %v4374_v1  ;;  %4401 = vrcp.f32 %v860_v41  ;;  %v5655_v41 = vadd.f32 %v5559_v49, %v350_v52  ;;  %v5664_v49 = vadd.f32 %v5580_v0, %v350_v52  ;;  %6758 = vst [vmem:[#allocation34_spill] sm:$0xff] %v5669_v51 }
 0x163   : > { %v4378_v21 = vpop.eup %4377  ;;  %4403 = vrcp.f32 %v861_v48  ;;  %v927_v50 = vadd.f32 1.0, %v4376_v4  ;;  %v955_v4 = vrot.slane %v951_v2, 3 }
 0x164   : > { %v4380_v58 = vpop.eup %4379  ;;  %4405 = vrcp.f32 %v862_v62  ;;  %v928_v16 = vadd.f32 1.0, %v4378_v21  ;;  %6754 = vst [vmem:[#allocation30_spill] sm:$0xff] %v5655_v41  ;;  %v5661_v21 = vadd.f32 %v5572_v59, %v350_v52  ;;  %6757 = vst [vmem:[#allocation33_spill] sm:$0xff] %v5664_v49  ;;  %v959_v59 = vrot.slane %v951_v2, 7 }
 0x165   : > { %v4382_v38 = vpop.eup %4381  ;;  %v929_v60 = vadd.f32 1.0, %v4380_v58  ;;  %4407 = vrcp.f32 %v927_v50  ;;  %v956_v50 = vrot.slane %v951_v2, 4 }
 0x166   : > { %v4384_v63 = vpop.eup %4383  ;;  %v930_v61 = vadd.f32 1.0, %v4382_v38  ;;  %4409 = vrcp.f32 %v928_v16  ;;  %6756 = vst [vmem:[#allocation32_spill] sm:$0xff] %v5661_v21  ;;  %v957_v38 = vrot.slane %v951_v2, 5 }
 0x167   : > { %v4386_v8 = vpop.eup %4385  ;;  %v931_v31 = vadd.f32 1.0, %v4384_v63  ;;  %4411 = vrcp.f32 %v929_v60 }
 0x168   : > { %v4388_v30 = vpop.eup %4387  ;;  %v932_v27 = vadd.f32 1.0, %v4386_v8  ;;  %4413 = vrcp.f32 %v930_v61 }
 0x169   : > { %v4390_v22 = vpop.eup %4389  ;;  %v933_v1 = vadd.f32 1.0, %v4388_v30  ;;  %4415 = vrcp.f32 %v931_v31 }
 0x16a   : > { %v4392_v48 = vpop.eup %4391  ;;  %v934_v46 = vadd.f32 1.0, %v4390_v22  ;;  %4417 = vrcp.f32 %v932_v27 }
 0x16b   : > { %v4394_v62 = vpop.eup %4393  ;;  %v968_v58 = vmul.f32 %v4392_v48, %v951_v2  ;;  %4419 = vrcp.f32 %v933_v1  ;;  %v5673_v1 = vadd.f32 %v5635_v3, %v350_v52 }
 0x16c   : > { %v4396_v16 = vpop.eup %4395  ;;  %v969_v60 = vmul.f32 %v4394_v62, %v953_v39  ;;  %4421 = vrcp.f32 %v934_v46  ;;  %v5677_v46 = vadd.f32 %v5589_v6, %v350_v52 }
 0x16d   : > { %v4398_v63 = vpop.eup %4397  ;;  %v970_v8 = vmul.f32 %v4396_v16, %v954_v56  ;;  %v976_v61 = vadd.f32 %v968_v58, %v5658_v57  ;;  %6759 = vst [vmem:[#allocation35_spill] sm:$0xff] %v5673_v1 }
 0x16e   : > { %v4400_v30 = vpop.eup %4399  ;;  %v971_v22 = vmul.f32 %v4398_v63, %v955_v4  ;;  %v977_v31 = vadd.f32 %v969_v60, %v5664_v49  ;;  %6760 = vst [vmem:[#allocation36_spill] sm:$0xff] %v5677_v46 }
 0x16f   : > { %v4402_v48 = vpop.eup %4401  ;;  %v972_v0 = vmul.f32 %v4400_v30, %v956_v50  ;;  %v978_v27 = vadd.f32 %v970_v8, %v5655_v41  ;;  %4423 = vtanh.f32 %v976_v61  ;;  %v5681_v50 = vadd.f32 %v5632_v47, %v350_v52 }
 0x170   : > { %v4404_v39 = vpop.eup %4403  ;;  %v973_v56 = vmul.f32 %v4402_v48, %v957_v38  ;;  %v979_v62 = vadd.f32 %v971_v22, %v5661_v21  ;;  %4425 = vtanh.f32 %v977_v31  ;;  %v1009_v47 = vrot.slane %v5499_v34, 1 }
 0x171   : > { %v4406_v2 = vpop.eup %4405  ;;  %v974_v4 = vmul.f32 %v4404_v39, %v958_v53  ;;  %v980_v55 = vadd.f32 %v972_v0, %v5669_v51  ;;  %4427 = vtanh.f32 %v978_v27  ;;  %6761 = vst [vmem:[#allocation37_spill] sm:$0xff] %v5681_v50  ;;  %v1010_v52 = vrot.slane %v5499_v34, 2 }
 0x172   : > { %4429 = vtanh.f32 %v979_v62  ;;  %v975_v58 = vmul.f32 %v4406_v2, %v959_v59  ;;  %v981_v3 = vadd.f32 %v973_v56, %v5673_v1  ;;  %v4408_v38 = vpop.eup %4407  ;;  %v1011_v59 = vrot.slane %v5499_v34, 3 }
 0x173   : > { %4431 = vtanh.f32 %v980_v55  ;;  %v982_v16 = vadd.f32 %v974_v4, %v5677_v46  ;;  %v4410_v6 = vpop.eup %4409  ;;  %v992_v31 = vsub.f32 1.0, %v4408_v38  ;;  %v1012_v48 = vrot.slane %v5499_v34, 4 }
 0x174   : > { %v983_v60 = vadd.f32 %v975_v58, %v5681_v50  ;;  %4433 = vtanh.f32 %v981_v3  ;;  %v4412_v63 = vpop.eup %4411  ;;  %v1013_v0 = vrot.slane %v5499_v34, 5  ;;  %v993_v39 = vsub.f32 1.0, %v4410_v6 }
 0x175   : > { %4435 = vtanh.f32 %v982_v16  ;;  %v4414_v53 = vpop.eup %4413  ;;  %v1014_v56 = vrot.slane %v5499_v34, 6  ;;  %v1015_v62 = vrot.slane %v5499_v34, 7  ;;  %v1024_v2 = vmul.f32 %v4408_v38, %v5499_v34 }
 0x176   : > { %4437 = vtanh.f32 %v983_v60  ;;  %v4416_v8 = vpop.eup %4415  ;;  %v994_v55 = vsub.f32 1.0, %v4412_v63  ;;  %v1025_v3 = vmul.f32 %v4410_v6, %v1009_v47  ;;  %v1026_v16 = vmul.f32 %v4412_v63, %v1010_v52 }
 0x177   : > { %v4418_v61 = vpop.eup %4417  ;;  %v995_v50 = vsub.f32 1.0, %v4414_v53  ;;  %v996_v46 = vsub.f32 1.0, %v4416_v8  ;;  %v1027_v51 = vmul.f32 %v4414_v53, %v1011_v59  ;;  %v1028_v49 = vmul.f32 %v4416_v8, %v1012_v48 }
 0x178   : > { %v4420_v30 = vpop.eup %4419  ;;  %v997_v41 = vsub.f32 1.0, %v4418_v61 }
 0x179   : > { %v4422_v22 = vpop.eup %4421  ;;  %v998_v38 = vsub.f32 1.0, %v4420_v30  ;;  %v1030_v52 = vmul.f32 %v4420_v30, %v1014_v56 }
 0x17c   : > { %v4424_v27 = vpop.eup %4423 }
 0x17d   : > { %v4426_v4 = vpop.eup %4425  ;;  %v1000_v58 = vmul.f32 %v4424_v27, %v992_v31  ;;  %v1029_v31 = vmul.f32 %v4418_v61, %v1013_v0 }
 0x17e   : > { %v4428_v60 = vpop.eup %4427  ;;  %v1001_v1 = vmul.f32 %v4426_v4, %v993_v39  ;;  %v999_v39 = vsub.f32 1.0, %v4422_v22 }
 0x17f   : > { %v4430_v21 = vpop.eup %4429  ;;  %v1002_v57 = vmul.f32 %v4428_v60, %v994_v55  ;;  %v5694_v54 = vadd.f32 %v1024_v2, %v1000_v58 }
 0x180   : > { %v4432_v34 = vpop.eup %4431  ;;  %v1003_v33 = vmul.f32 %v4430_v21, %v995_v50  ;;  %v5696_v6 = vadd.f32 %v1025_v3, %v1001_v1  ;;  %v1031_v1 = vmul.f32 %v4422_v22, %v1015_v62 }
 0x181   : > { %v4434_v63 = vpop.eup %4433  ;;  %v1004_v47 = vmul.f32 %v4432_v34, %v996_v46  ;;  %v5698_v27 = vadd.f32 %v1026_v16, %v1002_v57  ;;  %v1040_v53 = vpack.c.bf16 %v5694_v54, %v5694_v54 }
 0x182   : > { %v4436_v59 = vpop.eup %4435  ;;  %v1005_v8 = vmul.f32 %v4434_v63, %v997_v41  ;;  %v5702_v48 = vadd.f32 %v1027_v51, %v1003_v33  ;;  %v1041_v2 = vpack.c.bf16 %v5696_v6, %v5696_v6 }
 0x183   : > { %v4438_v21 = vpop.eup %4437  ;;  %v1006_v50 = vmul.f32 %v4436_v59, %v998_v38  ;;  %v5706_v61 = vadd.f32 %v1028_v49, %v1004_v47  ;;  %v1042_v57 = vpack.c.bf16 %v5698_v27, %v5698_v27  ;;  %v1056_v56 = vunpack.c.l.b16 %v1040_v53 }
 0x184   : > { %v1007_v46 = vmul.f32 %v4438_v21, %v999_v39  ;;  %v5710_v30 = vadd.f32 %v1029_v31, %v1005_v8  ;;  %v1043_v0 = vpack.c.bf16 %v5702_v48, %v5702_v48  ;;  %v1057_v41 = vunpack.c.l.b16 %v1041_v2 }
 0x185   : > { %v5714_v51 = vadd.f32 %v1030_v52, %v1006_v50  ;;  %v1044_v33 = vpack.c.bf16 %v5706_v61, %v5706_v61  ;;  %v1058_v4 = vunpack.c.l.b16 %v1042_v57 }
 0x186   : > { %v5718_v22 = vadd.f32 %v1031_v1, %v1007_v46  ;;  %v1045_v49 = vpack.c.bf16 %v5710_v30, %v5710_v30  ;;  %v1059_v62 = vunpack.c.l.b16 %v1043_v0  ;;  %v1064_v55 = vrot.slane %v1057_v41, 7 }
 0x187   : > { %v1046_v58 = vpack.c.bf16 %v5714_v51, %v5714_v51  ;;  %v1060_v3 = vunpack.c.l.b16 %v1044_v33  ;;  %v1067_v16 = vrot.slane %v1058_v4, 6  ;;  %v6762_v0 = vmov 0.0   ;;  %v6771_v4 = vld [vmem:[#allocation22_spill] sm:$0xff] }
 0x188   : > { %v1047_v60 = vpack.c.bf16 %v5718_v22, %v5718_v22  ;;  %v1061_v34 = vunpack.c.l.b16 %v1045_v49  ;;  %v1066_v38 = vsel %vm1065_vm2, %v1064_v55, %v1056_v56  ;;  %v1070_v31 = vrot.slane %v1059_v62, 5  ;;  %v6772_v55 = vld [vmem:[#allocation25_spill] sm:$0xff] }
 0x189   : > { %v1062_v63 = vunpack.c.l.b16 %v1046_v58  ;;  %v1069_v47 = vsel %vm1068_vm3, %v1067_v16, %v1066_v38  ;;  %v1073_v52 = vrot.slane %v1060_v3, 4  ;;  %v6763_v41 = vmov 0   ;;  %v6773_v16 = vld [vmem:[#allocation27_spill] sm:$0xff] }
 0x18a   : > { %v1063_v53 = vunpack.c.l.b16 %v1047_v60  ;;  %v1072_v59 = vsel %vm1071_vm4, %v1070_v31, %v1069_v47  ;;  %v1076_v39 = vrot.slane %v1061_v34, 3 }
 0x18b   : > { %v1075_v8 = vsel %vm1074_vm5, %v1073_v52, %v1072_v59  ;;  %v1079_v2 = vrot.slane %v1062_v63, 2 }
 0x18c   : > { %v1078_v21 = vsel %vm1077_vm6, %v1076_v39, %v1075_v8  ;;  %v1082_v50 = vrot.slane %v1063_v53, 1 }
 0x18d   : > { %v1081_v1 = vsel %vm1080_vm7, %v1079_v2, %v1078_v21 }
 0x18e   : > { %v1084_v57 = vsel %vm1083_vm8, %v1082_v50, %v1081_v1 }
 0x18f   : > { %v1085_v46 = vpack.c.b16 %v1084_v57, %v1084_v57 }
 0x191   : > { %1120 = vmatmul.mubr.bf16.vlgmr.msra.gmra.mxu0 %v1085_v46  ;;  %4108 = vmatmul.mubr.bf16.vlgmr.msra.gmra.mxu1 %v1085_v46 }
 0x192   : > { %1450 = vmatpush1.bf16.msra.mxu0 %v5424_v9  ;;  %4112 = vmatpush3.bf16.msra.mxu1 %v5452_v20  ;;  %v6764_v9 = vld [vmem:[#allocation15_spill] sm:$0xff] }
 0x193   : > { %1451 = vmatprep.subr.bf16.mxu0 %v5427_v10  ;;  %4113 = vmatprep.subr.bf16.mxu1 %v6762_v0  ;;  %v6765_v10 = vld [vmem:[#allocation16_spill] sm:$0xff] }
 0x194   : > { %1481 = vmatprep.mubr.bf16.mxu0 %v6763_v41  ;;  %4127 = vmatprep.mubr.msk.bf16.mxu1 %vm5237_vm1, %v6762_v0 }
 0x196   : > { %1452 = vmatpush1.bf16.msra.mxu0 %v5431_v11  ;;  %4114 = vmatpush3.bf16.msra.mxu1 %v5464_v25  ;;  %v6766_v11 = vld [vmem:[#allocation19_spill] sm:$0xff] }
 0x197   : > { %1453 = vmatprep.subr.bf16.mxu0 %v5435_v12  ;;  %4115 = vmatprep.subr.bf16.mxu1 %v6762_v0  ;;  %v6767_v12 = vld [vmem:[#allocation17_spill] sm:$0xff] }
 0x19a   : > { %1454 = vmatpush1.bf16.msra.mxu0 %v5438_v15  ;;  %4116 = vmatpush3.bf16.msra.mxu1 %v5477_v28  ;;  %v6768_v15 = vld [vmem:[#allocation18_spill] sm:$0xff] }
 0x19b   : > { %1455 = vmatprep.subr.bf16.mxu0 %v5442_v17  ;;  %4117 = vmatprep.subr.bf16.mxu1 %v6762_v0  ;;  %v6769_v17 = vld [vmem:[#allocation20_spill] sm:$0xff] }
 0x19e   : > { %1456 = vmatpush1.bf16.msra.mxu0 %v5446_v18  ;;  %4118 = vmatpush3.bf16.msra.mxu1 %v5489_v32  ;;  %v6770_v18 = vld [vmem:[#allocation14_spill] sm:$0xff] }
 0x19f   : > { %1457 = vmatprep.subr.bf16.mxu0 %v5450_v19  ;;  %4119 = vmatprep.subr.bf16.mxu1 %v6762_v0 }
 0x1a2   : > { %1458 = vmatpush1.bf16.msra.mxu0 %v5456_v23  ;;  %4120 = vmatpush3.bf16.msra.mxu1 %v5503_v35 }
 0x1a3   : > { %1459 = vmatprep.subr.bf16.mxu0 %v5459_v24  ;;  %4121 = vmatprep.subr.bf16.mxu1 %v6762_v0 }
 0x1a6   : > { %1460 = vmatpush1.bf16.msra.mxu0 %v5470_v26  ;;  %4122 = vmatpush3.bf16.msra.mxu1 %v5510_v37 }
 0x1a7   : > { %1461 = vmatprep.subr.bf16.mxu0 %v6764_v9  ;;  %4123 = vmatprep.subr.bf16.mxu1 %v6762_v0 }
 0x1aa   : > { %1462 = vmatpush1.bf16.msra.mxu0 %v6765_v10  ;;  %4124 = vmatpush3.bf16.msra.mxu1 %v6766_v11 }
 0x1ab   : > { %1463 = vmatprep.subr.bf16.mxu0 %v6767_v12  ;;  %4125 = vmatprep.subr.bf16.mxu1 %v6762_v0  ;;  %v6774_v12 = vld [vmem:[#allocation23_spill] sm:$0xff] }
 0x1ae   : > { %1464 = vmatpush1.bf16.msra.mxu0 %v6768_v15  ;;  %4126 = vmatpush3.bf16.msra.mxu1 %v6769_v17 }
 0x1af   : > { %1811 = vmatprep.subr.bf16.mxu0 %v6770_v18  ;;  %4131 = vmatprep.subr.bf16.mxu1 %v6762_v0 }
 0x251   : > { %v1121_v19 = vpop.f32.mrf.mxu0  ;;  %v5768_v20 = vpop.f32.mrf.mxu1 }
 0x252   : > { %v1169_v23 = vrot.slane %v1121_v19, 7  ;;  %v1170_v24 = vrot.slane %v1121_v19, 1  ;;  %v1171_v25 = vrot.slane %v1121_v19, 2  ;;  %v1172_v26 = vrot.slane %v1121_v19, 3 }
 0x253   : > { %v1173_v28 = vrot.slane %v1121_v19, 4  ;;  %v1174_v32 = vrot.slane %v1121_v19, 5  ;;  %v1175_v35 = vrot.slane %v1121_v19, 6  ;;  %v1185_v37 = vadd.f32 %v1121_v19, %v5587_v5  ;;  %v5771_v33 = vpop.f32.mrf.mxu0  ;;  %v4109_v56 = vpop.f32.mrf.mxu1 }
 0x254   : > { %v1184_v49 = vadd.f32 %v1169_v23, %v6771_v4  ;;  %v1186_v62 = vadd.f32 %v1170_v24, %v5594_v13  ;;  %v1187_v58 = vadd.f32 %v1171_v25, %v6772_v55  ;;  %v1188_v3 = vadd.f32 %v1172_v26, %v5604_v36 }
 0x255   : > { %v1189_v60 = vadd.f32 %v1173_v28, %v6773_v16  ;;  %v1190_v34 = vadd.f32 %v1174_v32, %v5614_v43  ;;  %v3862_v38 = vmul.f32 -1.442695, %v1185_v37  ;;  %v1125_v31 = vpop.f32.mrf.mxu0  ;;  %v1165_v63 = vpop.f32.mrf.mxu1  ;;  %v1191_v47 = vadd.f32 %v1175_v35, %v5619_v45 }
 0x256   : > { %v3861_v52 = vmul.f32 -1.442695, %v1184_v49  ;;  %v3863_v53 = vmul.f32 -1.442695, %v1186_v62  ;;  %v3864_v59 = vmul.f32 -1.442695, %v1187_v58  ;;  %v1257_v17 = vadd.f32 %v5771_v33, %v5592_v7 }
 0x257   : > { %4439 = vpow2.f32 %v3862_v38  ;;  %v3865_v39 = vmul.f32 -1.442695, %v1188_v3  ;;  %v1126_v8 = vpop.f32.mrf.mxu0  ;;  %v4110_v2 = vpop.f32.mrf.mxu1  ;;  %v3866_v21 = vmul.f32 -1.442695, %v1189_v60  ;;  %v3867_v50 = vmul.f32 -1.442695, %v1190_v34 }
 0x258   : > { %4441 = vpow2.f32 %v3861_v52  ;;  %v3868_v1 = vmul.f32 -1.442695, %v1191_v47  ;;  %v1241_v57 = vrot.slane %v5771_v33, 7  ;;  %v1242_v46 = vrot.slane %v5771_v33, 1 }
 0x259   : > { %4443 = vpow2.f32 %v3863_v53  ;;  %v1243_v9 = vrot.slane %v5771_v33, 2  ;;  %v1244_v10 = vrot.slane %v5771_v33, 3  ;;  %v1245_v11 = vrot.slane %v5771_v33, 4  ;;  %v6775_v53 = vld [vmem:[#allocation28_spill] sm:$0xff] }
 0x25a   : > { %4445 = vpow2.f32 %v3864_v59  ;;  %v1256_v15 = vadd.f32 %v1241_v57, %v6774_v12  ;;  %v1258_v18 = vadd.f32 %v1242_v46, %v5597_v14  ;;  %v3870_v26 = vmul.f32 -1.442695, %v1257_v17  ;;  %v6776_v17 = vld [vmem:[#allocation29_spill] sm:$0xff] }
 0x25b   : > { %4447 = vpow2.f32 %v3865_v39  ;;  %v1259_v19 = vadd.f32 %v1243_v9, %v5602_v29  ;;  %v1260_v23 = vadd.f32 %v1244_v10, %v5607_v40  ;;  %v1261_v24 = vadd.f32 %v1245_v11, %v5612_v42 }
 0x25c   : > { %4449 = vpow2.f32 %v3866_v21  ;;  %v3869_v25 = vmul.f32 -1.442695, %v1256_v15  ;;  %v3871_v28 = vmul.f32 -1.442695, %v1258_v18  ;;  %v1246_v56 = vrot.slane %v5771_v33, 5 }
 0x25d   : > { %4451 = vpow2.f32 %v3867_v50  ;;  %v3872_v32 = vmul.f32 -1.442695, %v1259_v19  ;;  %v3873_v35 = vmul.f32 -1.442695, %v1260_v23  ;;  %v3874_v37 = vmul.f32 -1.442695, %v1261_v24 }
 0x25e   : > { %4453 = vpow2.f32 %v3868_v1  ;;  %v1247_v62 = vrot.slane %v5771_v33, 6  ;;  %v1262_v63 = vadd.f32 %v1246_v56, %v5617_v44  ;;  %v1312_v18 = vadd.f32 %v6776_v17, %v5768_v20 }
 0x25f   : > { %4455 = vpow2.f32 %v3869_v25 }
 0x260   : > { %4457 = vpow2.f32 %v3870_v26  ;;  %v1263_v59 = vadd.f32 %v1247_v62, %v6775_v53  ;;  %v3875_v1 = vmul.f32 -1.442695, %v1262_v63  ;;  %v1315_v62 = vrot.slane %v1312_v18, 1  ;;  %v6777_v63 = vld [vmem:[#allocation33_spill] sm:$0xff] }
 0x261   : > { %4459 = vpow2.f32 %v3871_v28 }
 0x262   : > { %4461 = vpow2.f32 %v3872_v32  ;;  %v3876_v46 = vmul.f32 -1.442695, %v1263_v59  ;;  %v1318_v59 = vrot.slane %v1312_v18, 4 }
 0x263   : > { %4463 = vpow2.f32 %v3873_v35 }
 0x264   : > { %v4440_v49 = vpop.eup %4439  ;;  %4465 = vpow2.f32 %v3874_v37  ;;  %v1314_v37 = vrot.slane %v1312_v18, 7 }
 0x265   : > { %v4442_v58 = vpop.eup %4441  ;;  %v1217_v3 = vadd.f32 1.0, %v4440_v49 }
 0x266   : > { %v4444_v60 = vpop.eup %4443  ;;  %v1216_v34 = vadd.f32 1.0, %v4442_v58 }
 0x267   : > { %v4446_v38 = vpop.eup %4445  ;;  %v1218_v31 = vadd.f32 1.0, %v4444_v60  ;;  %4467 = vrcp.f32 %v1217_v3  ;;  %v1316_v60 = vrot.slane %v1312_v18, 2 }
 0x268   : > { %v4448_v47 = vpop.eup %4447  ;;  %v1219_v52 = vadd.f32 1.0, %v4446_v38  ;;  %4469 = vrcp.f32 %v1216_v34  ;;  %v1317_v38 = vrot.slane %v1312_v18, 3 }
 0x269   : > { %v4450_v39 = vpop.eup %4449  ;;  %v1220_v8 = vadd.f32 1.0, %v4448_v47  ;;  %4471 = vrcp.f32 %v1218_v31 }
 0x26a   : > { %v4452_v33 = vpop.eup %4451  ;;  %v1221_v2 = vadd.f32 1.0, %v4450_v39  ;;  %4473 = vrcp.f32 %v1219_v52 }
 0x26b   : > { %v4454_v21 = vpop.eup %4453  ;;  %v1222_v50 = vadd.f32 1.0, %v4452_v33  ;;  %4475 = vrcp.f32 %v1220_v8  ;;  %v6778_v8 = vld [vmem:[#allocation31_spill] sm:$0xff] }
 0x26c   : > { %v1223_v57 = vadd.f32 1.0, %v4454_v21  ;;  %4477 = vrcp.f32 %v1221_v2  ;;  %v4456_v9 = vpop.eup %4455  ;;  %v1319_v21 = vrot.slane %v1312_v18, 5 }
 0x26d   : > { %4479 = vrcp.f32 %v1222_v50  ;;  %v4458_v10 = vpop.eup %4457  ;;  %v1288_v11 = vadd.f32 1.0, %v4456_v9  ;;  %v1320_v9 = vrot.slane %v1312_v18, 6 }
 0x26e   : > { %4481 = vrcp.f32 %v1223_v57  ;;  %v4460_v15 = vpop.eup %4459  ;;  %v1289_v19 = vadd.f32 1.0, %v4458_v10 }
 0x26f   : > { %4483 = vpow2.f32 %v3875_v1  ;;  %v4462_v23 = vpop.eup %4461  ;;  %v1290_v24 = vadd.f32 1.0, %v4460_v15  ;;  %v6779_v1 = vld [vmem:[#allocation30_spill] sm:$0xff] }
 0x270   : > { %4485 = vpow2.f32 %v3876_v46  ;;  %v4464_v25 = vpop.eup %4463  ;;  %v1291_v26 = vadd.f32 1.0, %v4462_v23  ;;  %v6781_v23 = vld [vmem:[#allocation34_spill] sm:$0xff] }
 0x271   : > { %v4466_v28 = vpop.eup %4465  ;;  %v1292_v32 = vadd.f32 1.0, %v4464_v25  ;;  %4487 = vrcp.f32 %v1288_v11  ;;  %v6780_v11 = vld [vmem:[#allocation32_spill] sm:$0xff] }
 0x272   : > { %v1293_v56 = vadd.f32 1.0, %v4466_v28  ;;  %4489 = vrcp.f32 %v1289_v19  ;;  %v6782_v28 = vld [vmem:[#allocation35_spill] sm:$0xff] }
 0x273   : > { %4491 = vrcp.f32 %v1290_v24 }
 0x274   : > { %v4468_v35 = vpop.eup %4467  ;;  %4493 = vrcp.f32 %v1291_v26 }
 0x275   : > { %v4470_v49 = vpop.eup %4469  ;;  %v1330_v58 = vmul.f32 %v4468_v35, %v1312_v18  ;;  %4495 = vrcp.f32 %v1292_v32 }
 0x276   : > { %v4472_v3 = vpop.eup %4471  ;;  %v1329_v20 = vmul.f32 %v4470_v49, %v1314_v37  ;;  %4497 = vrcp.f32 %v1293_v56  ;;  %v6783_v56 = vld [vmem:[#allocation36_spill] sm:$0xff] }
 0x277   : > { %v4474_v34 = vpop.eup %4473  ;;  %v1331_v31 = vmul.f32 %v4472_v3, %v1315_v62  ;;  %v1338_v47 = vadd.f32 %v1330_v58, %v6777_v63  ;;  %v6784_v62 = vld [vmem:[#allocation37_spill] sm:$0xff] }
 0x278   : > { %v4476_v52 = vpop.eup %4475  ;;  %v1332_v39 = vmul.f32 %v4474_v34, %v1316_v60  ;;  %v1337_v33 = vadd.f32 %v1329_v20, %v6778_v8 }
 0x279   : > { %v4478_v2 = vpop.eup %4477  ;;  %v1333_v50 = vmul.f32 %v4476_v52, %v1317_v38  ;;  %v1339_v57 = vadd.f32 %v1331_v31, %v6779_v1  ;;  %4499 = vtanh.f32 %v1338_v47  ;;  %v1377_v47 = vrot.slane %v5694_v54, 7 }
 0x27a   : > { %v4480_v46 = vpop.eup %4479  ;;  %v1334_v10 = vmul.f32 %v4478_v2, %v1318_v59  ;;  %v1340_v15 = vadd.f32 %v1332_v39, %v6780_v11  ;;  %4501 = vtanh.f32 %v1337_v33  ;;  %v1378_v52 = vrot.slane %v5696_v6, 7 }
 0x27b   : > { %v4482_v17 = vpop.eup %4481  ;;  %v1335_v19 = vmul.f32 %v4480_v46, %v1319_v21  ;;  %v1341_v24 = vadd.f32 %v1333_v50, %v6781_v23  ;;  %4503 = vtanh.f32 %v1339_v57  ;;  %v1379_v33 = vrot.slane %v5698_v27, 7 }
 0x27c   : > { %v4484_v25 = vpop.eup %4483  ;;  %4505 = vtanh.f32 %v1340_v15  ;;  %v1336_v26 = vmul.f32 %v4482_v17, %v1320_v9  ;;  %v1342_v32 = vadd.f32 %v1334_v10, %v6782_v28  ;;  %v1380_v2 = vrot.slane %v5702_v48, 7 }
 0x27d   : > { %v4486_v35 = vpop.eup %4485  ;;  %4507 = vtanh.f32 %v1341_v24  ;;  %v1294_v37 = vadd.f32 1.0, %v4484_v25  ;;  %v1343_v49 = vadd.f32 %v1335_v19, %v6783_v56  ;;  %v1381_v21 = vrot.slane %v5706_v61, 7 }
 0x27e   : > { %v1295_v18 = vadd.f32 1.0, %v4486_v35  ;;  %v1344_v58 = vadd.f32 %v1336_v26, %v6784_v62  ;;  %4509 = vtanh.f32 %v1342_v32  ;;  %v4488_v3 = vpop.eup %4487  ;;  %v1382_v46 = vrot.slane %v5710_v30, 7 }
 0x27f   : > { %4511 = vrcp.f32 %v1294_v37  ;;  %v4490_v60 = vpop.eup %4489  ;;  %v1353_v50 = vsub.f32 1.0, %v4488_v3  ;;  %v1383_v54 = vrot.slane %v5714_v51, 7  ;;  %v1393_v24 = vmul.f32 %v4488_v3, %v1377_v47 }
 0x280   : > { %4513 = vrcp.f32 %v1295_v18  ;;  %v4492_v20 = vpop.eup %4491  ;;  %v1354_v59 = vsub.f32 1.0, %v4490_v60  ;;  %v1394_v15 = vmul.f32 %v4490_v60, %v1378_v52 }
 0x281   : > { %4515 = vtanh.f32 %v1343_v49  ;;  %v4494_v34 = vpop.eup %4493  ;;  %v1355_v9 = vsub.f32 1.0, %v4492_v20  ;;  %v1395_v32 = vmul.f32 %v4492_v20, %v1379_v33 }
 0x282   : > { %4517 = vtanh.f32 %v1344_v58  ;;  %v4496_v38 = vpop.eup %4495  ;;  %v1356_v19 = vsub.f32 1.0, %v4494_v34  ;;  %v1396_v49 = vmul.f32 %v4494_v34, %v1380_v2  ;;  %v1384_v58 = vrot.slane %v5718_v22, 7 }
 0x283   : > { %v4498_v31 = vpop.eup %4497  ;;  %v1357_v26 = vsub.f32 1.0, %v4496_v38  ;;  %v1397_v51 = vmul.f32 %v4496_v38, %v1381_v21 }
 0x284   : > { %v1358_v35 = vsub.f32 1.0, %v4498_v31 }
 0x286   : > { %v4500_v39 = vpop.eup %4499 }
 0x287   : > { %v4502_v57 = vpop.eup %4501  ;;  %v1362_v10 = vmul.f32 %v4500_v39, %v1354_v59  ;;  %v1398_v59 = vmul.f32 %v4498_v31, %v1382_v46 }
 0x288   : > { %v4504_v17 = vpop.eup %4503  ;;  %v1361_v6 = vmul.f32 %v4502_v57, %v1353_v50 }
 0x289   : > { %v4506_v25 = vpop.eup %4505  ;;  %v1363_v27 = vmul.f32 %v4504_v17, %v1355_v9  ;;  %v5813_v48 = vadd.f32 %v1394_v15, %v1362_v10 }
 0x28a   : > { %v4508_v61 = vpop.eup %4507  ;;  %v1364_v37 = vmul.f32 %v4506_v25, %v1356_v19  ;;  %v5815_v30 = vadd.f32 %v1393_v24, %v1361_v6 }
 0x28b   : > { %v4510_v18 = vpop.eup %4509  ;;  %v1365_v60 = vmul.f32 %v4508_v61, %v1357_v26  ;;  %v5818_v52 = vadd.f32 %v1395_v32, %v1363_v27  ;;  %v1410_v2 = vpack.c.bf16 %v5813_v48, %v5813_v48 }
 0x28c   : > { %v4512_v3 = vpop.eup %4511  ;;  %v1366_v47 = vmul.f32 %v4510_v18, %v1358_v35  ;;  %v5820_v39 = vadd.f32 %v1396_v49, %v1364_v37  ;;  %v1409_v20 = vpack.c.bf16 %v5815_v30, %v5815_v30 }
 0x28d   : > { %v4514_v33 = vpop.eup %4513  ;;  %v1359_v50 = vsub.f32 1.0, %v4512_v3  ;;  %v5824_v34 = vadd.f32 %v1397_v51, %v1365_v60  ;;  %v1411_v22 = vpack.c.bf16 %v5818_v52, %v5818_v52  ;;  %v1399_v57 = vmul.f32 %v4512_v3, %v1383_v54 }
 0x28e   : > { %v4516_v38 = vpop.eup %4515  ;;  %v1360_v21 = vsub.f32 1.0, %v4514_v33  ;;  %v5830_v9 = vadd.f32 %v1398_v59, %v1366_v47  ;;  %v1412_v31 = vpack.c.bf16 %v5820_v39, %v5820_v39  ;;  %v1400_v15 = vmul.f32 %v4514_v33, %v1384_v58 }
 0x28f   : > { %v4518_v46 = vpop.eup %4517  ;;  %v1367_v10 = vmul.f32 %v4516_v38, %v1359_v50  ;;  %v1413_v17 = vpack.c.bf16 %v5824_v34, %v5824_v34  ;;  %v1425_v19 = vunpack.c.l.b16 %v1409_v20  ;;  %v1427_v25 = vunpack.c.l.b16 %v1411_v22 }
 0x290   : > { %v1368_v6 = vmul.f32 %v4518_v46, %v1360_v21  ;;  %v1414_v24 = vpack.c.bf16 %v5830_v9, %v5830_v9  ;;  %v1428_v26 = vunpack.c.l.b16 %v1412_v31  ;;  %v1426_v54 = vunpack.c.l.b16 %v1410_v2 }
 0x291   : > { %v5838_v27 = vadd.f32 %v1399_v57, %v1367_v10  ;;  %v1429_v32 = vunpack.c.l.b16 %v1413_v17  ;;  %v1433_v61 = vrot.slane %v1425_v19, 1  ;;  %v1435_v49 = vrot.slane %v1427_v25, 7  ;;  %v5853_v10 = vld [vmem:[#allocation9 + $0xa8] ss:$12 sps:$4 sm:$0xff]   ;;  %v5866_v19 = vld [vmem:[#allocation9 + $0x90] ss:$12 sps:$4 sm:$0xff]  }
 0x292   : > { %v5840_v35 = vadd.f32 %v1400_v15, %v1368_v6  ;;  %v1430_v37 = vunpack.c.l.b16 %v1414_v24  ;;  %v1437_v60 = vrot.slane %v1428_v26, 6  ;;  %v5856_v15 = vld [vmem:[#allocation9 + $0xb0] ss:$12 sps:$4 sm:$0xff]   ;;  %v5859_v17 = vld [vmem:[#allocation9 + $0x94] ss:$12 sps:$4 sm:$0xff]  }
 0x293   : > { %v1415_v18 = vpack.c.bf16 %v5838_v27, %v5838_v27  ;;  %v1434_v58 = vsel %vm1065_vm2, %v1426_v54, %v1433_v61  ;;  %v1439_v47 = vrot.slane %v1429_v32, 5  ;;  %v5869_v6 = vld [vmem:[#allocation9 + $0x98] ss:$12 sps:$4 sm:$0xff]   ;;  %v5872_v24 = vld [vmem:[#allocation9 + $0x7c] ss:$12 sps:$4 sm:$0xff]  }
 0x294   : > { %v1416_v51 = vpack.c.bf16 %v5840_v35, %v5840_v35  ;;  %v1436_v3 = vsel %vm1068_vm3, %v1435_v49, %v1434_v58  ;;  %v1441_v33 = vrot.slane %v1430_v37, 4  ;;  %v5876_v25 = vld [vmem:[#allocation9 + $0x78] ss:$12 sps:$4 sm:$0xff]   ;;  %v5879_v26 = vld [vmem:[#allocation9 + $0x80] ss:$12 sps:$4 sm:$0xff]  }
 0x295   : > { %v1431_v59 = vunpack.c.l.b16 %v1415_v18  ;;  %v1438_v20 = vsel %vm1071_vm4, %v1437_v60, %v1436_v3  ;;  %v5882_v54 = vld [vmem:[#allocation9 + $0x64] ss:$12 sps:$4 sm:$0xff]   ;;  %v5886_v32 = vld [vmem:[#allocation9 + $0x60] ss:$12 sps:$4 sm:$0xff]   ;;  %v5889_v61 = vld [vmem:[#allocation9 + $0x68] ss:$12 sps:$4 sm:$0xff]  }
 0x296   : > { %v1432_v50 = vunpack.c.l.b16 %v1416_v51  ;;  %v1440_v2 = vsel %vm1074_vm5, %v1439_v47, %v1438_v20  ;;  %6785 = vst [vmem:[#allocation15_spill] sm:$0xff] %v5882_v54  ;;  %6786 = vst [vmem:[#allocation16_spill] sm:$0xff] %v5886_v32  ;;  %v5892_v37 = vld [vmem:[#allocation9 + $0x4c] ss:$12 sps:$4 sm:$0xff]   ;;  %v5896_v49 = vld [vmem:[#allocation9 + $0x48] ss:$12 sps:$4 sm:$0xff]  }
 0x297   : > { %v1442_v22 = vsel %vm1077_vm6, %v1441_v33, %v1440_v2  ;;  %v1443_v38 = vrot.slane %v1431_v59, 3  ;;  %6787 = vst [vmem:[#allocation19_spill] sm:$0xff] %v5889_v61  ;;  %6788 = vst [vmem:[#allocation17_spill] sm:$0xff] %v5892_v37  ;;  %v5899_v18 = vld [vmem:[#allocation9 + $0x50] ss:$12 sps:$4 sm:$0xff]  }
 0x298   : > { %v1445_v21 = vrot.slane %v1432_v50, 2  ;;  %6789 = vst [vmem:[#allocation18_spill] sm:$0xff] %v5896_v49  ;;  %6790 = vst [vmem:[#allocation20_spill] sm:$0xff] %v5899_v18  ;;  %v5902_v58 = vld [vmem:[#allocation9 + $0x34] ss:$12 sps:$4 sm:$0xff]  }
 0x299   : > { %v1444_v57 = vsel %vm1080_vm7, %v1443_v38, %v1442_v22  ;;  %6791 = vst [vmem:[#allocation14_spill] sm:$0xff] %v5902_v58  ;;  %v5906_v60 = vld [vmem:[#allocation9 + $0x30] ss:$12 sps:$4 sm:$0xff]   ;;  %v5909_v51 = vld [vmem:[#allocation9 + $0x38] ss:$12 sps:$4 sm:$0xff]  }
 0x29a   : > { %v1446_v31 = vsel %vm1083_vm8, %v1445_v21, %v1444_v57  ;;  %6792 = vst [vmem:[#allocation25_spill] sm:$0xff] %v5906_v60  ;;  %6793 = vst [vmem:[#allocation27_spill] sm:$0xff] %v5909_v51  ;;  %v5912_v3 = vld [vmem:[#allocation9 + $0x1c] ss:$12 sps:$4 sm:$0xff]   ;;  %v5916_v47 = vld [vmem:[#allocation9 + $0x18] ss:$12 sps:$4 sm:$0xff]  }
 0x29b   : > { %v1447_v46 = vpack.c.b16 %v1446_v31, %v1446_v31  ;;  %6794 = vst [vmem:[#allocation23_spill] sm:$0xff] %v5912_v3  ;;  %6795 = vst [vmem:[#allocation28_spill] sm:$0xff] %v5916_v47  ;;  %v5919_v59 = vld [vmem:[#allocation9 + $0x20] ss:$12 sps:$4 sm:$0xff]   ;;  %v5922_v20 = vld [vmem:[#allocation9 + $0x4] ss:$12 sps:$4 sm:$0xff]  }
 0x29c   : > { %6796 = vst [vmem:[#allocation29_spill] sm:$0xff] %v5919_v59  ;;  %6797 = vst [vmem:[#allocation33_spill] sm:$0xff] %v5922_v20  ;;  %v5926_v33 = vld [vmem:[#allocation9] ss:$12 sps:$4 sm:$0xff]   ;;  %v5929_v50 = vld [vmem:[#allocation9 + $0x8] ss:$12 sps:$4 sm:$0xff]  }
 0x29d   : > { %1482 = vmatmul.mubr.bf16.vlgmr.msra.gmra.mxu0 %v1447_v46  ;;  %4128 = vmatmul.mubr.bf16.vlgmr.msra.gmra.mxu1 %v1447_v46  ;;  %6798 = vst [vmem:[#allocation31_spill] sm:$0xff] %v5926_v33  ;;  %6799 = vst [vmem:[#allocation38_spill] sm:$0xff] %v5929_v50  ;;  %v5932_v2 = vld [vmem:[#allocation9 + $0xac] ss:$12 sps:$4 sm:$0xff]  }
 0x29e   : > { %1812 = vmatpush1.bf16.msra.mxu0 %v5853_v10  ;;  %4132 = vmatpush3.bf16.msra.mxu1 %v5856_v15  ;;  %6800 = vst [vmem:[#allocation39_spill] sm:$0xff] %v5932_v2 }
 0x29f   : > { %1813 = vmatprep.subr.bf16.mxu0 %v5859_v17  ;;  %4133 = vmatprep.subr.bf16.mxu1 %v6762_v0 }
 0x2a0   : > { %1843 = vmatprep.mubr.bf16.mxu0 %v6763_v41  ;;  %4147 = vmatprep.mubr.msk.bf16.mxu1 %vm5237_vm1, %v6762_v0 }
 0x2a2   : > { %1814 = vmatpush1.bf16.msra.mxu0 %v5866_v19  ;;  %4134 = vmatpush3.bf16.msra.mxu1 %v5869_v6 }
 0x2a3   : > { %1815 = vmatprep.subr.bf16.mxu0 %v5872_v24  ;;  %4135 = vmatprep.subr.bf16.mxu1 %v6762_v0 }
 0x2a6   : > { %1816 = vmatpush1.bf16.msra.mxu0 %v5876_v25  ;;  %4136 = vmatpush3.bf16.msra.mxu1 %v5879_v26 }
 0x2a7   : > { %1817 = vmatprep.subr.bf16.mxu0 %v5882_v54  ;;  %4137 = vmatprep.subr.bf16.mxu1 %v6762_v0 }
 0x2aa   : > { %1818 = vmatpush1.bf16.msra.mxu0 %v5886_v32  ;;  %4138 = vmatpush3.bf16.msra.mxu1 %v5889_v61 }
 0x2ab   : > { %1819 = vmatprep.subr.bf16.mxu0 %v5892_v37  ;;  %4139 = vmatprep.subr.bf16.mxu1 %v6762_v0 }
 0x2ae   : > { %1820 = vmatpush1.bf16.msra.mxu0 %v5896_v49  ;;  %4140 = vmatpush3.bf16.msra.mxu1 %v5899_v18 }
 0x2af   : > { %1821 = vmatprep.subr.bf16.mxu0 %v5902_v58  ;;  %4141 = vmatprep.subr.bf16.mxu1 %v6762_v0 }
 0x2b2   : > { %1822 = vmatpush1.bf16.msra.mxu0 %v5906_v60  ;;  %4142 = vmatpush3.bf16.msra.mxu1 %v5909_v51 }
 0x2b3   : > { %1823 = vmatprep.subr.bf16.mxu0 %v5912_v3  ;;  %4143 = vmatprep.subr.bf16.mxu1 %v6762_v0 }
 0x2b6   : > { %1824 = vmatpush1.bf16.msra.mxu0 %v5916_v47  ;;  %4144 = vmatpush3.bf16.msra.mxu1 %v5919_v59 }
 0x2b7   : > { %1825 = vmatprep.subr.bf16.mxu0 %v5922_v20  ;;  %4145 = vmatprep.subr.bf16.mxu1 %v6762_v0 }
 0x2ba   : > { %1826 = vmatpush1.bf16.msra.mxu0 %v5926_v33  ;;  %4146 = vmatpush3.bf16.msra.mxu1 %v5929_v50 }
 0x2bb   : > { %2173 = vmatprep.subr.bf16.mxu0 %v5932_v2  ;;  %4151 = vmatprep.subr.bf16.mxu1 %v6762_v0 }
 0x35d   : > { %v1483_v22 = vpop.f32.mrf.mxu0  ;;  %v5936_v38 = vpop.f32.mrf.mxu1 }
 0x35e   : > { %v1531_v21 = vrot.slane %v1483_v22, 6  ;;  %v1532_v57 = vrot.slane %v1483_v22, 7  ;;  %v1533_v31 = vrot.slane %v1483_v22, 1  ;;  %v1534_v46 = vrot.slane %v1483_v22, 2 }
 0x35f   : > { %v1535_v20 = vrot.slane %v1483_v22, 3  ;;  %v1536_v59 = vrot.slane %v1483_v22, 4  ;;  %v1537_v33 = vrot.slane %v1483_v22, 5  ;;  %v1548_v47 = vadd.f32 %v1483_v22, %v5594_v13  ;;  %v5939_v3 = vpop.f32.mrf.mxu0  ;;  %v4129_v50 = vpop.f32.mrf.mxu1 }
 0x360   : > { %v1546_v51 = vadd.f32 %v1531_v21, %v6771_v4  ;;  %v1547_v2 = vadd.f32 %v1532_v57, %v5587_v5  ;;  %v1549_v60 = vadd.f32 %v1533_v31, %v6772_v55  ;;  %v1550_v58 = vadd.f32 %v1534_v46, %v5604_v36 }
 0x361   : > { %v1551_v18 = vadd.f32 %v1535_v20, %v6773_v16  ;;  %v1552_v49 = vadd.f32 %v1536_v59, %v5614_v43  ;;  %v3879_v37 = vmul.f32 -1.442695, %v1548_v47  ;;  %v1487_v61 = vpop.f32.mrf.mxu0  ;;  %v1527_v32 = vpop.f32.mrf.mxu1  ;;  %v1553_v22 = vadd.f32 %v1537_v33, %v5619_v45 }
 0x362   : > { %v3877_v13 = vmul.f32 -1.442695, %v1546_v51  ;;  %v3878_v54 = vmul.f32 -1.442695, %v1547_v2  ;;  %v3880_v50 = vmul.f32 -1.442695, %v1549_v60 }
 0x363   : > { %4519 = vpow2.f32 %v3879_v37  ;;  %v3881_v21 = vmul.f32 -1.442695, %v1550_v58  ;;  %v1488_v4 = vpop.f32.mrf.mxu0  ;;  %v4130_v57 = vpop.f32.mrf.mxu1  ;;  %v3882_v31 = vmul.f32 -1.442695, %v1551_v18  ;;  %v3883_v46 = vmul.f32 -1.442695, %v1552_v49 }
 0x364   : > { %4521 = vpow2.f32 %v3877_v13  ;;  %v3884_v20 = vmul.f32 -1.442695, %v1553_v22  ;;  %v1603_v59 = vrot.slane %v5939_v3, 6  ;;  %v1604_v32 = vrot.slane %v5939_v3, 7 }
 0x365   : > { %4523 = vpow2.f32 %v3878_v54  ;;  %v1605_v61 = vrot.slane %v5939_v3, 1  ;;  %v1606_v51 = vrot.slane %v5939_v3, 2  ;;  %v1607_v37 = vrot.slane %v5939_v3, 3 }
 0x366   : > { %4525 = vpow2.f32 %v3880_v50  ;;  %v1618_v13 = vadd.f32 %v1603_v59, %v6774_v12  ;;  %v1619_v4 = vadd.f32 %v1604_v32, %v5592_v7  ;;  %v1620_v54 = vadd.f32 %v5939_v3, %v5597_v14 }
 0x367   : > { %4527 = vpow2.f32 %v3881_v21  ;;  %v1621_v49 = vadd.f32 %v1605_v61, %v5602_v29  ;;  %v1622_v18 = vadd.f32 %v1606_v51, %v5607_v40  ;;  %v1623_v58 = vadd.f32 %v1607_v37, %v5612_v42 }
 0x368   : > { %4529 = vpow2.f32 %v3882_v31  ;;  %v3885_v60 = vmul.f32 -1.442695, %v1618_v13  ;;  %v3886_v47 = vmul.f32 -1.442695, %v1619_v4  ;;  %v3887_v33 = vmul.f32 -1.442695, %v1620_v54 }
 0x369   : > { %4531 = vpow2.f32 %v3883_v46  ;;  %v3888_v2 = vmul.f32 -1.442695, %v1621_v49  ;;  %v3889_v22 = vmul.f32 -1.442695, %v1622_v18  ;;  %v3890_v50 = vmul.f32 -1.442695, %v1623_v58 }
 0x36a   : > { %4533 = vpow2.f32 %v3884_v20  ;;  %v1608_v21 = vrot.slane %v5939_v3, 4  ;;  %v1609_v31 = vrot.slane %v5939_v3, 5 }
 0x36b   : > { %4535 = vpow2.f32 %v3885_v60 }
 0x36c   : > { %4537 = vpow2.f32 %v3886_v47  ;;  %v1624_v37 = vadd.f32 %v1608_v21, %v5617_v44  ;;  %v1625_v54 = vadd.f32 %v1609_v31, %v6775_v53 }
 0x36d   : > { %4539 = vpow2.f32 %v3887_v33 }
 0x36e   : > { %4541 = vpow2.f32 %v3888_v2  ;;  %v3891_v33 = vmul.f32 -1.442695, %v1624_v37 }
 0x36f   : > { %4543 = vpow2.f32 %v3889_v22  ;;  %v3892_v22 = vmul.f32 -1.442695, %v1625_v54 }
 0x370   : > { %v4520_v57 = vpop.eup %4519  ;;  %4545 = vpow2.f32 %v3890_v50 }
 0x371   : > { %v4522_v46 = vpop.eup %4521  ;;  %v1580_v20 = vadd.f32 1.0, %v4520_v57 }
 0x372   : > { %v4524_v59 = vpop.eup %4523  ;;  %v1578_v32 = vadd.f32 1.0, %v4522_v46  ;;  %v5967_v46 = vld [vmem:[%s6633_s4] ss:$0 sm:$0xff] }
 0x373   : > { %v4526_v61 = vpop.eup %4525  ;;  %v1579_v51 = vadd.f32 1.0, %v4524_v59  ;;  %4547 = vrcp.f32 %v1580_v20  ;;  %v1674_v20 = vadd.f32 %v5967_v46, %v5936_v38 }
 0x374   : > { %v4528_v13 = vpop.eup %4527  ;;  %v1581_v4 = vadd.f32 1.0, %v4526_v61  ;;  %4549 = vrcp.f32 %v1578_v32 }
 0x375   : > { %v4530_v49 = vpop.eup %4529  ;;  %v1582_v18 = vadd.f32 1.0, %v4528_v13  ;;  %4551 = vrcp.f32 %v1579_v51 }
 0x376   : > { %v4532_v3 = vpop.eup %4531  ;;  %v1583_v58 = vadd.f32 1.0, %v4530_v49  ;;  %4553 = vrcp.f32 %v1581_v4  ;;  %v1676_v49 = vrot.slane %v1674_v20, 6 }
 0x377   : > { %v4534_v60 = vpop.eup %4533  ;;  %v1584_v47 = vadd.f32 1.0, %v4532_v3  ;;  %4555 = vrcp.f32 %v1582_v18 }
 0x378   : > { %v1585_v2 = vadd.f32 1.0, %v4534_v60  ;;  %4557 = vrcp.f32 %v1583_v58  ;;  %v4536_v50 = vpop.eup %4535  ;;  %v1677_v58 = vrot.slane %v1674_v20, 7 }
 0x379   : > { %4559 = vrcp.f32 %v1584_v47  ;;  %v4538_v21 = vpop.eup %4537  ;;  %v1650_v57 = vadd.f32 1.0, %v4536_v50 }
 0x37a   : > { %4561 = vrcp.f32 %v1585_v2  ;;  %v4540_v31 = vpop.eup %4539  ;;  %v1651_v59 = vadd.f32 1.0, %v4538_v21 }
 0x37b   : > { %4563 = vpow2.f32 %v3891_v33  ;;  %v4542_v32 = vpop.eup %4541  ;;  %v1652_v61 = vadd.f32 1.0, %v4540_v31  ;;  %v1678_v33 = vrot.slane %v1674_v20, 1 }
 0x37c   : > { %4565 = vpow2.f32 %v3892_v22  ;;  %v4544_v51 = vpop.eup %4543  ;;  %v1653_v37 = vadd.f32 1.0, %v4542_v32  ;;  %v1679_v22 = vrot.slane %v1674_v20, 2 }
 0x37d   : > { %v4546_v13 = vpop.eup %4545  ;;  %v1654_v4 = vadd.f32 1.0, %v4544_v51  ;;  %4567 = vrcp.f32 %v1650_v57  ;;  %v1680_v57 = vrot.slane %v1674_v20, 3 }
 0x37e   : > { %v1655_v18 = vadd.f32 1.0, %v4546_v13  ;;  %4569 = vrcp.f32 %v1651_v59  ;;  %v1681_v13 = vrot.slane %v1674_v20, 4 }
 0x37f   : > { %4571 = vrcp.f32 %v1652_v61 }
 0x380   : > { %v4548_v54 = vpop.eup %4547  ;;  %4573 = vrcp.f32 %v1653_v37  ;;  %v1682_v37 = vrot.slane %v1674_v20, 5 }
 0x381   : > { %v4550_v3 = vpop.eup %4549  ;;  %v1693_v60 = vmul.f32 %v4548_v54, %v1674_v20  ;;  %4575 = vrcp.f32 %v1654_v4 }
 0x382   : > { %v4552_v47 = vpop.eup %4551  ;;  %v1691_v38 = vmul.f32 %v4550_v3, %v1676_v49  ;;  %4577 = vrcp.f32 %v1655_v18 }
 0x383   : > { %v4554_v2 = vpop.eup %4553  ;;  %v1692_v50 = vmul.f32 %v4552_v47, %v1677_v58  ;;  %v1701_v21 = vadd.f32 %v1693_v60, %v6779_v1 }
 0x384   : > { %v4556_v31 = vpop.eup %4555  ;;  %v1694_v32 = vmul.f32 %v4554_v2, %v1678_v33  ;;  %v1699_v51 = vadd.f32 %v1691_v38, %v6778_v8 }
 0x385   : > { %v4558_v59 = vpop.eup %4557  ;;  %v1695_v54 = vmul.f32 %v4556_v31, %v1679_v22  ;;  %v1700_v61 = vadd.f32 %v1692_v50, %v6777_v63  ;;  %4579 = vtanh.f32 %v1701_v21 }
 0x386   : > { %v4560_v49 = vpop.eup %4559  ;;  %v1696_v3 = vmul.f32 %v4558_v59, %v1680_v57  ;;  %v1702_v58 = vadd.f32 %v1694_v32, %v6780_v11  ;;  %4581 = vtanh.f32 %v1699_v51 }
 0x387   : > { %v4562_v60 = vpop.eup %4561  ;;  %v1697_v4 = vmul.f32 %v4560_v49, %v1681_v13  ;;  %v1703_v47 = vadd.f32 %v1695_v54, %v6781_v23  ;;  %4583 = vtanh.f32 %v1700_v61  ;;  %v1740_v54 = vrot.slane %v5813_v48, 7 }
 0x388   : > { %v4564_v33 = vpop.eup %4563  ;;  %4585 = vtanh.f32 %v1702_v58  ;;  %v1698_v18 = vmul.f32 %v4562_v60, %v1682_v37  ;;  %v1704_v38 = vadd.f32 %v1696_v3, %v6782_v28  ;;  %v1741_v61 = vrot.slane %v5818_v52, 7 }
 0x389   : > { %v4566_v2 = vpop.eup %4565  ;;  %4587 = vtanh.f32 %v1703_v47  ;;  %v1656_v22 = vadd.f32 1.0, %v4564_v33  ;;  %v1705_v50 = vadd.f32 %v1697_v4, %v6783_v56  ;;  %v1739_v3 = vrot.slane %v5815_v30, 7 }
 0x38a   : > { %v1657_v20 = vadd.f32 1.0, %v4566_v2  ;;  %v1706_v21 = vadd.f32 %v1698_v18, %v6784_v62  ;;  %4589 = vtanh.f32 %v1704_v38  ;;  %v4568_v31 = vpop.eup %4567  ;;  %v1742_v58 = vrot.slane %v5820_v39, 7 }
 0x38b   : > { %4591 = vrcp.f32 %v1656_v22  ;;  %v4570_v57 = vpop.eup %4569  ;;  %v1743_v60 = vrot.slane %v5824_v34, 7  ;;  %v1715_v4 = vsub.f32 1.0, %v4568_v31  ;;  %v1744_v33 = vrot.slane %v5830_v9, 7 }
 0x38c   : > { %4593 = vrcp.f32 %v1657_v20  ;;  %v4572_v32 = vpop.eup %4571  ;;  %v1716_v18 = vsub.f32 1.0, %v4570_v57  ;;  %v1745_v48 = vrot.slane %v5838_v27, 7  ;;  %v1755_v20 = vmul.f32 %v4568_v31, %v1739_v3 }
 0x38d   : > { %4595 = vtanh.f32 %v1705_v50  ;;  %v4574_v51 = vpop.eup %4573  ;;  %v1717_v49 = vsub.f32 1.0, %v4572_v32  ;;  %v1757_v2 = vmul.f32 %v4572_v32, %v1741_v61  ;;  %v1756_v56 = vmul.f32 %v4570_v57, %v1740_v54 }
 0x38e   : > { %4597 = vtanh.f32 %v1706_v21  ;;  %v4576_v59 = vpop.eup %4575  ;;  %v1718_v50 = vsub.f32 1.0, %v4574_v51  ;;  %v1758_v1 = vmul.f32 %v4574_v51, %v1742_v58  ;;  %v1746_v32 = vrot.slane %v5840_v35, 7 }
 0x38f   : > { %v4578_v13 = vpop.eup %4577  ;;  %v1719_v62 = vsub.f32 1.0, %v4576_v59  ;;  %v1759_v27 = vmul.f32 %v4576_v59, %v1743_v60 }
 0x390   : > { %v1720_v28 = vsub.f32 1.0, %v4578_v13 }
 0x392   : > { %v4580_v37 = vpop.eup %4579 }
 0x393   : > { %v4582_v47 = vpop.eup %4581  ;;  %v1725_v38 = vmul.f32 %v4580_v37, %v1717_v49 }
 0x394   : > { %v4584_v22 = vpop.eup %4583  ;;  %v1723_v52 = vmul.f32 %v4582_v47, %v1715_v4  ;;  %v1760_v4 = vmul.f32 %v4578_v13, %v1744_v33 }
 0x395   : > { %v4586_v21 = vpop.eup %4585  ;;  %v1724_v30 = vmul.f32 %v4584_v22, %v1716_v18  ;;  %v5986_v39 = vadd.f32 %v1757_v2, %v1725_v38 }
 0x396   : > { %v4588_v34 = vpop.eup %4587  ;;  %v1726_v23 = vmul.f32 %v4586_v21, %v1718_v50  ;;  %v5988_v9 = vadd.f32 %v1755_v20, %v1723_v52 }
 0x397   : > { %v4590_v49 = vpop.eup %4589  ;;  %v1727_v61 = vmul.f32 %v4588_v34, %v1719_v62  ;;  %v5991_v37 = vadd.f32 %v1756_v56, %v1724_v30  ;;  %v1773_v62 = vpack.c.bf16 %v5986_v39, %v5986_v39 }
 0x398   : > { %v4592_v31 = vpop.eup %4591  ;;  %v1728_v3 = vmul.f32 %v4590_v49, %v1720_v28  ;;  %v5993_v47 = vadd.f32 %v1758_v1, %v1726_v23  ;;  %v1771_v57 = vpack.c.bf16 %v5988_v9, %v5988_v9 }
 0x399   : > { %v4594_v54 = vpop.eup %4593  ;;  %v1721_v18 = vsub.f32 1.0, %v4592_v31  ;;  %v5997_v51 = vadd.f32 %v1759_v27, %v1727_v61  ;;  %v1772_v58 = vpack.c.bf16 %v5991_v37, %v5991_v37  ;;  %v1761_v59 = vmul.f32 %v4592_v31, %v1745_v48 }
 0x39a   : > { %v4596_v56 = vpop.eup %4595  ;;  %v1722_v35 = vsub.f32 1.0, %v4594_v54  ;;  %v6003_v28 = vadd.f32 %v1760_v4, %v1728_v3  ;;  %v1774_v1 = vpack.c.bf16 %v5993_v47, %v5993_v47  ;;  %v1787_v33 = vunpack.c.l.b16 %v1771_v57 }
 0x39b   : > { %v4598_v23 = vpop.eup %4597  ;;  %v1729_v13 = vmul.f32 %v4596_v56, %v1721_v18  ;;  %v1775_v60 = vpack.c.bf16 %v5997_v51, %v5997_v51  ;;  %v1788_v38 = vunpack.c.l.b16 %v1772_v58  ;;  %v1762_v22 = vmul.f32 %v4594_v54, %v1746_v32 }
 0x39c   : > { %v1730_v2 = vmul.f32 %v4598_v23, %v1722_v35  ;;  %v1776_v50 = vpack.c.bf16 %v6003_v28, %v6003_v28  ;;  %v1790_v52 = vunpack.c.l.b16 %v1774_v1  ;;  %v1795_v21 = vrot.slane %v1787_v33, 2  ;;  %v6804_v33 = vld [vmem:[#allocation17_spill] sm:$0xff] }
 0x39d   : > { %v6011_v20 = vadd.f32 %v1761_v59, %v1729_v13  ;;  %v1791_v48 = vunpack.c.l.b16 %v1775_v60  ;;  %v1796_v30 = vrot.slane %v1788_v38, 1  ;;  %v1789_v49 = vunpack.c.l.b16 %v1773_v62  ;;  %v6810_v38 = vld [vmem:[#allocation23_spill] sm:$0xff] }
 0x39e   : > { %v6013_v34 = vadd.f32 %v1762_v22, %v1730_v2  ;;  %v1792_v61 = vunpack.c.l.b16 %v1776_v50  ;;  %v1799_v3 = vrot.slane %v1790_v52, 7  ;;  %v6811_v2 = vld [vmem:[#allocation28_spill] sm:$0xff]  ;;  %v6812_v22 = vld [vmem:[#allocation29_spill] sm:$0xff]  ;;  %v6814_v52 = vld [vmem:[#allocation31_spill] sm:$0xff] }
 0x39f   : > { %v1777_v27 = vpack.c.bf16 %v6011_v20, %v6011_v20  ;;  %v1797_v31 = vsel %vm1065_vm2, %v1796_v30, %v1795_v21  ;;  %v1801_v57 = vrot.slane %v1791_v48, 6  ;;  %v6813_v50 = vld [vmem:[#allocation33_spill] sm:$0xff]  ;;  %v6815_v48 = vld [vmem:[#allocation38_spill] sm:$0xff]  ;;  %v6816_v21 = vld [vmem:[#allocation39_spill] sm:$0xff] }
 0x3a0   : > { %v1778_v32 = vpack.c.bf16 %v6013_v34, %v6013_v34  ;;  %v1798_v4 = vsel %vm1068_vm3, %v1789_v49, %v1797_v31  ;;  %v1803_v58 = vrot.slane %v1792_v61, 5 }
 0x3a1   : > { %v1793_v54 = vunpack.c.l.b16 %v1777_v27  ;;  %v1800_v18 = vsel %vm1071_vm4, %v1799_v3, %v1798_v4 }
 0x3a2   : > { %v1794_v56 = vunpack.c.l.b16 %v1778_v32  ;;  %v1802_v62 = vsel %vm1074_vm5, %v1801_v57, %v1800_v18 }
 0x3a3   : > { %v1804_v35 = vsel %vm1077_vm6, %v1803_v58, %v1802_v62  ;;  %v1805_v59 = vrot.slane %v1793_v54, 4 }
 0x3a4   : > { %v1807_v1 = vrot.slane %v1794_v56, 3  ;;  %v6817_v56 = vld [vmem:[#allocation22_spill] sm:$0xff] }
 0x3a5   : > { %v1806_v23 = vsel %vm1080_vm7, %v1805_v59, %v1804_v35  ;;  %v6818_v59 = vld [vmem:[#allocation24_spill] sm:$0xff] }
 0x3a6   : > { %v1808_v13 = vsel %vm1083_vm8, %v1807_v1, %v1806_v23 }
 0x3a7   : > { %v1809_v60 = vpack.c.b16 %v1808_v13, %v1808_v13 }
 0x3a9   : > { %1844 = vmatmul.mubr.bf16.vlgmr.msra.gmra.mxu0 %v1809_v60  ;;  %4148 = vmatmul.mubr.bf16.vlgmr.msra.gmra.mxu1 %v1809_v60 }
 0x3aa   : > { %2174 = vmatpush1.bf16.msra.mxu0 %v5853_v10  ;;  %4152 = vmatpush3.bf16.msra.mxu1 %v5856_v15  ;;  %v6801_v10 = vld [vmem:[#allocation15_spill] sm:$0xff]  ;;  %v6802_v15 = vld [vmem:[#allocation16_spill] sm:$0xff] }
 0x3ab   : > { %2175 = vmatprep.subr.bf16.mxu0 %v5859_v17  ;;  %4153 = vmatprep.subr.bf16.mxu1 %v6762_v0  ;;  %v6803_v17 = vld [vmem:[#allocation19_spill] sm:$0xff] }
 0x3ac   : > { %2205 = vmatprep.mubr.bf16.mxu0 %v6763_v41  ;;  %4167 = vmatprep.mubr.msk.bf16.mxu1 %vm5237_vm1, %v6762_v0 }
 0x3ae   : > { %2176 = vmatpush1.bf16.msra.mxu0 %v5866_v19  ;;  %4154 = vmatpush3.bf16.msra.mxu1 %v5869_v6  ;;  %v6805_v19 = vld [vmem:[#allocation18_spill] sm:$0xff]  ;;  %v6806_v6 = vld [vmem:[#allocation20_spill] sm:$0xff] }
 0x3af   : > { %2177 = vmatprep.subr.bf16.mxu0 %v5872_v24  ;;  %4155 = vmatprep.subr.bf16.mxu1 %v6762_v0  ;;  %v6807_v24 = vld [vmem:[#allocation14_spill] sm:$0xff] }
 0x3b2   : > { %2178 = vmatpush1.bf16.msra.mxu0 %v5876_v25  ;;  %4156 = vmatpush3.bf16.msra.mxu1 %v5879_v26  ;;  %v6808_v25 = vld [vmem:[#allocation25_spill] sm:$0xff]  ;;  %v6809_v26 = vld [vmem:[#allocation27_spill] sm:$0xff] }
 0x3b3   : > { %2179 = vmatprep.subr.bf16.mxu0 %v6801_v10  ;;  %4157 = vmatprep.subr.bf16.mxu1 %v6762_v0 }
 0x3b6   : > { %2180 = vmatpush1.bf16.msra.mxu0 %v6802_v15  ;;  %4158 = vmatpush3.bf16.msra.mxu1 %v6803_v17 }
 0x3b7   : > { %2181 = vmatprep.subr.bf16.mxu0 %v6804_v33  ;;  %4159 = vmatprep.subr.bf16.mxu1 %v6762_v0 }
 0x3ba   : > { %2182 = vmatpush1.bf16.msra.mxu0 %v6805_v19  ;;  %4160 = vmatpush3.bf16.msra.mxu1 %v6806_v6 }
 0x3bb   : > { %2183 = vmatprep.subr.bf16.mxu0 %v6807_v24  ;;  %4161 = vmatprep.subr.bf16.mxu1 %v6762_v0 }
 0x3be   : > { %2184 = vmatpush1.bf16.msra.mxu0 %v6808_v25  ;;  %4162 = vmatpush3.bf16.msra.mxu1 %v6809_v26 }
 0x3bf   : > { %2185 = vmatprep.subr.bf16.mxu0 %v6810_v38  ;;  %4163 = vmatprep.subr.bf16.mxu1 %v6762_v0 }
 0x3c2   : > { %2186 = vmatpush1.bf16.msra.mxu0 %v6811_v2  ;;  %4164 = vmatpush3.bf16.msra.mxu1 %v6812_v22 }
 0x3c3   : > { %2187 = vmatprep.subr.bf16.mxu0 %v6813_v50  ;;  %4165 = vmatprep.subr.bf16.mxu1 %v6762_v0 }
 0x3c6   : > { %2188 = vmatpush1.bf16.msra.mxu0 %v6814_v52  ;;  %4166 = vmatpush3.bf16.msra.mxu1 %v6815_v48 }
 0x3c7   : > { %2535 = vmatprep.subr.bf16.mxu0 %v6816_v21  ;;  %4171 = vmatprep.subr.bf16.mxu1 %v6762_v0 }
 0x469   : > { %v1845_v30 = vpop.f32.mrf.mxu0  ;;  %v6061_v49 = vpop.f32.mrf.mxu1 }
 0x46a   : > { %v1893_v61 = vrot.slane %v1845_v30, 5  ;;  %v1894_v27 = vrot.slane %v1845_v30, 6  ;;  %v1895_v31 = vrot.slane %v1845_v30, 7  ;;  %v1896_v3 = vrot.slane %v1845_v30, 1 }
 0x46b   : > { %v1897_v32 = vrot.slane %v1845_v30, 2  ;;  %v1898_v4 = vrot.slane %v1845_v30, 3  ;;  %v1899_v57 = vrot.slane %v1845_v30, 4  ;;  %v1911_v54 = vadd.f32 %v1845_v30, %v6772_v55  ;;  %v6064_v18 = vpop.f32.mrf.mxu0  ;;  %v4149_v58 = vpop.f32.mrf.mxu1 }
 0x46c   : > { %v1908_v62 = vadd.f32 %v1893_v61, %v6817_v56  ;;  %v1909_v35 = vadd.f32 %v1894_v27, %v5587_v5  ;;  %v1910_v1 = vadd.f32 %v1895_v31, %v6818_v59  ;;  %v1912_v23 = vadd.f32 %v1896_v3, %v5604_v36 }
 0x46d   : > { %v1913_v13 = vadd.f32 %v1897_v32, %v6773_v16  ;;  %v1914_v60 = vadd.f32 %v1898_v4, %v5614_v43  ;;  %v3896_v10 = vmul.f32 -1.442695, %v1911_v54  ;;  %v1849_v15 = vpop.f32.mrf.mxu0  ;;  %v1889_v17 = vpop.f32.mrf.mxu1  ;;  %v1915_v33 = vadd.f32 %v1899_v57, %v5619_v45 }
 0x46e   : > { %v3893_v19 = vmul.f32 -1.442695, %v1908_v62  ;;  %v3894_v6 = vmul.f32 -1.442695, %v1909_v35  ;;  %v3895_v24 = vmul.f32 -1.442695, %v1910_v1  ;;  %v1983_v32 = vadd.f32 %v6064_v18, %v5602_v29 }
 0x46f   : > { %4599 = vpow2.f32 %v3896_v10  ;;  %v3897_v25 = vmul.f32 -1.442695, %v1912_v23  ;;  %v1850_v26 = vpop.f32.mrf.mxu0  ;;  %v4150_v38 = vpop.f32.mrf.mxu1  ;;  %v3898_v2 = vmul.f32 -1.442695, %v1913_v13  ;;  %v3899_v22 = vmul.f32 -1.442695, %v1914_v60 }
 0x470   : > { %4601 = vpow2.f32 %v3893_v19  ;;  %v3900_v50 = vmul.f32 -1.442695, %v1915_v33  ;;  %v1965_v52 = vrot.slane %v6064_v18, 5  ;;  %v1966_v48 = vrot.slane %v6064_v18, 6 }
 0x471   : > { %4603 = vpow2.f32 %v3894_v6  ;;  %v1967_v21 = vrot.slane %v6064_v18, 7  ;;  %v1968_v30 = vrot.slane %v6064_v18, 1  ;;  %v1969_v61 = vrot.slane %v6064_v18, 2 }
 0x472   : > { %4605 = vpow2.f32 %v3895_v24  ;;  %v1980_v27 = vadd.f32 %v1965_v52, %v6774_v12  ;;  %v1981_v31 = vadd.f32 %v1966_v48, %v5592_v7  ;;  %v3904_v35 = vmul.f32 -1.442695, %v1983_v32 }
 0x473   : > { %4607 = vpow2.f32 %v3897_v25  ;;  %v1982_v3 = vadd.f32 %v1967_v21, %v5597_v14  ;;  %v1984_v4 = vadd.f32 %v1968_v30, %v5607_v40  ;;  %v1985_v57 = vadd.f32 %v1969_v61, %v5612_v42 }
 0x474   : > { %4609 = vpow2.f32 %v3898_v2  ;;  %v3901_v54 = vmul.f32 -1.442695, %v1980_v27  ;;  %v3902_v58 = vmul.f32 -1.442695, %v1981_v31  ;;  %v1970_v13 = vrot.slane %v6064_v18, 3 }
 0x475   : > { %4611 = vpow2.f32 %v3899_v22  ;;  %v3903_v62 = vmul.f32 -1.442695, %v1982_v3  ;;  %v3905_v1 = vmul.f32 -1.442695, %v1984_v4  ;;  %v3906_v23 = vmul.f32 -1.442695, %v1985_v57 }
 0x476   : > { %4613 = vpow2.f32 %v3900_v50  ;;  %v1971_v10 = vrot.slane %v6064_v18, 4  ;;  %v1986_v25 = vadd.f32 %v1970_v13, %v5617_v44  ;;  %v2036_v57 = vadd.f32 %v5967_v46, %v6061_v49 }
 0x477   : > { %4615 = vpow2.f32 %v3901_v54 }
 0x478   : > { %4617 = vpow2.f32 %v3902_v58  ;;  %v1987_v2 = vadd.f32 %v1971_v10, %v6775_v53  ;;  %v3907_v30 = vmul.f32 -1.442695, %v1986_v25  ;;  %v2038_v10 = vrot.slane %v2036_v57, 5 }
 0x479   : > { %4619 = vpow2.f32 %v3903_v62  ;;  %v2041_v25 = vrot.slane %v2036_v57, 1 }
 0x47a   : > { %4621 = vpow2.f32 %v3904_v35  ;;  %v3908_v27 = vmul.f32 -1.442695, %v1987_v2 }
 0x47b   : > { %4623 = vpow2.f32 %v3905_v1 }
 0x47c   : > { %v4600_v60 = vpop.eup %4599  ;;  %4625 = vpow2.f32 %v3906_v23 }
 0x47d   : > { %v4602_v15 = vpop.eup %4601  ;;  %v1943_v17 = vadd.f32 1.0, %v4600_v60 }
 0x47e   : > { %v4604_v33 = vpop.eup %4603  ;;  %v1940_v19 = vadd.f32 1.0, %v4602_v15 }
 0x47f   : > { %v4606_v6 = vpop.eup %4605  ;;  %v1941_v24 = vadd.f32 1.0, %v4604_v33  ;;  %4627 = vrcp.f32 %v1943_v17  ;;  %v2039_v33 = vrot.slane %v2036_v57, 6 }
 0x480   : > { %v4608_v26 = vpop.eup %4607  ;;  %v1942_v38 = vadd.f32 1.0, %v4606_v6  ;;  %4629 = vrcp.f32 %v1940_v19 }
 0x481   : > { %v4610_v22 = vpop.eup %4609  ;;  %v1944_v50 = vadd.f32 1.0, %v4608_v26  ;;  %4631 = vrcp.f32 %v1941_v24  ;;  %v2040_v24 = vrot.slane %v2036_v57, 7 }
 0x482   : > { %v4612_v18 = vpop.eup %4611  ;;  %v1945_v52 = vadd.f32 1.0, %v4610_v22  ;;  %4633 = vrcp.f32 %v1942_v38  ;;  %v2042_v22 = vrot.slane %v2036_v57, 2 }
 0x483   : > { %v4614_v48 = vpop.eup %4613  ;;  %v1946_v21 = vadd.f32 1.0, %v4612_v18  ;;  %4635 = vrcp.f32 %v1944_v50 }
 0x484   : > { %v1947_v61 = vadd.f32 1.0, %v4614_v48  ;;  %4637 = vrcp.f32 %v1945_v52  ;;  %v4616_v31 = vpop.eup %4615  ;;  %v2043_v48 = vrot.slane %v2036_v57, 3 }
 0x485   : > { %4639 = vrcp.f32 %v1946_v21  ;;  %v4618_v3 = vpop.eup %4617  ;;  %v2012_v32 = vadd.f32 1.0, %v4616_v31 }
 0x486   : > { %4641 = vrcp.f32 %v1947_v61  ;;  %v4620_v4 = vpop.eup %4619  ;;  %v2013_v54 = vadd.f32 1.0, %v4618_v3  ;;  %v6819_v3 = vld [vmem:[#allocation30_spill] sm:$0xff] }
 0x487   : > { %4643 = vpow2.f32 %v3907_v30  ;;  %v4622_v58 = vpop.eup %4621  ;;  %v2014_v35 = vadd.f32 1.0, %v4620_v4 }
 0x488   : > { %4645 = vpow2.f32 %v3908_v27  ;;  %v4624_v62 = vpop.eup %4623  ;;  %v2015_v1 = vadd.f32 1.0, %v4622_v58  ;;  %v2044_v27 = vrot.slane %v2036_v57, 4  ;;  %v6820_v58 = vld [vmem:[#allocation34_spill] sm:$0xff] }
 0x489   : > { %v4626_v23 = vpop.eup %4625  ;;  %v2016_v13 = vadd.f32 1.0, %v4624_v62  ;;  %4647 = vrcp.f32 %v2012_v32 }
 0x48a   : > { %v2017_v15 = vadd.f32 1.0, %v4626_v23  ;;  %4649 = vrcp.f32 %v2013_v54  ;;  %v6821_v23 = vld [vmem:[#allocation35_spill] sm:$0xff] }
 0x48b   : > { %4651 = vrcp.f32 %v2015_v1 }
 0x48c   : > { %v4628_v60 = vpop.eup %4627  ;;  %4653 = vrcp.f32 %v2014_v35 }
 0x48d   : > { %v4630_v17 = vpop.eup %4629  ;;  %v2056_v19 = vmul.f32 %v4628_v60, %v2036_v57  ;;  %4655 = vrcp.f32 %v2016_v13 }
 0x48e   : > { %v4632_v6 = vpop.eup %4631  ;;  %v2053_v46 = vmul.f32 %v4630_v17, %v2038_v10  ;;  %4657 = vrcp.f32 %v2017_v15  ;;  %v6822_v15 = vld [vmem:[#allocation36_spill] sm:$0xff] }
 0x48f   : > { %v4634_v49 = vpop.eup %4633  ;;  %v2054_v26 = vmul.f32 %v4632_v6, %v2039_v33  ;;  %v2064_v38 = vadd.f32 %v2056_v19, %v6780_v11  ;;  %v6823_v33 = vld [vmem:[#allocation37_spill] sm:$0xff] }
 0x490   : > { %v4636_v2 = vpop.eup %4635  ;;  %v2055_v50 = vmul.f32 %v4634_v49, %v2040_v24  ;;  %v2061_v18 = vadd.f32 %v2053_v46, %v6778_v8 }
 0x491   : > { %v4638_v52 = vpop.eup %4637  ;;  %v2057_v21 = vmul.f32 %v4636_v2, %v2041_v25  ;;  %v2062_v30 = vadd.f32 %v2054_v26, %v6777_v63  ;;  %4659 = vtanh.f32 %v2064_v38  ;;  %v2103_v38 = vrot.slane %v5986_v39, 7 }
 0x492   : > { %v4640_v61 = vpop.eup %4639  ;;  %v2058_v31 = vmul.f32 %v4638_v52, %v2042_v22  ;;  %v2063_v32 = vadd.f32 %v2055_v50, %v6819_v3  ;;  %4661 = vtanh.f32 %v2061_v18  ;;  %v2104_v2 = vrot.slane %v5993_v47, 7 }
 0x493   : > { %v4642_v4 = vpop.eup %4641  ;;  %v2059_v54 = vmul.f32 %v4640_v61, %v2043_v48  ;;  %v2065_v62 = vadd.f32 %v2057_v21, %v6820_v58  ;;  %4663 = vtanh.f32 %v2062_v30  ;;  %v2101_v18 = vrot.slane %v5988_v9, 7 }
 0x494   : > { %v4644_v35 = vpop.eup %4643  ;;  %4665 = vtanh.f32 %v2063_v32  ;;  %v2060_v1 = vmul.f32 %v4642_v4, %v2044_v27  ;;  %v2066_v13 = vadd.f32 %v2058_v31, %v6821_v23  ;;  %v2102_v52 = vrot.slane %v5991_v37, 7 }
 0x495   : > { %v4646_v60 = vpop.eup %4645  ;;  %4667 = vtanh.f32 %v2065_v62  ;;  %v2018_v10 = vadd.f32 1.0, %v4644_v35  ;;  %v2067_v17 = vadd.f32 %v2059_v54, %v6822_v15  ;;  %v2105_v48 = vrot.slane %v5997_v51, 7 }
 0x496   : > { %v2019_v57 = vadd.f32 1.0, %v4646_v60  ;;  %v2068_v19 = vadd.f32 %v2060_v1, %v6823_v33  ;;  %4669 = vtanh.f32 %v2066_v13  ;;  %v4648_v6 = vpop.eup %4647  ;;  %v2106_v61 = vrot.slane %v6003_v28, 7 }
 0x497   : > { %4671 = vrcp.f32 %v2018_v10  ;;  %v4650_v24 = vpop.eup %4649  ;;  %v2077_v21 = vsub.f32 1.0, %v4648_v6  ;;  %v2107_v39 = vrot.slane %v6011_v20, 7  ;;  %v2117_v62 = vmul.f32 %v4648_v6, %v2101_v18 }
 0x498   : > { %4673 = vrcp.f32 %v2019_v57  ;;  %v4652_v46 = vpop.eup %4651  ;;  %v2078_v27 = vsub.f32 1.0, %v4650_v24  ;;  %v2118_v13 = vmul.f32 %v4650_v24, %v2102_v52 }
 0x499   : > { %4675 = vtanh.f32 %v2067_v17  ;;  %v4654_v49 = vpop.eup %4653  ;;  %v2080_v22 = vsub.f32 1.0, %v4652_v46  ;;  %v2120_v32 = vmul.f32 %v4652_v46, %v2104_v2 }
 0x49a   : > { %4677 = vtanh.f32 %v2068_v19  ;;  %v4656_v25 = vpop.eup %4655  ;;  %v2079_v54 = vsub.f32 1.0, %v4654_v49  ;;  %v2119_v17 = vmul.f32 %v4654_v49, %v2103_v38  ;;  %v2108_v19 = vrot.slane %v6013_v34, 7 }
 0x49b   : > { %v4658_v26 = vpop.eup %4657  ;;  %v2081_v1 = vsub.f32 1.0, %v4656_v25  ;;  %v2121_v20 = vmul.f32 %v4656_v25, %v2105_v48 }
 0x49c   : > { %v2082_v60 = vsub.f32 1.0, %v4658_v26 }
 0x49e   : > { %v4660_v50 = vpop.eup %4659 }
 0x49f   : > { %v4662_v30 = vpop.eup %4661  ;;  %v2088_v31 = vmul.f32 %v4660_v50, %v2080_v22  ;;  %v2122_v50 = vmul.f32 %v4658_v26, %v2106_v61 }
 0x4a0   : > { %v4664_v4 = vpop.eup %4663  ;;  %v2085_v47 = vmul.f32 %v4662_v30, %v2077_v21 }
 0x4a1   : > { %v4666_v35 = vpop.eup %4665  ;;  %v2086_v9 = vmul.f32 %v4664_v4, %v2078_v27  ;;  %v6106_v37 = vadd.f32 %v2120_v32, %v2088_v31 }
 0x4a2   : > { %v4668_v51 = vpop.eup %4667  ;;  %v2087_v10 = vmul.f32 %v4666_v35, %v2079_v54  ;;  %v6108_v28 = vadd.f32 %v2117_v62, %v2085_v47 }
 0x4a3   : > { %v4670_v57 = vpop.eup %4669  ;;  %v2089_v46 = vmul.f32 %v4668_v51, %v2081_v1  ;;  %v6111_v2 = vadd.f32 %v2118_v13, %v2086_v9  ;;  %v2136_v34 = vpack.c.bf16 %v6106_v37, %v6106_v37 }
 0x4a4   : > { %v4672_v6 = vpop.eup %4671  ;;  %v2090_v22 = vmul.f32 %v4670_v57, %v2082_v60  ;;  %v6113_v18 = vadd.f32 %v2119_v17, %v2087_v10  ;;  %v2133_v24 = vpack.c.bf16 %v6108_v28, %v6108_v28 }
 0x4a5   : > { %v4674_v52 = vpop.eup %4673  ;;  %v2083_v21 = vsub.f32 1.0, %v4672_v6  ;;  %v6117_v49 = vadd.f32 %v2121_v20, %v2089_v46  ;;  %v2134_v38 = vpack.c.bf16 %v6111_v2, %v6111_v2  ;;  %v2123_v30 = vmul.f32 %v4672_v6, %v2107_v39 }
 0x4a6   : > { %v4676_v25 = vpop.eup %4675  ;;  %v2084_v48 = vsub.f32 1.0, %v4674_v52  ;;  %v6123_v27 = vadd.f32 %v2122_v50, %v2090_v22  ;;  %v2135_v26 = vpack.c.bf16 %v6113_v18, %v6113_v18  ;;  %v2149_v4 = vunpack.c.l.b16 %v2133_v24 }
 0x4a7   : > { %v4678_v61 = vpop.eup %4677  ;;  %v2091_v31 = vmul.f32 %v4676_v25, %v2083_v21  ;;  %v2137_v32 = vpack.c.bf16 %v6117_v49, %v6117_v49  ;;  %v2150_v54 = vunpack.c.l.b16 %v2134_v38  ;;  %v2124_v62 = vmul.f32 %v4674_v52, %v2108_v19 }
 0x4a8   : > { %v2092_v47 = vmul.f32 %v4678_v61, %v2084_v48  ;;  %v2138_v35 = vpack.c.bf16 %v6123_v27, %v6123_v27  ;;  %v2151_v1 = vunpack.c.l.b16 %v2135_v26  ;;  %v2157_v13 = vrot.slane %v2149_v4, 3  ;;  %v6152_v4 = vld [vmem:[#allocation9 + $0x94] ss:$12 sps:$4 sm:$0xff]  }
 0x4a9   : > { %v6131_v9 = vadd.f32 %v2123_v30, %v2091_v31  ;;  %v2153_v39 = vunpack.c.l.b16 %v2137_v32  ;;  %v2158_v51 = vrot.slane %v2150_v54, 2  ;;  %v2152_v46 = vunpack.c.l.b16 %v2136_v34  ;;  %v6146_v31 = vld [vmem:[#allocation9 + $0xa8] ss:$12 sps:$4 sm:$0xff]   ;;  %v6149_v32 = vld [vmem:[#allocation9 + $0xb0] ss:$12 sps:$4 sm:$0xff]  }
 0x4aa   : > { %v6133_v60 = vadd.f32 %v2124_v62, %v2092_v47  ;;  %v2154_v10 = vunpack.c.l.b16 %v2138_v35  ;;  %v2160_v17 = vrot.slane %v2151_v1, 1  ;;  %v6159_v54 = vld [vmem:[#allocation9 + $0x90] ss:$12 sps:$4 sm:$0xff]   ;;  %v6162_v47 = vld [vmem:[#allocation9 + $0x98] ss:$12 sps:$4 sm:$0xff]  }
 0x4ab   : > { %v2139_v57 = vpack.c.bf16 %v6131_v9, %v6131_v9  ;;  %v2159_v20 = vsel %vm1065_vm2, %v2158_v51, %v2157_v13  ;;  %v2163_v22 = vrot.slane %v2153_v39, 7  ;;  %v6165_v62 = vld [vmem:[#allocation9 + $0x7c] ss:$12 sps:$4 sm:$0xff]   ;;  %v6169_v35 = vld [vmem:[#allocation9 + $0x78] ss:$12 sps:$4 sm:$0xff]  }
 0x4ac   : > { %v2140_v19 = vpack.c.bf16 %v6133_v60, %v6133_v60  ;;  %v2161_v6 = vsel %vm1068_vm3, %v2160_v17, %v2159_v20  ;;  %v2165_v52 = vrot.slane %v2154_v10, 6  ;;  %v6172_v1 = vld [vmem:[#allocation9 + $0x80] ss:$12 sps:$4 sm:$0xff]   ;;  %v6175_v39 = vld [vmem:[#allocation9 + $0x64] ss:$12 sps:$4 sm:$0xff]  }
 0x4ad   : > { %v2155_v50 = vunpack.c.l.b16 %v2139_v57  ;;  %v2162_v24 = vsel %vm1071_vm4, %v2152_v46, %v2161_v6  ;;  %6824 = vst [vmem:[#allocation15_spill] sm:$0xff] %v6172_v1  ;;  %6825 = vst [vmem:[#allocation16_spill] sm:$0xff] %v6175_v39  ;;  %v6179_v13 = vld [vmem:[#allocation9 + $0x60] ss:$12 sps:$4 sm:$0xff]   ;;  %v6182_v51 = vld [vmem:[#allocation9 + $0x68] ss:$12 sps:$4 sm:$0xff]  }
 0x4ae   : > { %v2156_v21 = vunpack.c.l.b16 %v2140_v19  ;;  %v2164_v38 = vsel %vm1074_vm5, %v2163_v22, %v2162_v24  ;;  %6826 = vst [vmem:[#allocation19_spill] sm:$0xff] %v6179_v13  ;;  %6827 = vst [vmem:[#allocation17_spill] sm:$0xff] %v6182_v51  ;;  %v6185_v10 = vld [vmem:[#allocation9 + $0x4c] ss:$12 sps:$4 sm:$0xff]   ;;  %v6189_v17 = vld [vmem:[#allocation9 + $0x48] ss:$12 sps:$4 sm:$0xff]  }
 0x4af   : > { %v2166_v25 = vsel %vm1077_vm6, %v2165_v52, %v2164_v38  ;;  %v2167_v48 = vrot.slane %v2155_v50, 5  ;;  %6828 = vst [vmem:[#allocation18_spill] sm:$0xff] %v6185_v10  ;;  %6829 = vst [vmem:[#allocation20_spill] sm:$0xff] %v6189_v17  ;;  %v6192_v57 = vld [vmem:[#allocation9 + $0x50] ss:$12 sps:$4 sm:$0xff]  }
 0x4b0   : > { %v2169_v30 = vrot.slane %v2156_v21, 4  ;;  %6830 = vst [vmem:[#allocation14_spill] sm:$0xff] %v6192_v57  ;;  %v6195_v46 = vld [vmem:[#allocation9 + $0x34] ss:$12 sps:$4 sm:$0xff]   ;;  %v6199_v20 = vld [vmem:[#allocation9 + $0x30] ss:$12 sps:$4 sm:$0xff]  }
 0x4b1   : > { %v2168_v34 = vsel %vm1080_vm7, %v2167_v48, %v2166_v25  ;;  %6831 = vst [vmem:[#allocation25_spill] sm:$0xff] %v6195_v46  ;;  %6832 = vst [vmem:[#allocation27_spill] sm:$0xff] %v6199_v20  ;;  %v6202_v19 = vld [vmem:[#allocation9 + $0x38] ss:$12 sps:$4 sm:$0xff]   ;;  %v6205_v6 = vld [vmem:[#allocation9 + $0x1c] ss:$12 sps:$4 sm:$0xff]  }
 0x4b2   : > { %v2170_v26 = vsel %vm1083_vm8, %v2169_v30, %v2168_v34  ;;  %6833 = vst [vmem:[#allocation23_spill] sm:$0xff] %v6202_v19  ;;  %6834 = vst [vmem:[#allocation28_spill] sm:$0xff] %v6205_v6  ;;  %v6209_v22 = vld [vmem:[#allocation9 + $0x18] ss:$12 sps:$4 sm:$0xff]   ;;  %v6212_v50 = vld [vmem:[#allocation9 + $0x20] ss:$12 sps:$4 sm:$0xff]  }
 0x4b3   : > { %v2171_v61 = vpack.c.b16 %v2170_v26, %v2170_v26  ;;  %6835 = vst [vmem:[#allocation29_spill] sm:$0xff] %v6209_v22  ;;  %6836 = vst [vmem:[#allocation33_spill] sm:$0xff] %v6212_v50  ;;  %v6215_v24 = vld [vmem:[#allocation9 + $0x4] ss:$12 sps:$4 sm:$0xff]   ;;  %v6219_v52 = vld [vmem:[#allocation9] ss:$12 sps:$4 sm:$0xff]  }
 0x4b4   : > { %6837 = vst [vmem:[#allocation31_spill] sm:$0xff] %v6215_v24  ;;  %6838 = vst [vmem:[#allocation38_spill] sm:$0xff] %v6219_v52  ;;  %v6222_v21 = vld [vmem:[#allocation9 + $0x8] ss:$12 sps:$4 sm:$0xff]   ;;  %v6225_v38 = vld [vmem:[#allocation9 + $0xac] ss:$12 sps:$4 sm:$0xff]  }
 0x4b5   : > { %2206 = vmatmul.mubr.bf16.vlgmr.msra.gmra.mxu0 %v2171_v61  ;;  %4168 = vmatmul.mubr.bf16.vlgmr.msra.gmra.mxu1 %v2171_v61  ;;  %6839 = vst [vmem:[#allocation39_spill] sm:$0xff] %v6222_v21  ;;  %6840 = vst [vmem:[#allocation22_spill] sm:$0xff] %v6225_v38 }
 0x4b6   : > { %2536 = vmatpush1.bf16.msra.mxu0 %v6146_v31  ;;  %4172 = vmatpush3.bf16.msra.mxu1 %v6149_v32 }
 0x4b7   : > { %2537 = vmatprep.subr.bf16.mxu0 %v6152_v4  ;;  %4173 = vmatprep.subr.bf16.mxu1 %v6762_v0 }
 0x4b8   : > { %2567 = vmatprep.mubr.bf16.mxu0 %v6763_v41  ;;  %4187 = vmatprep.mubr.msk.bf16.mxu1 %vm5237_vm1, %v6762_v0 }
 0x4ba   : > { %2538 = vmatpush1.bf16.msra.mxu0 %v6159_v54  ;;  %4174 = vmatpush3.bf16.msra.mxu1 %v6162_v47 }
 0x4bb   : > { %2539 = vmatprep.subr.bf16.mxu0 %v6165_v62  ;;  %4175 = vmatprep.subr.bf16.mxu1 %v6762_v0 }
 0x4be   : > { %2540 = vmatpush1.bf16.msra.mxu0 %v6169_v35  ;;  %4176 = vmatpush3.bf16.msra.mxu1 %v6172_v1 }
 0x4bf   : > { %2541 = vmatprep.subr.bf16.mxu0 %v6175_v39  ;;  %4177 = vmatprep.subr.bf16.mxu1 %v6762_v0 }
 0x4c2   : > { %2542 = vmatpush1.bf16.msra.mxu0 %v6179_v13  ;;  %4178 = vmatpush3.bf16.msra.mxu1 %v6182_v51 }
 0x4c3   : > { %2543 = vmatprep.subr.bf16.mxu0 %v6185_v10  ;;  %4179 = vmatprep.subr.bf16.mxu1 %v6762_v0 }
 0x4c6   : > { %2544 = vmatpush1.bf16.msra.mxu0 %v6189_v17  ;;  %4180 = vmatpush3.bf16.msra.mxu1 %v6192_v57 }
 0x4c7   : > { %2545 = vmatprep.subr.bf16.mxu0 %v6195_v46  ;;  %4181 = vmatprep.subr.bf16.mxu1 %v6762_v0 }
 0x4ca   : > { %2546 = vmatpush1.bf16.msra.mxu0 %v6199_v20  ;;  %4182 = vmatpush3.bf16.msra.mxu1 %v6202_v19 }
 0x4cb   : > { %2547 = vmatprep.subr.bf16.mxu0 %v6205_v6  ;;  %4183 = vmatprep.subr.bf16.mxu1 %v6762_v0 }
 0x4ce   : > { %2548 = vmatpush1.bf16.msra.mxu0 %v6209_v22  ;;  %4184 = vmatpush3.bf16.msra.mxu1 %v6212_v50 }
 0x4cf   : > { %2549 = vmatprep.subr.bf16.mxu0 %v6215_v24  ;;  %4185 = vmatprep.subr.bf16.mxu1 %v6762_v0 }
 0x4d2   : > { %2550 = vmatpush1.bf16.msra.mxu0 %v6219_v52  ;;  %4186 = vmatpush3.bf16.msra.mxu1 %v6222_v21 }
 0x4d3   : > { %2897 = vmatprep.subr.bf16.mxu0 %v6225_v38  ;;  %4191 = vmatprep.subr.bf16.mxu1 %v6762_v0 }
 0x575   : > { %v2207_v25 = vpop.f32.mrf.mxu0  ;;  %v6229_v48 = vpop.f32.mrf.mxu1 }
 0x576   : > { %v2255_v30 = vrot.slane %v2207_v25, 4  ;;  %v2256_v34 = vrot.slane %v2207_v25, 5  ;;  %v2257_v26 = vrot.slane %v2207_v25, 6  ;;  %v2258_v61 = vrot.slane %v2207_v25, 7 }
 0x577   : > { %v2259_v24 = vrot.slane %v2207_v25, 1  ;;  %v2260_v50 = vrot.slane %v2207_v25, 2  ;;  %v2261_v52 = vrot.slane %v2207_v25, 3  ;;  %v2274_v22 = vadd.f32 %v2207_v25, %v5604_v36  ;;  %v6232_v6 = vpop.f32.mrf.mxu0  ;;  %v4169_v21 = vpop.f32.mrf.mxu1 }
 0x578   : > { %v2270_v19 = vadd.f32 %v2255_v30, %v6817_v56  ;;  %v2271_v38 = vadd.f32 %v2256_v34, %v5587_v5  ;;  %v2272_v20 = vadd.f32 %v2257_v26, %v6818_v59  ;;  %v2273_v46 = vadd.f32 %v2258_v61, %v6772_v55 }
 0x579   : > { %v2275_v57 = vadd.f32 %v2259_v24, %v6773_v16  ;;  %v2276_v17 = vadd.f32 %v2260_v50, %v5614_v43  ;;  %v3913_v10 = vmul.f32 -1.442695, %v2274_v22  ;;  %v2211_v51 = vpop.f32.mrf.mxu0  ;;  %v2251_v13 = vpop.f32.mrf.mxu1  ;;  %v2277_v25 = vadd.f32 %v2261_v52, %v5619_v45 }
 0x57a   : > { %v3909_v36 = vmul.f32 -1.442695, %v2270_v19  ;;  %v3910_v39 = vmul.f32 -1.442695, %v2271_v38  ;;  %v3911_v21 = vmul.f32 -1.442695, %v2272_v20 }
 0x57b   : > { %v3912_v1 = vmul.f32 -1.442695, %v2273_v46  ;;  %4679 = vpow2.f32 %v3913_v10  ;;  %v2212_v30 = vpop.f32.mrf.mxu0  ;;  %v4170_v34 = vpop.f32.mrf.mxu1  ;;  %v3914_v26 = vmul.f32 -1.442695, %v2275_v57  ;;  %v3915_v61 = vmul.f32 -1.442695, %v2276_v17 }
 0x57c   : > { %4681 = vpow2.f32 %v3909_v36  ;;  %v3916_v24 = vmul.f32 -1.442695, %v2277_v25  ;;  %v2327_v50 = vrot.slane %v6232_v6, 4  ;;  %v2328_v13 = vrot.slane %v6232_v6, 5 }
 0x57d   : > { %4683 = vpow2.f32 %v3910_v39  ;;  %v2329_v51 = vrot.slane %v6232_v6, 6  ;;  %v2330_v19 = vrot.slane %v6232_v6, 7  ;;  %v2331_v10 = vrot.slane %v6232_v6, 1 }
 0x57e   : > { %4685 = vpow2.f32 %v3911_v21  ;;  %v2342_v36 = vadd.f32 %v2327_v50, %v6774_v12  ;;  %v2343_v39 = vadd.f32 %v2328_v13, %v5592_v7  ;;  %v2332_v30 = vrot.slane %v6232_v6, 2 }
 0x57f   : > { %4687 = vpow2.f32 %v3912_v1  ;;  %v2344_v17 = vadd.f32 %v2329_v51, %v5597_v14  ;;  %v2345_v57 = vadd.f32 %v2330_v19, %v5602_v29  ;;  %v2346_v1 = vadd.f32 %v6232_v6, %v5607_v40 }
 0x580   : > { %4689 = vpow2.f32 %v3914_v26  ;;  %v2347_v46 = vadd.f32 %v2331_v10, %v5612_v42  ;;  %v3917_v20 = vmul.f32 -1.442695, %v2342_v36  ;;  %v3918_v22 = vmul.f32 -1.442695, %v2343_v39 }
 0x581   : > { %4691 = vpow2.f32 %v3915_v61  ;;  %v3919_v52 = vmul.f32 -1.442695, %v2344_v17  ;;  %v3920_v38 = vmul.f32 -1.442695, %v2345_v57  ;;  %v3921_v25 = vmul.f32 -1.442695, %v2346_v1 }
 0x582   : > { %4693 = vpow2.f32 %v3916_v24  ;;  %v3922_v21 = vmul.f32 -1.442695, %v2347_v46  ;;  %v2333_v26 = vrot.slane %v6232_v6, 3  ;;  %v2348_v10 = vadd.f32 %v2332_v30, %v5617_v44 }
 0x583   : > { %4695 = vpow2.f32 %v3917_v20 }
 0x584   : > { %4697 = vpow2.f32 %v3918_v22  ;;  %v2349_v17 = vadd.f32 %v2333_v26, %v6775_v53 }
 0x585   : > { %4699 = vpow2.f32 %v3919_v52  ;;  %v3923_v52 = vmul.f32 -1.442695, %v2348_v10 }
 0x586   : > { %4701 = vpow2.f32 %v3920_v38 }
 0x587   : > { %4703 = vpow2.f32 %v3921_v25  ;;  %v3924_v25 = vmul.f32 -1.442695, %v2349_v17 }
 0x588   : > { %v4680_v34 = vpop.eup %4679  ;;  %4705 = vpow2.f32 %v3922_v21 }
 0x589   : > { %v4682_v61 = vpop.eup %4681  ;;  %v2306_v24 = vadd.f32 1.0, %v4680_v34 }
 0x58a   : > { %v4684_v50 = vpop.eup %4683  ;;  %v2302_v13 = vadd.f32 1.0, %v4682_v61  ;;  %v6260_v61 = vld [vmem:[%s6633_s4] ss:$0 sm:$0xff] }
 0x58b   : > { %v4686_v51 = vpop.eup %4685  ;;  %v2303_v19 = vadd.f32 1.0, %v4684_v50  ;;  %4707 = vrcp.f32 %v2306_v24  ;;  %v2398_v24 = vadd.f32 %v6260_v61, %v6229_v48 }
 0x58c   : > { %v4688_v36 = vpop.eup %4687  ;;  %v2304_v39 = vadd.f32 1.0, %v4686_v51  ;;  %4709 = vrcp.f32 %v2302_v13 }
 0x58d   : > { %v4690_v57 = vpop.eup %4689  ;;  %v2305_v1 = vadd.f32 1.0, %v4688_v36  ;;  %4711 = vrcp.f32 %v2303_v19 }
 0x58e   : > { %v4692_v6 = vpop.eup %4691  ;;  %v2307_v46 = vadd.f32 1.0, %v4690_v57  ;;  %4713 = vrcp.f32 %v2304_v39  ;;  %v2400_v57 = vrot.slane %v2398_v24, 4 }
 0x58f   : > { %v4694_v20 = vpop.eup %4693  ;;  %v2308_v22 = vadd.f32 1.0, %v4692_v6  ;;  %4715 = vrcp.f32 %v2305_v1 }
 0x590   : > { %v2309_v38 = vadd.f32 1.0, %v4694_v20  ;;  %4717 = vrcp.f32 %v2307_v46  ;;  %v4696_v21 = vpop.eup %4695  ;;  %v2401_v46 = vrot.slane %v2398_v24, 5 }
 0x591   : > { %4719 = vrcp.f32 %v2308_v22  ;;  %v4698_v30 = vpop.eup %4697  ;;  %v2374_v34 = vadd.f32 1.0, %v4696_v21 }
 0x592   : > { %4721 = vrcp.f32 %v2309_v38  ;;  %v4700_v26 = vpop.eup %4699  ;;  %v2375_v50 = vadd.f32 1.0, %v4698_v30 }
 0x593   : > { %4723 = vpow2.f32 %v3923_v52  ;;  %v4702_v13 = vpop.eup %4701  ;;  %v2376_v19 = vadd.f32 1.0, %v4700_v26  ;;  %v2402_v52 = vrot.slane %v2398_v24, 6 }
 0x594   : > { %4725 = vpow2.f32 %v3924_v25  ;;  %v4704_v51 = vpop.eup %4703  ;;  %v2377_v36 = vadd.f32 1.0, %v4702_v13  ;;  %v2403_v25 = vrot.slane %v2398_v24, 7 }
 0x595   : > { %v4706_v10 = vpop.eup %4705  ;;  %v2378_v39 = vadd.f32 1.0, %v4704_v51  ;;  %4727 = vrcp.f32 %v2374_v34  ;;  %v2404_v34 = vrot.slane %v2398_v24, 1 }
 0x596   : > { %v2379_v1 = vadd.f32 1.0, %v4706_v10  ;;  %4729 = vrcp.f32 %v2375_v50  ;;  %v2405_v10 = vrot.slane %v2398_v24, 2 }
 0x597   : > { %4731 = vrcp.f32 %v2378_v39 }
 0x598   : > { %v4708_v17 = vpop.eup %4707  ;;  %4733 = vrcp.f32 %v2376_v19  ;;  %v2406_v19 = vrot.slane %v2398_v24, 3 }
 0x599   : > { %v4710_v6 = vpop.eup %4709  ;;  %v2419_v20 = vmul.f32 %v4708_v17, %v2398_v24  ;;  %4735 = vrcp.f32 %v2377_v36 }
 0x59a   : > { %v4712_v22 = vpop.eup %4711  ;;  %v2415_v48 = vmul.f32 %v4710_v6, %v2400_v57  ;;  %4737 = vrcp.f32 %v2379_v1 }
 0x59b   : > { %v4714_v38 = vpop.eup %4713  ;;  %v2416_v21 = vmul.f32 %v4712_v22, %v2401_v46  ;;  %v2427_v30 = vadd.f32 %v2419_v20, %v6820_v58 }
 0x59c   : > { %v4716_v26 = vpop.eup %4715  ;;  %v2417_v13 = vmul.f32 %v4714_v38, %v2402_v52  ;;  %v2423_v51 = vadd.f32 %v2415_v48, %v6778_v8 }
 0x59d   : > { %v4718_v50 = vpop.eup %4717  ;;  %v2418_v17 = vmul.f32 %v4716_v26, %v2403_v25  ;;  %v2424_v39 = vadd.f32 %v2416_v21, %v6777_v63  ;;  %4739 = vtanh.f32 %v2427_v30 }
 0x59e   : > { %v4720_v57 = vpop.eup %4719  ;;  %v2420_v6 = vmul.f32 %v4718_v50, %v2404_v34  ;;  %v2425_v46 = vadd.f32 %v2417_v13, %v6819_v3  ;;  %4741 = vtanh.f32 %v2423_v51 }
 0x59f   : > { %v4722_v20 = vpop.eup %4721  ;;  %v2421_v36 = vmul.f32 %v4720_v57, %v2405_v10  ;;  %v2426_v22 = vadd.f32 %v2418_v17, %v6780_v11  ;;  %4743 = vtanh.f32 %v2424_v39  ;;  %v2466_v17 = vrot.slane %v6106_v37, 7 }
 0x5a0   : > { %v4724_v52 = vpop.eup %4723  ;;  %4745 = vtanh.f32 %v2425_v46  ;;  %v2422_v1 = vmul.f32 %v4722_v20, %v2406_v19  ;;  %v2428_v48 = vadd.f32 %v2420_v6, %v6821_v23  ;;  %v2467_v39 = vrot.slane %v6117_v49, 7 }
 0x5a1   : > { %v4726_v38 = vpop.eup %4725  ;;  %4747 = vtanh.f32 %v2426_v22  ;;  %v2380_v25 = vadd.f32 1.0, %v4724_v52  ;;  %v2429_v21 = vadd.f32 %v2421_v36, %v6822_v15  ;;  %v2463_v6 = vrot.slane %v6108_v28, 7 }
 0x5a2   : > { %v2381_v24 = vadd.f32 1.0, %v4726_v38  ;;  %v2430_v30 = vadd.f32 %v2422_v1, %v6823_v33  ;;  %4749 = vtanh.f32 %v2428_v48  ;;  %v4728_v26 = vpop.eup %4727  ;;  %v2464_v46 = vrot.slane %v6111_v2, 7 }
 0x5a3   : > { %4751 = vrcp.f32 %v2380_v25  ;;  %v4730_v34 = vpop.eup %4729  ;;  %v2465_v20 = vrot.slane %v6113_v18, 7  ;;  %v2439_v36 = vsub.f32 1.0, %v4728_v26  ;;  %v2468_v52 = vrot.slane %v6123_v27, 7 }
 0x5a4   : > { %4753 = vrcp.f32 %v2381_v24  ;;  %v4732_v13 = vpop.eup %4731  ;;  %v2440_v1 = vsub.f32 1.0, %v4730_v34  ;;  %v2469_v37 = vrot.slane %v6131_v9, 7  ;;  %v2479_v24 = vmul.f32 %v4728_v26, %v2463_v6 }
 0x5a5   : > { %4755 = vtanh.f32 %v2429_v21  ;;  %v4734_v51 = vpop.eup %4733  ;;  %v2443_v57 = vsub.f32 1.0, %v4732_v13  ;;  %v2483_v38 = vmul.f32 %v4732_v13, %v2467_v39  ;;  %v2480_v15 = vmul.f32 %v4730_v34, %v2464_v46 }
 0x5a6   : > { %4757 = vtanh.f32 %v2430_v30  ;;  %v4736_v50 = vpop.eup %4735  ;;  %v2441_v21 = vsub.f32 1.0, %v4734_v51  ;;  %v2481_v3 = vmul.f32 %v4734_v51, %v2465_v20  ;;  %v2470_v13 = vrot.slane %v6133_v60, 7 }
 0x5a7   : > { %v4738_v10 = vpop.eup %4737  ;;  %v2442_v33 = vsub.f32 1.0, %v4736_v50  ;;  %v2482_v9 = vmul.f32 %v4736_v50, %v2466_v17 }
 0x5a8   : > { %v2444_v58 = vsub.f32 1.0, %v4738_v10 }
 0x5aa   : > { %v4740_v19 = vpop.eup %4739 }
 0x5ab   : > { %v4742_v22 = vpop.eup %4741  ;;  %v2451_v48 = vmul.f32 %v4740_v19, %v2443_v57 }
 0x5ac   : > { %v4744_v25 = vpop.eup %4743  ;;  %v2447_v49 = vmul.f32 %v4742_v22, %v2439_v36  ;;  %v2484_v36 = vmul.f32 %v4738_v10, %v2468_v52 }
 0x5ad   : > { %v4746_v30 = vpop.eup %4745  ;;  %v2448_v28 = vmul.f32 %v4744_v25, %v2440_v1  ;;  %v6279_v2 = vadd.f32 %v2483_v38, %v2451_v48 }
 0x5ae   : > { %v4748_v18 = vpop.eup %4747  ;;  %v2449_v11 = vmul.f32 %v4746_v30, %v2441_v21  ;;  %v6281_v27 = vadd.f32 %v2479_v24, %v2447_v49 }
 0x5af   : > { %v4750_v57 = vpop.eup %4749  ;;  %v2450_v39 = vmul.f32 %v4748_v18, %v2442_v33  ;;  %v6284_v19 = vadd.f32 %v2480_v15, %v2448_v28  ;;  %v2499_v33 = vpack.c.bf16 %v6279_v2, %v6279_v2 }
 0x5b0   : > { %v4752_v26 = vpop.eup %4751  ;;  %v2452_v6 = vmul.f32 %v4750_v57, %v2444_v58  ;;  %v6286_v22 = vadd.f32 %v2481_v3, %v2449_v11  ;;  %v2495_v34 = vpack.c.bf16 %v6281_v27, %v6281_v27 }
 0x5b1   : > { %v4754_v46 = vpop.eup %4753  ;;  %v2445_v1 = vsub.f32 1.0, %v4752_v26  ;;  %v6290_v51 = vadd.f32 %v2482_v9, %v2450_v39  ;;  %v2496_v20 = vpack.c.bf16 %v6284_v19, %v6284_v19  ;;  %v2485_v50 = vmul.f32 %v4752_v26, %v2469_v37 }
 0x5b2   : > { %v4756_v15 = vpop.eup %4755  ;;  %v2446_v60 = vsub.f32 1.0, %v4754_v46  ;;  %v6296_v58 = vadd.f32 %v2484_v36, %v2452_v6  ;;  %v2497_v11 = vpack.c.bf16 %v6286_v22, %v6286_v22  ;;  %v2511_v52 = vunpack.c.l.b16 %v2495_v34 }
 0x5b3   : > { %v4758_v3 = vpop.eup %4757  ;;  %v2453_v10 = vmul.f32 %v4756_v15, %v2445_v1  ;;  %v2498_v17 = vpack.c.bf16 %v6290_v51, %v6290_v51  ;;  %v2512_v48 = vunpack.c.l.b16 %v2496_v20  ;;  %v2486_v25 = vmul.f32 %v4754_v46, %v2470_v13 }
 0x5b4   : > { %v2454_v38 = vmul.f32 %v4758_v3, %v2446_v60  ;;  %v2500_v21 = vpack.c.bf16 %v6296_v58, %v6296_v58  ;;  %v2513_v49 = vunpack.c.l.b16 %v2497_v11  ;;  %v2519_v30 = vrot.slane %v2511_v52, 4 }
 0x5b5   : > { %v6304_v24 = vadd.f32 %v2485_v50, %v2453_v10  ;;  %v2514_v37 = vunpack.c.l.b16 %v2498_v17  ;;  %v2520_v28 = vrot.slane %v2512_v48, 3  ;;  %v2515_v36 = vunpack.c.l.b16 %v2499_v33  ;;  %v6844_v33 = vld [vmem:[#allocation17_spill] sm:$0xff]  ;;  %v6845_v48 = vld [vmem:[#allocation18_spill] sm:$0xff] }
 0x5b6   : > { %v6306_v18 = vadd.f32 %v2486_v25, %v2454_v38  ;;  %v2516_v57 = vunpack.c.l.b16 %v2500_v21  ;;  %v2522_v39 = vrot.slane %v2513_v49, 2  ;;  %v6850_v38 = vld [vmem:[#allocation23_spill] sm:$0xff]  ;;  %v6851_v25 = vld [vmem:[#allocation28_spill] sm:$0xff]  ;;  %v6852_v21 = vld [vmem:[#allocation29_spill] sm:$0xff] }
 0x5b7   : > { %v2501_v9 = vpack.c.bf16 %v6304_v24, %v6304_v24  ;;  %v2521_v26 = vsel %vm1065_vm2, %v2520_v28, %v2519_v30  ;;  %v2524_v6 = vrot.slane %v2514_v37, 1  ;;  %v6853_v49 = vld [vmem:[#allocation33_spill] sm:$0xff]  ;;  %v6854_v37 = vld [vmem:[#allocation31_spill] sm:$0xff]  ;;  %v6855_v30 = vld [vmem:[#allocation38_spill] sm:$0xff] }
 0x5b8   : > { %v2502_v13 = vpack.c.bf16 %v6306_v18, %v6306_v18  ;;  %v2523_v34 = vsel %vm1068_vm3, %v2522_v39, %v2521_v26  ;;  %v2527_v20 = vrot.slane %v2516_v57, 7  ;;  %v6856_v28 = vld [vmem:[#allocation39_spill] sm:$0xff]  ;;  %v6857_v57 = vld [vmem:[#allocation22_spill] sm:$0xff] }
 0x5b9   : > { %v2517_v46 = vunpack.c.l.b16 %v2501_v9  ;;  %v2525_v1 = vsel %vm1071_vm4, %v2524_v6, %v2523_v34 }
 0x5ba   : > { %v2518_v15 = vunpack.c.l.b16 %v2502_v13  ;;  %v2526_v60 = vsel %vm1074_vm5, %v2515_v36, %v2525_v1 }
 0x5bb   : > { %v2528_v50 = vsel %vm1077_vm6, %v2527_v20, %v2526_v60  ;;  %v2529_v11 = vrot.slane %v2517_v46, 6 }
 0x5bc   : > { %v2531_v3 = vrot.slane %v2518_v15, 5 }
 0x5bd   : > { %v2530_v10 = vsel %vm1080_vm7, %v2529_v11, %v2528_v50 }
 0x5be   : > { %v2532_v17 = vsel %vm1083_vm8, %v2531_v3, %v2530_v10 }
 0x5bf   : > { %v2533_v52 = vpack.c.b16 %v2532_v17, %v2532_v17  ;;  %v6858_v17 = vld [vmem:[#allocation26_spill] sm:$0xff] }
 0x5c1   : > { %2568 = vmatmul.mubr.bf16.vlgmr.msra.gmra.mxu0 %v2533_v52  ;;  %4188 = vmatmul.mubr.bf16.vlgmr.msra.gmra.mxu1 %v2533_v52 }
 0x5c2   : > { %2898 = vmatpush1.bf16.msra.mxu0 %v6146_v31  ;;  %4192 = vmatpush3.bf16.msra.mxu1 %v6149_v32  ;;  %v6841_v31 = vld [vmem:[#allocation15_spill] sm:$0xff]  ;;  %v6842_v32 = vld [vmem:[#allocation16_spill] sm:$0xff] }
 0x5c3   : > { %2899 = vmatprep.subr.bf16.mxu0 %v6152_v4  ;;  %4193 = vmatprep.subr.bf16.mxu1 %v6762_v0  ;;  %v6843_v4 = vld [vmem:[#allocation19_spill] sm:$0xff] }
 0x5c4   : > { %2929 = vmatprep.mubr.bf16.mxu0 %v6763_v41  ;;  %4207 = vmatprep.mubr.msk.bf16.mxu1 %vm5237_vm1, %v6762_v0 }
 0x5c6   : > { %2900 = vmatpush1.bf16.msra.mxu0 %v6159_v54  ;;  %4194 = vmatpush3.bf16.msra.mxu1 %v6162_v47  ;;  %v6846_v54 = vld [vmem:[#allocation20_spill] sm:$0xff]  ;;  %v6847_v47 = vld [vmem:[#allocation14_spill] sm:$0xff] }
 0x5c7   : > { %2901 = vmatprep.subr.bf16.mxu0 %v6165_v62  ;;  %4195 = vmatprep.subr.bf16.mxu1 %v6762_v0  ;;  %v6848_v62 = vld [vmem:[#allocation25_spill] sm:$0xff] }
 0x5ca   : > { %2902 = vmatpush1.bf16.msra.mxu0 %v6169_v35  ;;  %4196 = vmatpush3.bf16.msra.mxu1 %v6841_v31  ;;  %v6849_v35 = vld [vmem:[#allocation27_spill] sm:$0xff] }
 0x5cb   : > { %2903 = vmatprep.subr.bf16.mxu0 %v6842_v32  ;;  %4197 = vmatprep.subr.bf16.mxu1 %v6762_v0 }
 0x5ce   : > { %2904 = vmatpush1.bf16.msra.mxu0 %v6843_v4  ;;  %4198 = vmatpush3.bf16.msra.mxu1 %v6844_v33 }
 0x5cf   : > { %2905 = vmatprep.subr.bf16.mxu0 %v6845_v48  ;;  %4199 = vmatprep.subr.bf16.mxu1 %v6762_v0 }
 0x5d2   : > { %2906 = vmatpush1.bf16.msra.mxu0 %v6846_v54  ;;  %4200 = vmatpush3.bf16.msra.mxu1 %v6847_v47 }
 0x5d3   : > { %2907 = vmatprep.subr.bf16.mxu0 %v6848_v62  ;;  %4201 = vmatprep.subr.bf16.mxu1 %v6762_v0 }
 0x5d6   : > { %2908 = vmatpush1.bf16.msra.mxu0 %v6849_v35  ;;  %4202 = vmatpush3.bf16.msra.mxu1 %v6850_v38 }
 0x5d7   : > { %2909 = vmatprep.subr.bf16.mxu0 %v6851_v25  ;;  %4203 = vmatprep.subr.bf16.mxu1 %v6762_v0 }
 0x5da   : > { %2910 = vmatpush1.bf16.msra.mxu0 %v6852_v21  ;;  %4204 = vmatpush3.bf16.msra.mxu1 %v6853_v49 }
 0x5db   : > { %2911 = vmatprep.subr.bf16.mxu0 %v6854_v37  ;;  %4205 = vmatprep.subr.bf16.mxu1 %v6762_v0 }
 0x5de   : > { %2912 = vmatpush1.bf16.msra.mxu0 %v6855_v30  ;;  %4206 = vmatpush3.bf16.msra.mxu1 %v6856_v28 }
 0x5df   : > { %3259 = vmatprep.subr.bf16.mxu0 %v6857_v57  ;;  %4211 = vmatprep.subr.bf16.mxu1 %v6762_v0 }
 0x681   : > { %v2569_v39 = vpop.f32.mrf.mxu0  ;;  %v6354_v9 = vpop.f32.mrf.mxu1 }
 0x682   : > { %v2617_v26 = vrot.slane %v2569_v39, 3  ;;  %v2618_v6 = vrot.slane %v2569_v39, 4  ;;  %v2619_v13 = vrot.slane %v2569_v39, 5  ;;  %v2620_v36 = vrot.slane %v2569_v39, 6 }
 0x683   : > { %v2621_v34 = vrot.slane %v2569_v39, 7  ;;  %v2622_v46 = vrot.slane %v2569_v39, 1  ;;  %v2623_v1 = vrot.slane %v2569_v39, 2  ;;  %v2637_v20 = vadd.f32 %v2569_v39, %v6773_v16  ;;  %v6357_v15 = vpop.f32.mrf.mxu0  ;;  %v4189_v60 = vpop.f32.mrf.mxu1 }
 0x684   : > { %v2632_v50 = vadd.f32 %v2617_v26, %v6817_v56  ;;  %v2633_v11 = vadd.f32 %v2618_v6, %v5587_v5  ;;  %v2634_v3 = vadd.f32 %v2619_v13, %v6818_v59  ;;  %v2635_v10 = vadd.f32 %v2620_v36, %v6772_v55 }
 0x685   : > { %v2636_v52 = vadd.f32 %v2621_v34, %v6858_v17  ;;  %v2638_v31 = vadd.f32 %v2622_v46, %v5614_v43  ;;  %v3930_v32 = vmul.f32 -1.442695, %v2637_v20  ;;  %v2573_v4 = vpop.f32.mrf.mxu0  ;;  %v2613_v33 = vpop.f32.mrf.mxu1  ;;  %v2639_v48 = vadd.f32 %v2623_v1, %v5619_v45 }
 0x686   : > { %v3925_v54 = vmul.f32 -1.442695, %v2632_v50  ;;  %v3926_v47 = vmul.f32 -1.442695, %v2633_v11  ;;  %v3927_v62 = vmul.f32 -1.442695, %v2634_v3  ;;  %v2709_v1 = vadd.f32 %v6357_v15, %v5612_v42 }
 0x687   : > { %v3928_v35 = vmul.f32 -1.442695, %v2635_v10  ;;  %4759 = vpow2.f32 %v3930_v32  ;;  %v2574_v38 = vpop.f32.mrf.mxu0  ;;  %v4190_v25 = vpop.f32.mrf.mxu1  ;;  %v3929_v21 = vmul.f32 -1.442695, %v2636_v52  ;;  %v3931_v49 = vmul.f32 -1.442695, %v2638_v31 }
 0x688   : > { %4761 = vpow2.f32 %v3925_v54  ;;  %v3932_v37 = vmul.f32 -1.442695, %v2639_v48  ;;  %v2689_v30 = vrot.slane %v6357_v15, 3  ;;  %v2690_v28 = vrot.slane %v6357_v15, 4 }
 0x689   : > { %4763 = vpow2.f32 %v3926_v47  ;;  %v2691_v57 = vrot.slane %v6357_v15, 5  ;;  %v2692_v39 = vrot.slane %v6357_v15, 6  ;;  %v2693_v26 = vrot.slane %v6357_v15, 7 }
 0x68a   : > { %4765 = vpow2.f32 %v3927_v62  ;;  %v2704_v6 = vadd.f32 %v2689_v30, %v6774_v12  ;;  %v2705_v13 = vadd.f32 %v2690_v28, %v5592_v7  ;;  %v3938_v10 = vmul.f32 -1.442695, %v2709_v1 }
 0x68b   : > { %4767 = vpow2.f32 %v3928_v35  ;;  %v2706_v36 = vadd.f32 %v2691_v57, %v5597_v14  ;;  %v2707_v34 = vadd.f32 %v2692_v39, %v5602_v29  ;;  %v2708_v46 = vadd.f32 %v2693_v26, %v5607_v40 }
 0x68c   : > { %4769 = vpow2.f32 %v3929_v21  ;;  %v3933_v20 = vmul.f32 -1.442695, %v2704_v6  ;;  %v3934_v60 = vmul.f32 -1.442695, %v2705_v13  ;;  %v2694_v52 = vrot.slane %v6357_v15, 1 }
 0x68d   : > { %4771 = vpow2.f32 %v3931_v49  ;;  %v3935_v50 = vmul.f32 -1.442695, %v2706_v36  ;;  %v3936_v11 = vmul.f32 -1.442695, %v2707_v34  ;;  %v3937_v3 = vmul.f32 -1.442695, %v2708_v46 }
 0x68e   : > { %4773 = vpow2.f32 %v3932_v37  ;;  %v2695_v32 = vrot.slane %v6357_v15, 2  ;;  %v2710_v35 = vadd.f32 %v2694_v52, %v5617_v44  ;;  %v2760_v1 = vadd.f32 %v6260_v61, %v6354_v9 }
 0x68f   : > { %4775 = vpow2.f32 %v3933_v20 }
 0x690   : > { %4777 = vpow2.f32 %v3934_v60  ;;  %v2711_v21 = vadd.f32 %v2695_v32, %v6775_v53  ;;  %v3939_v39 = vmul.f32 -1.442695, %v2710_v35  ;;  %v2765_v35 = vrot.slane %v2760_v1, 6 }
 0x691   : > { %4779 = vpow2.f32 %v3935_v50 }
 0x692   : > { %4781 = vpow2.f32 %v3936_v11  ;;  %v3940_v6 = vmul.f32 -1.442695, %v2711_v21 }
 0x693   : > { %4783 = vpow2.f32 %v3937_v3 }
 0x694   : > { %v4760_v31 = vpop.eup %4759  ;;  %4785 = vpow2.f32 %v3938_v10 }
 0x695   : > { %v4762_v4 = vpop.eup %4761  ;;  %v2669_v33 = vadd.f32 1.0, %v4760_v31  ;;  %v2762_v31 = vrot.slane %v2760_v1, 3 }
 0x696   : > { %v4764_v48 = vpop.eup %4763  ;;  %v2664_v54 = vadd.f32 1.0, %v4762_v4 }
 0x697   : > { %v4766_v47 = vpop.eup %4765  ;;  %v2665_v62 = vadd.f32 1.0, %v4764_v48  ;;  %4787 = vrcp.f32 %v2669_v33  ;;  %v2763_v48 = vrot.slane %v2760_v1, 4 }
 0x698   : > { %v4768_v38 = vpop.eup %4767  ;;  %v2666_v25 = vadd.f32 1.0, %v4766_v47  ;;  %4789 = vrcp.f32 %v2664_v54 }
 0x699   : > { %v4770_v49 = vpop.eup %4769  ;;  %v2667_v37 = vadd.f32 1.0, %v4768_v38  ;;  %4791 = vrcp.f32 %v2665_v62  ;;  %v2764_v62 = vrot.slane %v2760_v1, 5 }
 0x69a   : > { %v4772_v15 = vpop.eup %4771  ;;  %v2668_v30 = vadd.f32 1.0, %v4770_v49  ;;  %4793 = vrcp.f32 %v2666_v25  ;;  %v2766_v49 = vrot.slane %v2760_v1, 7 }
 0x69b   : > { %v4774_v28 = vpop.eup %4773  ;;  %v2670_v57 = vadd.f32 1.0, %v4772_v15  ;;  %4795 = vrcp.f32 %v2667_v37 }
 0x69c   : > { %v2671_v26 = vadd.f32 1.0, %v4774_v28  ;;  %4797 = vrcp.f32 %v2668_v30  ;;  %v4776_v13 = vpop.eup %4775  ;;  %v2767_v28 = vrot.slane %v2760_v1, 1 }
 0x69d   : > { %4799 = vrcp.f32 %v2670_v57  ;;  %v4778_v36 = vpop.eup %4777  ;;  %v2736_v34 = vadd.f32 1.0, %v4776_v13 }
 0x69e   : > { %4801 = vrcp.f32 %v2671_v26  ;;  %v4780_v46 = vpop.eup %4779  ;;  %v2737_v20 = vadd.f32 1.0, %v4778_v36  ;;  %v6859_v36 = vld [vmem:[#allocation30_spill] sm:$0xff] }
 0x69f   : > { %4803 = vpow2.f32 %v3939_v39  ;;  %v4782_v60 = vpop.eup %4781  ;;  %v2738_v50 = vadd.f32 1.0, %v4780_v46 }
 0x6a0   : > { %4805 = vpow2.f32 %v3940_v6  ;;  %v4784_v11 = vpop.eup %4783  ;;  %v2739_v10 = vadd.f32 1.0, %v4782_v60  ;;  %v2768_v6 = vrot.slane %v2760_v1, 2  ;;  %v6860_v60 = vld [vmem:[#allocation32_spill] sm:$0xff] }
 0x6a1   : > { %v4786_v3 = vpop.eup %4785  ;;  %4807 = vrcp.f32 %v2736_v34  ;;  %v2740_v32 = vadd.f32 1.0, %v4784_v11 }
 0x6a2   : > { %v2741_v4 = vadd.f32 1.0, %v4786_v3  ;;  %4809 = vrcp.f32 %v2737_v20  ;;  %v6861_v3 = vld [vmem:[#allocation34_spill] sm:$0xff] }
 0x6a3   : > { %4811 = vrcp.f32 %v2738_v50 }
 0x6a4   : > { %v4788_v52 = vpop.eup %4787  ;;  %4813 = vrcp.f32 %v2741_v4  ;;  %v6862_v4 = vld [vmem:[#allocation36_spill] sm:$0xff] }
 0x6a5   : > { %v4790_v33 = vpop.eup %4789  ;;  %v2782_v54 = vmul.f32 %v4788_v52, %v2760_v1  ;;  %4815 = vrcp.f32 %v2739_v10 }
 0x6a6   : > { %v4792_v47 = vpop.eup %4791  ;;  %v2777_v61 = vmul.f32 %v4790_v33, %v2762_v31  ;;  %4817 = vrcp.f32 %v2740_v32 }
 0x6a7   : > { %v4794_v9 = vpop.eup %4793  ;;  %v2778_v38 = vmul.f32 %v4792_v47, %v2763_v48  ;;  %v2790_v25 = vadd.f32 %v2782_v54, %v6821_v23  ;;  %v6863_v48 = vld [vmem:[#allocation37_spill] sm:$0xff] }
 0x6a8   : > { %v4796_v21 = vpop.eup %4795  ;;  %v2779_v37 = vmul.f32 %v4794_v9, %v2764_v62  ;;  %v2785_v15 = vadd.f32 %v2777_v61, %v6778_v8 }
 0x6a9   : > { %v4798_v30 = vpop.eup %4797  ;;  %v2780_v57 = vmul.f32 %v4796_v21, %v2765_v35  ;;  %v2786_v39 = vadd.f32 %v2778_v38, %v6777_v63  ;;  %4819 = vtanh.f32 %v2790_v25  ;;  %v2829_v25 = vrot.slane %v6279_v2, 7 }
 0x6aa   : > { %v4800_v26 = vpop.eup %4799  ;;  %v2781_v13 = vmul.f32 %v4798_v30, %v2766_v49  ;;  %v2787_v34 = vadd.f32 %v2779_v37, %v6859_v36  ;;  %4821 = vtanh.f32 %v2785_v15  ;;  %v2830_v21 = vrot.slane %v6296_v58, 7 }
 0x6ab   : > { %v4802_v46 = vpop.eup %4801  ;;  %v2783_v20 = vmul.f32 %v4800_v26, %v2767_v28  ;;  %v2788_v50 = vadd.f32 %v2780_v57, %v6860_v60  ;;  %4823 = vtanh.f32 %v2786_v39  ;;  %v2825_v15 = vrot.slane %v6281_v27, 7 }
 0x6ac   : > { %v4804_v11 = vpop.eup %4803  ;;  %v2789_v10 = vadd.f32 %v2781_v13, %v6861_v3  ;;  %4825 = vtanh.f32 %v2787_v34  ;;  %v2784_v52 = vmul.f32 %v4802_v46, %v2768_v6  ;;  %v2826_v30 = vrot.slane %v6284_v19, 7 }
 0x6ad   : > { %v4806_v31 = vpop.eup %4805  ;;  %4827 = vtanh.f32 %v2788_v50  ;;  %v2742_v32 = vadd.f32 1.0, %v4804_v11  ;;  %v2791_v33 = vadd.f32 %v2783_v20, %v6862_v4  ;;  %v2827_v28 = vrot.slane %v6286_v22, 7 }
 0x6ae   : > { %4829 = vtanh.f32 %v2789_v10  ;;  %v2743_v1 = vadd.f32 1.0, %v4806_v31  ;;  %v2792_v54 = vadd.f32 %v2784_v52, %v6863_v48  ;;  %v4808_v47 = vpop.eup %4807  ;;  %v2828_v26 = vrot.slane %v6290_v51, 7 }
 0x6af   : > { %4831 = vrcp.f32 %v2742_v32  ;;  %v4810_v62 = vpop.eup %4809  ;;  %v2801_v57 = vsub.f32 1.0, %v4808_v47  ;;  %v2831_v2 = vrot.slane %v6304_v24, 7  ;;  %v2841_v50 = vmul.f32 %v4808_v47, %v2825_v15 }
 0x6b0   : > { %4833 = vrcp.f32 %v2743_v1  ;;  %v4812_v61 = vpop.eup %4811  ;;  %v2802_v6 = vsub.f32 1.0, %v4810_v62  ;;  %v2842_v52 = vmul.f32 %v4810_v62, %v2826_v30 }
 0x6b1   : > { %4835 = vtanh.f32 %v2791_v33  ;;  %v4814_v9 = vpop.eup %4813  ;;  %v2803_v20 = vsub.f32 1.0, %v4812_v61  ;;  %v2843_v33 = vmul.f32 %v4812_v61, %v2827_v28 }
 0x6b2   : > { %4837 = vtanh.f32 %v2792_v54  ;;  %v4816_v35 = vpop.eup %4815  ;;  %v2806_v49 = vsub.f32 1.0, %v4814_v9  ;;  %v2846_v34 = vmul.f32 %v4814_v9, %v2830_v21  ;;  %v2832_v54 = vrot.slane %v6306_v18, 7 }
 0x6b3   : > { %v4818_v38 = vpop.eup %4817  ;;  %v2804_v10 = vsub.f32 1.0, %v4816_v35  ;;  %v2844_v24 = vmul.f32 %v4816_v35, %v2828_v26 }
 0x6b4   : > { %v2805_v31 = vsub.f32 1.0, %v4818_v38 }
 0x6b6   : > { %v4820_v37 = vpop.eup %4819 }
 0x6b7   : > { %v4822_v39 = vpop.eup %4821  ;;  %v2814_v13 = vmul.f32 %v4820_v37, %v2806_v49  ;;  %v2845_v37 = vmul.f32 %v4818_v38, %v2829_v25 }
 0x6b8   : > { %v4824_v46 = vpop.eup %4823  ;;  %v2809_v58 = vmul.f32 %v4822_v39, %v2801_v57 }
 0x6b9   : > { %v4826_v11 = vpop.eup %4825  ;;  %v2810_v27 = vmul.f32 %v4824_v46, %v2802_v6  ;;  %v6399_v19 = vadd.f32 %v2846_v34, %v2814_v13 }
 0x6ba   : > { %v4828_v22 = vpop.eup %4827  ;;  %v2811_v32 = vmul.f32 %v4826_v11, %v2803_v20  ;;  %v6401_v51 = vadd.f32 %v2841_v50, %v2809_v58 }
 0x6bb   : > { %v4830_v1 = vpop.eup %4829  ;;  %v2812_v9 = vmul.f32 %v4828_v22, %v2804_v10  ;;  %v6404_v21 = vadd.f32 %v2842_v52, %v2810_v27  ;;  %v2862_v18 = vpack.c.bf16 %v6399_v19, %v6399_v19 }
 0x6bc   : > { %v4832_v47 = vpop.eup %4831  ;;  %v2813_v49 = vmul.f32 %v4830_v1, %v2805_v31  ;;  %v6406_v15 = vadd.f32 %v2843_v33, %v2811_v32  ;;  %v2857_v62 = vpack.c.bf16 %v6401_v51, %v6401_v51 }
 0x6bd   : > { %v4834_v30 = vpop.eup %4833  ;;  %v2807_v57 = vsub.f32 1.0, %v4832_v47  ;;  %v6410_v61 = vadd.f32 %v2844_v24, %v2812_v9  ;;  %v2858_v28 = vpack.c.bf16 %v6404_v21, %v6404_v21  ;;  %v2847_v26 = vmul.f32 %v4832_v47, %v2831_v2 }
 0x6be   : > { %v4836_v35 = vpop.eup %4835  ;;  %v2808_v39 = vsub.f32 1.0, %v4834_v30  ;;  %v6416_v6 = vadd.f32 %v2845_v37, %v2813_v49  ;;  %v2859_v38 = vpack.c.bf16 %v6406_v15, %v6406_v15  ;;  %v2873_v46 = vunpack.c.l.b16 %v2857_v62 }
 0x6bf   : > { %v4838_v25 = vpop.eup %4837  ;;  %v2815_v13 = vmul.f32 %v4836_v35, %v2807_v57  ;;  %v2860_v34 = vpack.c.bf16 %v6410_v61, %v6410_v61  ;;  %v2874_v20 = vunpack.c.l.b16 %v2858_v28  ;;  %v2848_v50 = vmul.f32 %v4834_v30, %v2832_v54 }
 0x6c0   : > { %v2816_v58 = vmul.f32 %v4838_v25, %v2808_v39  ;;  %v2861_v11 = vpack.c.bf16 %v6416_v6, %v6416_v6  ;;  %v2875_v10 = vunpack.c.l.b16 %v2859_v38  ;;  %v2881_v52 = vrot.slane %v2873_v46, 5  ;;  %v5051_v46 = vld [vmem:[#allocation9 + $0x94] ss:$12 sps:$4 sm:$0xff]  }
 0x6c1   : > { %v6424_v27 = vadd.f32 %v2847_v26, %v2815_v13  ;;  %v2876_v2 = vunpack.c.l.b16 %v2860_v34  ;;  %v2882_v22 = vrot.slane %v2874_v20, 4  ;;  %v2878_v37 = vunpack.c.l.b16 %v2862_v18  ;;  %v5049_v34 = vld [vmem:[#allocation9 + $0xa8] ss:$12 sps:$4 sm:$0xff]   ;;  %v5050_v18 = vld [vmem:[#allocation9 + $0xb0] ss:$12 sps:$4 sm:$0xff]  }
 0x6c2   : > { %v6426_v31 = vadd.f32 %v2848_v50, %v2816_v58  ;;  %v2877_v32 = vunpack.c.l.b16 %v2861_v11  ;;  %v2884_v33 = vrot.slane %v2875_v10, 3  ;;  %v5052_v20 = vld [vmem:[#allocation9 + $0x90] ss:$12 sps:$4 sm:$0xff]   ;;  %v5053_v58 = vld [vmem:[#allocation9 + $0x98] ss:$12 sps:$4 sm:$0xff]  }
 0x6c3   : > { %v2863_v1 = vpack.c.bf16 %v6424_v27, %v6424_v27  ;;  %v2883_v9 = vsel %vm1065_vm2, %v2882_v22, %v2881_v52  ;;  %v2886_v24 = vrot.slane %v2876_v2, 2  ;;  %v5054_v50 = vld [vmem:[#allocation9 + $0x7c] ss:$12 sps:$4 sm:$0xff]   ;;  %v5055_v11 = vld [vmem:[#allocation9 + $0x78] ss:$12 sps:$4 sm:$0xff]  }
 0x6c4   : > { %v2864_v54 = vpack.c.bf16 %v6426_v31, %v6426_v31  ;;  %v2885_v47 = vsel %vm1068_vm3, %v2884_v33, %v2883_v9  ;;  %v2888_v49 = vrot.slane %v2877_v32, 1  ;;  %v5056_v10 = vld [vmem:[#allocation9 + $0x80] ss:$12 sps:$4 sm:$0xff]   ;;  %v5057_v2 = vld [vmem:[#allocation9 + $0x64] ss:$12 sps:$4 sm:$0xff]  }
 0x6c5   : > { %v2879_v62 = vunpack.c.l.b16 %v2863_v1  ;;  %v2887_v30 = vsel %vm1071_vm4, %v2886_v24, %v2885_v47  ;;  %v5059_v52 = vld [vmem:[#allocation9 + $0x68] ss:$12 sps:$4 sm:$0xff]   ;;  %v5060_v22 = vld [vmem:[#allocation9 + $0x4c] ss:$12 sps:$4 sm:$0xff]   ;;  %v5062_v33 = vld [vmem:[#allocation9 + $0x50] ss:$12 sps:$4 sm:$0xff]  }
 0x6c6   : > { %v2880_v57 = vunpack.c.l.b16 %v2864_v54  ;;  %v2889_v28 = vsel %vm1074_vm5, %v2888_v49, %v2887_v30  ;;  %v5061_v32 = vld [vmem:[#allocation9 + $0x48] ss:$12 sps:$4 sm:$0xff]   ;;  %v5064_v9 = vld [vmem:[#allocation9 + $0x30] ss:$12 sps:$4 sm:$0xff]   ;;  %v5065_v24 = vld [vmem:[#allocation9 + $0x38] ss:$12 sps:$4 sm:$0xff]  }
 0x6c7   : > { %v2890_v35 = vsel %vm1077_vm6, %v2878_v37, %v2889_v28  ;;  %v2891_v39 = vrot.slane %v2879_v62, 7  ;;  %v5063_v1 = vld [vmem:[#allocation9 + $0x34] ss:$12 sps:$4 sm:$0xff]   ;;  %v5066_v54 = vld [vmem:[#allocation9 + $0x1c] ss:$12 sps:$4 sm:$0xff]  }
 0x6c8   : > { %v2893_v26 = vrot.slane %v2880_v57, 6  ;;  %v5067_v47 = vld [vmem:[#allocation9 + $0x18] ss:$12 sps:$4 sm:$0xff]   ;;  %v5068_v49 = vld [vmem:[#allocation9 + $0x20] ss:$12 sps:$4 sm:$0xff]  }
 0x6c9   : > { %v2892_v38 = vsel %vm1080_vm7, %v2891_v39, %v2890_v35  ;;  %v5069_v37 = vld [vmem:[#allocation9 + $0x4] ss:$12 sps:$4 sm:$0xff]   ;;  %v5070_v62 = vld [vmem:[#allocation9] ss:$12 sps:$4 sm:$0xff]   ;;  %v5071_v30 = vld [vmem:[#allocation9 + $0x8] ss:$12 sps:$4 sm:$0xff]  }
 0x6ca   : > { %v2894_v25 = vsel %vm1083_vm8, %v2893_v26, %v2892_v38 }
 0x6cb   : > { %v2895_v13 = vpack.c.b16 %v2894_v25, %v2894_v25 }
 0x6cd   : > { %2930 = vmatmul.mubr.bf16.vlgmr.msra.gmra.mxu0 %v2895_v13  ;;  %4208 = vmatmul.mubr.bf16.vlgmr.msra.gmra.mxu1 %v2895_v13 }
 0x6ce   : > { %3260 = vmatpush1.bf16.msra.mxu0 %v5049_v34  ;;  %4212 = vmatpush3.bf16.msra.mxu1 %v5050_v18 }
 0x6cf   : > { %3261 = vmatprep.subr.bf16.mxu0 %v5051_v46  ;;  %4213 = vmatprep.subr.bf16.mxu1 %v6762_v0 }
 0x6d0   : > { %3291 = vmatprep.mubr.bf16.mxu0 %v6763_v41  ;;  %4227 = vmatprep.mubr.msk.bf16.mxu1 %vm5237_vm1, %v6762_v0  ;;  %v5058_v41 = vld [vmem:[#allocation9 + $0x60] ss:$12 sps:$4 sm:$0xff]  }
 0x6d2   : > { %3262 = vmatpush1.bf16.msra.mxu0 %v5052_v20  ;;  %4214 = vmatpush3.bf16.msra.mxu1 %v5053_v58 }
 0x6d3   : > { %3263 = vmatprep.subr.bf16.mxu0 %v5054_v50  ;;  %4215 = vmatprep.subr.bf16.mxu1 %v6762_v0 }
 0x6d6   : > { %3264 = vmatpush1.bf16.msra.mxu0 %v5055_v11  ;;  %4216 = vmatpush3.bf16.msra.mxu1 %v5056_v10 }
 0x6d7   : > { %3265 = vmatprep.subr.bf16.mxu0 %v5057_v2  ;;  %4217 = vmatprep.subr.bf16.mxu1 %v6762_v0 }
 0x6da   : > { %3266 = vmatpush1.bf16.msra.mxu0 %v5058_v41  ;;  %4218 = vmatpush3.bf16.msra.mxu1 %v5059_v52 }
 0x6db   : > { %3267 = vmatprep.subr.bf16.mxu0 %v5060_v22  ;;  %4219 = vmatprep.subr.bf16.mxu1 %v6762_v0 }
 0x6de   : > { %3268 = vmatpush1.bf16.msra.mxu0 %v5061_v32  ;;  %4220 = vmatpush3.bf16.msra.mxu1 %v5062_v33 }
 0x6df   : > { %3269 = vmatprep.subr.bf16.mxu0 %v5063_v1  ;;  %4221 = vmatprep.subr.bf16.mxu1 %v6762_v0 }
 0x6e2   : > { %3270 = vmatpush1.bf16.msra.mxu0 %v5064_v9  ;;  %4222 = vmatpush3.bf16.msra.mxu1 %v5065_v24 }
 0x6e3   : > { %3271 = vmatprep.subr.bf16.mxu0 %v5066_v54  ;;  %4223 = vmatprep.subr.bf16.mxu1 %v6762_v0 }
 0x6e6   : > { %3272 = vmatpush1.bf16.msra.mxu0 %v5067_v47  ;;  %4224 = vmatpush3.bf16.msra.mxu1 %v5068_v49 }
 0x6e7   : > { %3273 = vmatprep.subr.bf16.mxu0 %v5069_v37  ;;  %4225 = vmatprep.subr.bf16.mxu1 %v6762_v0 }
 0x6ea   : > { %3274 = vmatpush1.bf16.msra.mxu0 %v5070_v62  ;;  %4226 = vmatpush3.bf16.msra.mxu1 %v5071_v30 }
 0x78d   : > { %v2931_v57 = vpop.f32.mrf.mxu0  ;;  %v6449_v28 = vpop.f32.mrf.mxu1 }
 0x78e   : > { %v2979_v35 = vrot.slane %v2931_v57, 2  ;;  %v2980_v39 = vrot.slane %v2931_v57, 3  ;;  %v2981_v26 = vrot.slane %v2931_v57, 4  ;;  %v2982_v38 = vrot.slane %v2931_v57, 5 }
 0x78f   : > { %v2983_v25 = vrot.slane %v2931_v57, 6  ;;  %v2984_v13 = vrot.slane %v2931_v57, 7  ;;  %v2985_v34 = vrot.slane %v2931_v57, 1  ;;  %v3000_v18 = vadd.f32 %v2931_v57, %v5614_v43  ;;  %v6452_v46 = vpop.f32.mrf.mxu0  ;;  %v4209_v20 = vpop.f32.mrf.mxu1 }
 0x790   : > { %v2994_v0 = vadd.f32 %v2979_v35, %v6817_v56  ;;  %v2995_v58 = vadd.f32 %v2980_v39, %v5587_v5  ;;  %v2996_v50 = vadd.f32 %v2981_v26, %v6818_v59  ;;  %v2997_v11 = vadd.f32 %v2982_v38, %v6772_v55 }
 0x791   : > { %v2998_v10 = vadd.f32 %v2983_v25, %v6858_v17  ;;  %v2999_v2 = vadd.f32 %v2984_v13, %v6773_v16  ;;  %v3947_v41 = vmul.f32 -1.442695, %v3000_v18  ;;  %v2935_v52 = vpop.f32.mrf.mxu0  ;;  %v2975_v22 = vpop.f32.mrf.mxu1  ;;  %v3001_v32 = vadd.f32 %v2985_v34, %v5619_v45 }
 0x792   : > { %v3941_v33 = vmul.f32 -1.442695, %v2994_v0  ;;  %v3942_v1 = vmul.f32 -1.442695, %v2995_v58  ;;  %v3943_v9 = vmul.f32 -1.442695, %v2996_v50 }
 0x793   : > { %v3944_v24 = vmul.f32 -1.442695, %v2997_v11  ;;  %4839 = vpow2.f32 %v3947_v41  ;;  %v2936_v54 = vpop.f32.mrf.mxu0  ;;  %v4210_v47 = vpop.f32.mrf.mxu1  ;;  %v3945_v49 = vmul.f32 -1.442695, %v2998_v10  ;;  %v3946_v37 = vmul.f32 -1.442695, %v2999_v2 }
 0x794   : > { %4841 = vpow2.f32 %v3941_v33  ;;  %v3948_v62 = vmul.f32 -1.442695, %v3001_v32  ;;  %v3051_v30 = vrot.slane %v6452_v46, 2  ;;  %v3052_v57 = vrot.slane %v6452_v46, 3 }
 0x795   : > { %4843 = vpow2.f32 %v3942_v1  ;;  %v3053_v35 = vrot.slane %v6452_v46, 4  ;;  %v3054_v39 = vrot.slane %v6452_v46, 5  ;;  %v3055_v26 = vrot.slane %v6452_v46, 6 }
 0x796   : > { %4845 = vpow2.f32 %v3943_v9  ;;  %v3056_v38 = vrot.slane %v6452_v46, 7  ;;  %v3066_v25 = vadd.f32 %v3051_v30, %v6774_v12  ;;  %v3067_v13 = vadd.f32 %v3052_v57, %v5592_v7 }
 0x797   : > { %4847 = vpow2.f32 %v3944_v24  ;;  %v3068_v34 = vadd.f32 %v3053_v35, %v5597_v14  ;;  %v3069_v18 = vadd.f32 %v3054_v39, %v5602_v29  ;;  %v3070_v20 = vadd.f32 %v3055_v26, %v5607_v40 }
 0x798   : > { %4849 = vpow2.f32 %v3945_v49  ;;  %v3071_v0 = vadd.f32 %v3056_v38, %v5612_v42  ;;  %v3949_v58 = vmul.f32 -1.442695, %v3066_v25  ;;  %v3950_v50 = vmul.f32 -1.442695, %v3067_v13 }
 0x799   : > { %4851 = vpow2.f32 %v3946_v37  ;;  %v3951_v11 = vmul.f32 -1.442695, %v3068_v34  ;;  %v3952_v10 = vmul.f32 -1.442695, %v3069_v18  ;;  %v3953_v2 = vmul.f32 -1.442695, %v3070_v20 }
 0x79a   : > { %4853 = vpow2.f32 %v3948_v62  ;;  %v3954_v41 = vmul.f32 -1.442695, %v3071_v0  ;;  %v3057_v22 = vrot.slane %v6452_v46, 1  ;;  %v3072_v47 = vadd.f32 %v6452_v46, %v5617_v44 }
 0x79b   : > { %4855 = vpow2.f32 %v3949_v58  ;;  %v6480_v58 = vld [vmem:[%s6633_s4] ss:$0 sm:$0xff] }
 0x79c   : > { %4857 = vpow2.f32 %v3950_v50  ;;  %v3073_v62 = vadd.f32 %v3057_v22, %v6775_v53  ;;  %v3955_v25 = vmul.f32 -1.442695, %v3072_v47  ;;  %v3122_v50 = vadd.f32 %v6480_v58, %v6449_v28 }
 0x79d   : > { %4859 = vpow2.f32 %v3951_v11 }
 0x79e   : > { %4861 = vpow2.f32 %v3952_v10  ;;  %v3956_v34 = vmul.f32 -1.442695, %v3073_v62 }
 0x79f   : > { %4863 = vpow2.f32 %v3953_v2 }
 0x7a0   : > { %v4840_v52 = vpop.eup %4839  ;;  %4865 = vpow2.f32 %v3954_v41 }
 0x7a1   : > { %v4842_v32 = vpop.eup %4841  ;;  %v3032_v33 = vadd.f32 1.0, %v4840_v52 }
 0x7a2   : > { %v4844_v1 = vpop.eup %4843  ;;  %v3026_v9 = vadd.f32 1.0, %v4842_v32 }
 0x7a3   : > { %v4846_v24 = vpop.eup %4845  ;;  %v3027_v54 = vadd.f32 1.0, %v4844_v1  ;;  %4867 = vrcp.f32 %v3032_v33  ;;  %v3124_v1 = vrot.slane %v3122_v50, 2 }
 0x7a4   : > { %v4848_v49 = vpop.eup %4847  ;;  %v3028_v37 = vadd.f32 1.0, %v4846_v24  ;;  %4869 = vrcp.f32 %v3026_v9 }
 0x7a5   : > { %v4850_v30 = vpop.eup %4849  ;;  %v3029_v57 = vadd.f32 1.0, %v4848_v49  ;;  %4871 = vrcp.f32 %v3027_v54  ;;  %v3125_v54 = vrot.slane %v3122_v50, 3 }
 0x7a6   : > { %v4852_v35 = vpop.eup %4851  ;;  %v3030_v39 = vadd.f32 1.0, %v4850_v30  ;;  %4873 = vrcp.f32 %v3028_v37  ;;  %v3126_v37 = vrot.slane %v3122_v50, 4  ;;  %v3127_v30 = vrot.slane %v3122_v50, 5 }
 0x7a7   : > { %v4854_v26 = vpop.eup %4853  ;;  %v3031_v38 = vadd.f32 1.0, %v4852_v35  ;;  %4875 = vrcp.f32 %v3029_v57 }
 0x7a8   : > { %v3033_v13 = vadd.f32 1.0, %v4854_v26  ;;  %4877 = vrcp.f32 %v3030_v39  ;;  %v4856_v46 = vpop.eup %4855  ;;  %v3128_v26 = vrot.slane %v3122_v50, 6 }
 0x7a9   : > { %4879 = vrcp.f32 %v3031_v38  ;;  %v4858_v18 = vpop.eup %4857  ;;  %v3098_v20 = vadd.f32 1.0, %v4856_v46 }
 0x7aa   : > { %4881 = vrcp.f32 %v3033_v13  ;;  %v4860_v0 = vpop.eup %4859  ;;  %v3099_v11 = vadd.f32 1.0, %v4858_v18 }
 0x7ab   : > { %4883 = vpow2.f32 %v3955_v25  ;;  %v4862_v10 = vpop.eup %4861  ;;  %v3100_v2 = vadd.f32 1.0, %v4860_v0  ;;  %v3130_v0 = vrot.slane %v3122_v50, 1 }
 0x7ac   : > { %4885 = vpow2.f32 %v3956_v34  ;;  %v4864_v41 = vpop.eup %4863  ;;  %v3101_v52 = vadd.f32 1.0, %v4862_v10  ;;  %v3129_v34 = vrot.slane %v3122_v50, 7 }
 0x7ad   : > { %v4866_v22 = vpop.eup %4865  ;;  %v3102_v32 = vadd.f32 1.0, %v4864_v41  ;;  %4887 = vrcp.f32 %v3098_v20 }
 0x7ae   : > { %v3103_v9 = vadd.f32 1.0, %v4866_v22  ;;  %4889 = vrcp.f32 %v3099_v11 }
 0x7af   : > { %4891 = vrcp.f32 %v3100_v2 }
 0x7b0   : > { %v4868_v33 = vpop.eup %4867  ;;  %4893 = vrcp.f32 %v3101_v52 }
 0x7b1   : > { %v4870_v24 = vpop.eup %4869  ;;  %v3145_v47 = vmul.f32 %v4868_v33, %v3122_v50  ;;  %4895 = vrcp.f32 %v3102_v32 }
 0x7b2   : > { %v4872_v49 = vpop.eup %4871  ;;  %v3139_v28 = vmul.f32 %v4870_v24, %v3124_v1  ;;  %4897 = vrcp.f32 %v3103_v9 }
 0x7b3   : > { %v4874_v62 = vpop.eup %4873  ;;  %v3140_v57 = vmul.f32 %v4872_v49, %v3125_v54  ;;  %v3153_v35 = vadd.f32 %v3145_v47, %v6862_v4 }
 0x7b4   : > { %v4876_v39 = vpop.eup %4875  ;;  %v3141_v38 = vmul.f32 %v4874_v62, %v3126_v37  ;;  %v3147_v25 = vadd.f32 %v3139_v28, %v6778_v8 }
 0x7b5   : > { %v4878_v13 = vpop.eup %4877  ;;  %v3142_v46 = vmul.f32 %v4876_v39, %v3127_v30  ;;  %v3148_v18 = vadd.f32 %v3140_v57, %v6777_v63  ;;  %4899 = vtanh.f32 %v3153_v35  ;;  %v3192_v57 = vrot.slane %v6399_v19, 7 }
 0x7b6   : > { %v4880_v20 = vpop.eup %4879  ;;  %v3143_v11 = vmul.f32 %v4878_v13, %v3128_v26  ;;  %v3149_v10 = vadd.f32 %v3141_v38, %v6859_v36  ;;  %4901 = vtanh.f32 %v3147_v25  ;;  %v3187_v39 = vrot.slane %v6401_v51, 7 }
 0x7b7   : > { %v4882_v2 = vpop.eup %4881  ;;  %v3144_v41 = vmul.f32 %v4880_v20, %v3129_v34  ;;  %v3150_v52 = vadd.f32 %v3142_v46, %v6860_v60  ;;  %4903 = vtanh.f32 %v3148_v18  ;;  %v3188_v26 = vrot.slane %v6404_v21, 7 }
 0x7b8   : > { %v4884_v22 = vpop.eup %4883  ;;  %v3151_v32 = vadd.f32 %v3143_v11, %v6861_v3  ;;  %4905 = vtanh.f32 %v3149_v10  ;;  %v3146_v33 = vmul.f32 %v4882_v2, %v3130_v0  ;;  %v3189_v38 = vrot.slane %v6406_v15, 7 }
 0x7b9   : > { %v4886_v1 = vpop.eup %4885  ;;  %4907 = vtanh.f32 %v3150_v52  ;;  %v3104_v9 = vadd.f32 1.0, %v4884_v22  ;;  %v3152_v24 = vadd.f32 %v3144_v41, %v6821_v23  ;;  %v3190_v34 = vrot.slane %v6410_v61, 7 }
 0x7ba   : > { %4909 = vtanh.f32 %v3151_v32  ;;  %v3105_v50 = vadd.f32 1.0, %v4886_v1  ;;  %v3154_v54 = vadd.f32 %v3146_v33, %v6863_v48  ;;  %v4888_v47 = vpop.eup %4887  ;;  %v3191_v46 = vrot.slane %v6416_v6, 7 }
 0x7bb   : > { %4911 = vrcp.f32 %v3104_v9  ;;  %v4890_v49 = vpop.eup %4889  ;;  %v3163_v25 = vsub.f32 1.0, %v4888_v47  ;;  %v3193_v18 = vrot.slane %v6424_v27, 7  ;;  %v3194_v11 = vrot.slane %v6426_v31, 7 }
 0x7bc   : > { %4913 = vrcp.f32 %v3105_v50  ;;  %v4892_v37 = vpop.eup %4891  ;;  %v3164_v20 = vsub.f32 1.0, %v4890_v49  ;;  %v3203_v2 = vmul.f32 %v4888_v47, %v3187_v39  ;;  %v3204_v52 = vmul.f32 %v4890_v49, %v3188_v26 }
 0x7bd   : > { %4915 = vtanh.f32 %v3152_v24  ;;  %v4894_v28 = vpop.eup %4893  ;;  %v3165_v19 = vsub.f32 1.0, %v4892_v37  ;;  %v3205_v15 = vmul.f32 %v4892_v37, %v3189_v38 }
 0x7be   : > { %4917 = vtanh.f32 %v3154_v54  ;;  %v4896_v62 = vpop.eup %4895  ;;  %v3166_v41 = vsub.f32 1.0, %v4894_v28  ;;  %v3206_v61 = vmul.f32 %v4894_v28, %v3190_v34 }
 0x7bf   : > { %v4898_v30 = vpop.eup %4897  ;;  %v3167_v32 = vsub.f32 1.0, %v4896_v62  ;;  %v3207_v24 = vmul.f32 %v4896_v62, %v3191_v46 }
 0x7c0   : > { %v3168_v27 = vsub.f32 1.0, %v4898_v30  ;;  %v3208_v47 = vmul.f32 %v4898_v30, %v3192_v57 }
 0x7c2   : > { %v4900_v35 = vpop.eup %4899 }
 0x7c3   : > { %v4902_v13 = vpop.eup %4901 }
 0x7c4   : > { %v4904_v0 = vpop.eup %4903  ;;  %v3171_v10 = vmul.f32 %v4902_v13, %v3163_v25 }
 0x7c5   : > { %v4906_v51 = vpop.eup %4905  ;;  %v3172_v21 = vmul.f32 %v4904_v0, %v3164_v20 }
 0x7c6   : > { %v4908_v22 = vpop.eup %4907  ;;  %v3173_v33 = vmul.f32 %v4906_v51, %v3165_v19  ;;  %v6500_v1 = vadd.f32 %v3203_v2, %v3171_v10 }
 0x7c7   : > { %v4910_v6 = vpop.eup %4909  ;;  %v3174_v9 = vmul.f32 %v4908_v22, %v3166_v41  ;;  %v6502_v50 = vadd.f32 %v3204_v52, %v3172_v21 }
 0x7c8   : > { %v4912_v31 = vpop.eup %4911  ;;  %v3175_v54 = vmul.f32 %v4910_v6, %v3167_v32  ;;  %v6504_v39 = vadd.f32 %v3205_v15, %v3173_v33  ;;  %v3219_v49 = vpack.c.bf16 %v6500_v1, %v6500_v1 }
 0x7c9   : > { %v4914_v37 = vpop.eup %4913  ;;  %v3169_v26 = vsub.f32 1.0, %v4912_v31  ;;  %v3209_v38 = vmul.f32 %v4912_v31, %v3193_v18  ;;  %v6508_v28 = vadd.f32 %v3206_v61, %v3174_v9  ;;  %v3220_v25 = vpack.c.bf16 %v6502_v50, %v6502_v50 }
 0x7ca   : > { %v4916_v13 = vpop.eup %4915  ;;  %v3170_v62 = vsub.f32 1.0, %v4914_v37  ;;  %v3210_v34 = vmul.f32 %v4914_v37, %v3194_v11  ;;  %v6512_v46 = vadd.f32 %v3207_v24, %v3175_v54  ;;  %v3221_v30 = vpack.c.bf16 %v6504_v39, %v6504_v39 }
 0x7cb   : > { %v4918_v57 = vpop.eup %4917  ;;  %v3176_v20 = vmul.f32 %v4916_v13, %v3168_v27  ;;  %v3177_v0 = vmul.f32 %v4900_v35, %v3169_v26  ;;  %v3222_v19 = vpack.c.bf16 %v6508_v28, %v6508_v28  ;;  %v3235_v18 = vunpack.c.l.b16 %v3219_v49 }
 0x7cc   : > { %v3178_v10 = vmul.f32 %v4918_v57, %v3170_v62  ;;  %v3223_v2 = vpack.c.bf16 %v6512_v46, %v6512_v46  ;;  %v3236_v51 = vunpack.c.l.b16 %v3220_v25  ;;  %v3237_v41 = vunpack.c.l.b16 %v3221_v30 }
 0x7cd   : > { %v6520_v21 = vadd.f32 %v3208_v47, %v3176_v20  ;;  %v6522_v11 = vadd.f32 %v3209_v38, %v3177_v0  ;;  %v3238_v52 = vunpack.c.l.b16 %v3222_v19  ;;  %v3243_v15 = vrot.slane %v3235_v18, 6 }
 0x7ce   : > { %v6524_v22 = vadd.f32 %v3210_v34, %v3178_v10  ;;  %v3239_v32 = vunpack.c.l.b16 %v3223_v2  ;;  %v3244_v35 = vrot.slane %v3236_v51, 5  ;;  %v3246_v33 = vrot.slane %v3237_v41, 4 }
 0x7cf   : > { %v3224_v61 = vpack.c.bf16 %v6520_v21, %v6520_v21  ;;  %v3225_v6 = vpack.c.bf16 %v6522_v11, %v6522_v11  ;;  %v3248_v24 = vrot.slane %v3238_v52, 3 }
 0x7d0   : > { %v3226_v27 = vpack.c.bf16 %v6524_v22, %v6524_v22  ;;  %v3245_v9 = vsel %vm1065_vm2, %v3244_v35, %v3243_v15  ;;  %v3250_v47 = vrot.slane %v3239_v32, 2 }
 0x7d1   : > { %v3240_v31 = vunpack.c.l.b16 %v3224_v61  ;;  %v3247_v54 = vsel %vm1068_vm3, %v3246_v33, %v3245_v9  ;;  %v3241_v25 = vunpack.c.l.b16 %v3225_v6 }
 0x7d2   : > { %v3242_v49 = vunpack.c.l.b16 %v3226_v27  ;;  %v3249_v37 = vsel %vm1071_vm4, %v3248_v24, %v3247_v54 }
 0x7d3   : > { %v3251_v26 = vsel %vm1074_vm5, %v3250_v47, %v3249_v37  ;;  %v3252_v38 = vrot.slane %v3240_v31, 1 }
 0x7d4   : > { %v3255_v62 = vrot.slane %v3242_v49, 7 }
 0x7d5   : > { %v3253_v13 = vsel %vm1077_vm6, %v3252_v38, %v3251_v26 }
 0x7d6   : > { %v3254_v34 = vsel %vm1080_vm7, %v3241_v25, %v3253_v13 }
 0x7d7   : > { %v3256_v30 = vsel %vm1083_vm8, %v3255_v62, %v3254_v34 }
 0x7d8   : > { %v3257_v57 = vpack.c.b16 %v3256_v30, %v3256_v30 }
 0x7da   : > { %3292 = vmatmul.mubr.bf16.vlgmr.msra.gmra.mxu0 %v3257_v57  ;;  %4228 = vmatmul.mubr.bf16.vlgmr.msra.gmra.mxu1 %v3257_v57 }
 0x89a   : > { %v3293_v20 = vpop.f32.mrf.mxu0  ;;  %v6539_v0 = vpop.f32.mrf.mxu1 }
 0x89b   : > { %v3341_v19 = vrot.slane %v3293_v20, 1  ;;  %v3342_v18 = vrot.slane %v3293_v20, 2  ;;  %v3343_v10 = vrot.slane %v3293_v20, 3  ;;  %v3344_v2 = vrot.slane %v3293_v20, 4 }
 0x89c   : > { %v3345_v51 = vrot.slane %v3293_v20, 5  ;;  %v3346_v41 = vrot.slane %v3293_v20, 6  ;;  %v3347_v52 = vrot.slane %v3293_v20, 7  ;;  %v3363_v15 = vadd.f32 %v3293_v20, %v5619_v45  ;;  %v6542_v32 = vpop.f32.mrf.mxu0  ;;  %v4229_v35 = vpop.f32.mrf.mxu1 }
 0x89d   : > { %v3356_v33 = vadd.f32 %v3341_v19, %v6817_v56  ;;  %v3357_v61 = vadd.f32 %v3342_v18, %v5587_v5  ;;  %v3358_v6 = vadd.f32 %v3343_v10, %v6818_v59  ;;  %v3359_v27 = vadd.f32 %v3344_v2, %v6772_v55 }
 0x89e   : > { %v3360_v9 = vadd.f32 %v3345_v51, %v6858_v17  ;;  %v3361_v24 = vadd.f32 %v3346_v41, %v6773_v16  ;;  %v3964_v31 = vmul.f32 -1.442695, %v3363_v15  ;;  %v3297_v54 = vpop.f32.mrf.mxu0  ;;  %v3337_v47 = vpop.f32.mrf.mxu1  ;;  %v3362_v45 = vadd.f32 %v3347_v52, %v5614_v43 }
 0x89f   : > { %v3957_v49 = vmul.f32 -1.442695, %v3356_v33  ;;  %v3958_v37 = vmul.f32 -1.442695, %v3357_v61  ;;  %v3959_v26 = vmul.f32 -1.442695, %v3358_v6 }
 0x8a0   : > { %v3960_v38 = vmul.f32 -1.442695, %v3359_v27  ;;  %4919 = vpow2.f32 %v3964_v31  ;;  %v3298_v56 = vpop.f32.mrf.mxu0  ;;  %v4230_v5 = vpop.f32.mrf.mxu1  ;;  %v3961_v59 = vmul.f32 -1.442695, %v3360_v9  ;;  %v3962_v55 = vmul.f32 -1.442695, %v3361_v24 }
 0x8a1   : > { %4921 = vpow2.f32 %v3957_v49  ;;  %v3963_v17 = vmul.f32 -1.442695, %v3362_v45  ;;  %v3413_v16 = vrot.slane %v6542_v32, 1  ;;  %v3414_v25 = vrot.slane %v6542_v32, 2 }
 0x8a2   : > { %4923 = vpow2.f32 %v3958_v37  ;;  %v3415_v43 = vrot.slane %v6542_v32, 3  ;;  %v3416_v13 = vrot.slane %v6542_v32, 4  ;;  %v3417_v62 = vrot.slane %v6542_v32, 5 }
 0x8a3   : > { %4925 = vpow2.f32 %v3959_v26  ;;  %v3418_v34 = vrot.slane %v6542_v32, 6  ;;  %v3428_v30 = vadd.f32 %v3413_v16, %v6774_v12  ;;  %v3429_v57 = vadd.f32 %v3414_v25, %v5592_v7 }
 0x8a4   : > { %4927 = vpow2.f32 %v3960_v38  ;;  %v3430_v20 = vadd.f32 %v3415_v43, %v5597_v14  ;;  %v3431_v19 = vadd.f32 %v3416_v13, %v5602_v29  ;;  %v3432_v18 = vadd.f32 %v3417_v62, %v5607_v40 }
 0x8a5   : > { %4929 = vpow2.f32 %v3961_v59  ;;  %v3433_v10 = vadd.f32 %v3418_v34, %v5612_v42  ;;  %v3965_v2 = vmul.f32 -1.442695, %v3428_v30  ;;  %v3966_v51 = vmul.f32 -1.442695, %v3429_v57 }
 0x8a6   : > { %4931 = vpow2.f32 %v3962_v55  ;;  %v3967_v41 = vmul.f32 -1.442695, %v3430_v20  ;;  %v3968_v52 = vmul.f32 -1.442695, %v3431_v19  ;;  %v3969_v15 = vmul.f32 -1.442695, %v3432_v18 }
 0x8a7   : > { %4933 = vpow2.f32 %v3963_v17  ;;  %v3970_v35 = vmul.f32 -1.442695, %v3433_v10  ;;  %v3419_v12 = vrot.slane %v6542_v32, 7  ;;  %v3435_v24 = vadd.f32 %v6542_v32, %v6775_v53 }
 0x8a8   : > { %4935 = vpow2.f32 %v3965_v2  ;;  %v3484_v32 = vadd.f32 %v6480_v58, %v6539_v0 }
 0x8a9   : > { %4937 = vpow2.f32 %v3966_v51  ;;  %v3434_v6 = vadd.f32 %v3419_v12, %v5617_v44  ;;  %v3972_v56 = vmul.f32 -1.442695, %v3435_v24 }
 0x8aa   : > { %4939 = vpow2.f32 %v3967_v41  ;;  %v3486_v30 = vrot.slane %v3484_v32, 1  ;;  %v3487_v19 = vrot.slane %v3484_v32, 2  ;;  %v3488_v2 = vrot.slane %v3484_v32, 3 }
 0x8ab   : > { %4941 = vpow2.f32 %v3968_v52  ;;  %v3971_v26 = vmul.f32 -1.442695, %v3434_v6  ;;  %v3489_v51 = vrot.slane %v3484_v32, 4 }
 0x8ac   : > { %4943 = vpow2.f32 %v3969_v15 }
 0x8ad   : > { %v4920_v7 = vpop.eup %4919  ;;  %4945 = vpow2.f32 %v3970_v35  ;;  %v3490_v35 = vrot.slane %v3484_v32, 5 }
 0x8ae   : > { %v4922_v14 = vpop.eup %4921  ;;  %v3395_v33 = vadd.f32 1.0, %v4920_v7 }
 0x8af   : > { %v4924_v29 = vpop.eup %4923  ;;  %v3388_v40 = vadd.f32 1.0, %v4922_v14 }
 0x8b0   : > { %v4926_v42 = vpop.eup %4925  ;;  %v3389_v61 = vadd.f32 1.0, %v4924_v29  ;;  %4947 = vrcp.f32 %v3395_v33  ;;  %v3491_v33 = vrot.slane %v3484_v32, 6 }
 0x8b1   : > { %v4928_v27 = vpop.eup %4927  ;;  %v3390_v9 = vadd.f32 1.0, %v4926_v42  ;;  %4949 = vrcp.f32 %v3388_v40 }
 0x8b2   : > { %v4930_v31 = vpop.eup %4929  ;;  %v3391_v54 = vadd.f32 1.0, %v4928_v27  ;;  %4951 = vrcp.f32 %v3389_v61  ;;  %v3492_v61 = vrot.slane %v3484_v32, 7 }
 0x8b3   : > { %v4932_v47 = vpop.eup %4931  ;;  %v3392_v45 = vadd.f32 1.0, %v4930_v31  ;;  %4953 = vrcp.f32 %v3390_v9 }
 0x8b4   : > { %v4934_v49 = vpop.eup %4933  ;;  %v3393_v37 = vadd.f32 1.0, %v4932_v47  ;;  %4955 = vrcp.f32 %v3391_v54 }
 0x8b5   : > { %v3394_v38 = vadd.f32 1.0, %v4934_v49  ;;  %4957 = vrcp.f32 %v3392_v45  ;;  %v4936_v44 = vpop.eup %4935 }
 0x8b6   : > { %4959 = vrcp.f32 %v3393_v37  ;;  %v4938_v5 = vpop.eup %4937  ;;  %v3460_v59 = vadd.f32 1.0, %v4936_v44 }
 0x8b7   : > { %4961 = vrcp.f32 %v3394_v38  ;;  %v4940_v53 = vpop.eup %4939  ;;  %v3461_v55 = vadd.f32 1.0, %v4938_v5  ;;  %v3549_v5 = vrot.slane %v6500_v1, 7 }
 0x8b8   : > { %4963 = vpow2.f32 %v3971_v26  ;;  %v4942_v17 = vpop.eup %4941  ;;  %v3462_v16 = vadd.f32 1.0, %v4940_v53  ;;  %v3550_v53 = vrot.slane %v6502_v50, 7 }
 0x8b9   : > { %4965 = vpow2.f32 %v3972_v56  ;;  %v4944_v25 = vpop.eup %4943  ;;  %v3463_v43 = vadd.f32 1.0, %v4942_v17 }
 0x8ba   : > { %v4946_v13 = vpop.eup %4945  ;;  %v3464_v62 = vadd.f32 1.0, %v4944_v25  ;;  %4967 = vrcp.f32 %v3460_v59 }
 0x8bb   : > { %v3465_v57 = vadd.f32 1.0, %v4946_v13  ;;  %4969 = vrcp.f32 %v3461_v55 }
 0x8bc   : > { %4971 = vrcp.f32 %v3462_v16  ;;  %v3553_v16 = vrot.slane %v6512_v46, 7 }
 0x8bd   : > { %v4948_v34 = vpop.eup %4947  ;;  %4973 = vrcp.f32 %v3463_v43 }
 0x8be   : > { %v4950_v20 = vpop.eup %4949  ;;  %v3508_v18 = vmul.f32 %v4948_v34, %v3484_v32  ;;  %4975 = vrcp.f32 %v3464_v62  ;;  %v3552_v32 = vrot.slane %v6508_v28, 7  ;;  %v3554_v34 = vrot.slane %v6520_v21, 7 }
 0x8bf   : > { %v4952_v10 = vpop.eup %4951  ;;  %v3501_v58 = vmul.f32 %v4950_v20, %v3486_v30  ;;  %4977 = vrcp.f32 %v3465_v57 }
 0x8c0   : > { %v4954_v0 = vpop.eup %4953  ;;  %v3502_v41 = vmul.f32 %v4952_v10, %v3487_v19  ;;  %v3516_v52 = vadd.f32 %v3508_v18, %v6863_v48 }
 0x8c1   : > { %v4956_v15 = vpop.eup %4955  ;;  %v3503_v12 = vmul.f32 %v4954_v0, %v3488_v2  ;;  %v3509_v7 = vadd.f32 %v3501_v58, %v6778_v8 }
 0x8c2   : > { %v4958_v14 = vpop.eup %4957  ;;  %v3504_v29 = vmul.f32 %v4956_v15, %v3489_v51  ;;  %v3510_v40 = vadd.f32 %v3502_v41, %v6777_v63  ;;  %4979 = vtanh.f32 %v3516_v52 }
 0x8c3   : > { %v4960_v42 = vpop.eup %4959  ;;  %v3505_v6 = vmul.f32 %v4958_v14, %v3490_v35  ;;  %v3511_v27 = vadd.f32 %v3503_v12, %v6859_v36  ;;  %4981 = vtanh.f32 %v3509_v7 }
 0x8c4   : > { %v4962_v48 = vpop.eup %4961  ;;  %v3506_v9 = vmul.f32 %v4960_v42, %v3491_v33  ;;  %v3512_v24 = vadd.f32 %v3504_v29, %v6860_v60  ;;  %4983 = vtanh.f32 %v3510_v40  ;;  %v3555_v42 = vrot.slane %v6522_v11, 7 }
 0x8c5   : > { %v4964_v31 = vpop.eup %4963  ;;  %v3507_v8 = vmul.f32 %v4962_v48, %v3492_v61  ;;  %v3513_v54 = vadd.f32 %v3505_v6, %v6861_v3  ;;  %4985 = vtanh.f32 %v3511_v27  ;;  %v3556_v48 = vrot.slane %v6524_v22, 7 }
 0x8c6   : > { %v4966_v47 = vpop.eup %4965  ;;  %v3514_v63 = vadd.f32 %v3506_v9, %v6821_v23  ;;  %4987 = vtanh.f32 %v3512_v24  ;;  %v3466_v45 = vadd.f32 1.0, %v4964_v31 }
 0x8c7   : > { %v3515_v49 = vadd.f32 %v3507_v8, %v6862_v4  ;;  %4989 = vtanh.f32 %v3513_v54  ;;  %v3467_v36 = vadd.f32 1.0, %v4966_v47  ;;  %v4968_v37 = vpop.eup %4967  ;;  %v3551_v4 = vrot.slane %v6504_v39, 7 }
 0x8c8   : > { %4991 = vtanh.f32 %v3514_v63  ;;  %v4970_v26 = vpop.eup %4969  ;;  %v3525_v23 = vsub.f32 1.0, %v4968_v37  ;;  %v3565_v13 = vmul.f32 %v4968_v37, %v3549_v5 }
 0x8c9   : > { %4993 = vtanh.f32 %v3515_v49  ;;  %v4972_v60 = vpop.eup %4971  ;;  %v3526_v55 = vsub.f32 1.0, %v4970_v26  ;;  %v3566_v57 = vmul.f32 %v4970_v26, %v3550_v53 }
 0x8ca   : > { %4995 = vrcp.f32 %v3466_v45  ;;  %v4974_v38 = vpop.eup %4973  ;;  %v3527_v25 = vsub.f32 1.0, %v4972_v60  ;;  %v3567_v18 = vmul.f32 %v4972_v60, %v3551_v4 }
 0x8cb   : > { %4997 = vrcp.f32 %v3467_v36  ;;  %v4976_v56 = vpop.eup %4975  ;;  %v3528_v30 = vsub.f32 1.0, %v4974_v38  ;;  %v3568_v58 = vmul.f32 %v4974_v38, %v3552_v32 }
 0x8cc   : > { %v4978_v3 = vpop.eup %4977  ;;  %v3529_v19 = vsub.f32 1.0, %v4976_v56  ;;  %v3569_v41 = vmul.f32 %v4976_v56, %v3553_v16 }
 0x8cd   : > { %v3530_v28 = vsub.f32 1.0, %v4978_v3  ;;  %v3570_v35 = vmul.f32 %v4978_v3, %v3554_v34 }
 0x8cf   : > { %v4980_v44 = vpop.eup %4979 }
 0x8d0   : > { %v4982_v59 = vpop.eup %4981 }
 0x8d1   : > { %v4984_v17 = vpop.eup %4983  ;;  %v3533_v43 = vmul.f32 %v4982_v59, %v3525_v23 }
 0x8d2   : > { %v4986_v62 = vpop.eup %4985  ;;  %v3534_v1 = vmul.f32 %v4984_v17, %v3526_v55 }
 0x8d3   : > { %v4988_v20 = vpop.eup %4987  ;;  %v3535_v50 = vmul.f32 %v4986_v62, %v3527_v25  ;;  %v3573_v39 = vadd.f32 %v3565_v13, %v3533_v43 }
 0x8d4   : > { %v4990_v10 = vpop.eup %4989  ;;  %v3536_v2 = vmul.f32 %v4988_v20, %v3528_v30  ;;  %v3574_v0 = vadd.f32 %v3566_v57, %v3534_v1 }
 0x8d5   : > { %v4992_v46 = vpop.eup %4991  ;;  %v3537_v51 = vmul.f32 %v4990_v10, %v3529_v19  ;;  %v3575_v52 = vadd.f32 %v3567_v18, %v3535_v50  ;;  %3604 = vst [vmem:[#allocation2 - $0x7] sm:$0x80] %v3573_v39 }
 0x8d6   : > { %v4994_v15 = vpop.eup %4993  ;;  %v3538_v21 = vmul.f32 %v4992_v46, %v3530_v28  ;;  %v3576_v12 = vadd.f32 %v3568_v58, %v3536_v2  ;;  %v3589_v7 = vrot.slane %v3574_v0, 7 }
 0x8d7   : > { %v4996_v14 = vpop.eup %4995  ;;  %v3577_v33 = vadd.f32 %v3569_v41, %v3537_v51  ;;  %v3590_v29 = vrot.slane %v3575_v52, 6 }
 0x8d8   : > { %v4998_v40 = vpop.eup %4997  ;;  %v3531_v61 = vsub.f32 1.0, %v4996_v14  ;;  %v3578_v6 = vadd.f32 %v3570_v35, %v3538_v21  ;;  %v3592_v27 = vrot.slane %v3576_v12, 5  ;;  %v3571_v54 = vmul.f32 %v4996_v14, %v3555_v42 }
 0x8d9   : > { %v3532_v9 = vsub.f32 1.0, %v4998_v40  ;;  %v3591_v24 = vsel %vm1065_vm2, %v3590_v29, %v3589_v7  ;;  %v3594_v31 = vrot.slane %v3577_v33, 4  ;;  %v3572_v49 = vmul.f32 %v4998_v40, %v3556_v48 }
 0x8da   : > { %v3539_v8 = vmul.f32 %v4994_v15, %v3531_v61  ;;  %v3593_v47 = vsel %vm1068_vm3, %v3592_v27, %v3591_v24  ;;  %v3596_v63 = vrot.slane %v3578_v6, 3 }
 0x8db   : > { %v3540_v45 = vmul.f32 %v4980_v44, %v3532_v9  ;;  %v3595_v36 = vsel %vm1071_vm4, %v3594_v31, %v3593_v47 }
 0x8dc   : > { %v3579_v37 = vadd.f32 %v3571_v54, %v3539_v8  ;;  %v3597_v11 = vsel %vm1074_vm5, %v3596_v63, %v3595_v36 }
 0x8dd   : > { %v3580_v26 = vadd.f32 %v3572_v49, %v3540_v45 }
 0x8de   : > { %v3598_v60 = vrot.slane %v3579_v37, 2  ;;  %3609 = sbr.rel (%p3973_p4) target bundleno = 2515 (0x9d3), region = 68 }
 0x8df   : > { %v3600_v38 = vrot.slane %v3580_v26, 1 }
 0x8e0   : > { %v3599_v22 = vsel %vm1077_vm6, %v3598_v60, %v3597_v11 }
 0x8e1   : > { %v3601_v56 = vsel %vm1080_vm7, %v3600_v38, %v3599_v22 }
 0x8e2   : > { %3605 = vst [vmem:[#allocation2 + $0x1] sm:$0x7f] %v3601_v56 }
 0x8e3   : > { %v3621_v3 = vrot.slane %v3573_v39, 7  ;;  %v3622_v5 = vrot.slane %v3574_v0, 6  ;;  %v3624_v44 = vrot.slane %v3575_v52, 5  ;;  %v5238_v23 = vmov 0.0   ;;  %v3611_v4 = vld [vmem:[#allocation3] sm:$0x1] }
 0x8e4   : > { %4231 = vmatprep.subr.mxu0 %v5238_v23  ;;  %v3626_v59 = vrot.slane %v3576_v12, 4  ;;  %v3628_v53 = vrot.slane %v3577_v33, 3  ;;  %v3630_v55 = vrot.slane %v3578_v6, 2  ;;  %v3632_v16 = vrot.slane %v3579_v37, 1  ;;  %v3610_v1 = vld [vmem:[%s6634_s5] sm:$0x1] }
 0x8e5   : > { %v3623_v32 = vsel %vm1065_vm2, %v3622_v5, %v3621_v3  ;;  %vm5239_vm9 = vmmov 0   ;;  %v5240_v25 = vmov 0   ;;  %v6864_v20 = vld [vmem:[#allocation21_spill] sm:$0xff]  ;;  %vm3712_vm10 = vcmask 57344  }
 0x8e6   : > { %v3625_v17 = vsel %vm1068_vm3, %v3624_v44, %v3623_v32  ;;  %4233 = vmatprep.mubr.msk.f32.mxu0 %vm5239_vm9, %v5238_v23  ;;  %5073 = vset.pattern.permute.xlu0 %v5240_v25  ;;  %v6865_v19 = vsub.s32 0, %v6864_v20 }
 0x8e7   : > { %v3627_v43 = vsel %vm1071_vm4, %v3626_v59, %v3625_v17  ;;  %3614 = vperm.xlu0 %5073, %v3611_v4  }
 0x8e8   : > { %v3629_v13 = vsel %vm1074_vm5, %v3628_v53, %v3627_v43 }
 0x8e9   : > { %v3631_v62 = vsel %vm1077_vm6, %v3630_v55, %v3629_v13 }
 0x8ea   : > { %v3633_v34 = vsel %vm1080_vm7, %v3632_v16, %v3631_v62 }
 0x8eb   : > { %v3634_v30 = vsel %vm1083_vm8, %v3580_v26, %v3633_v34 }
 0x8ec   : > { %4232 = vmatpush3.xpose.msra.mxu0 %v3634_v30 }
 0x8ef   : > { %4234 = vmatmul.mubr.f32.vlgmr.msra.gmra.mxu0 %v3610_v1 }
 0x962   : > { %v3615_v57 = vpop.permute.xlu0 %3614 }
 0x963   : > { %v3620_v50 = vrot.slane %v3615_v57, %v6865_v19 }
 0x9af   : > { %v3702_v18 = vpop.f32.mrf.mxu0 }
 0x9b0   : > { %v3703_v39 = vadd.f32 %v3702_v18, %v3620_v50 }
 0x9b1   : > { %v4235_v10 = vpop.f32.mrf.mxu0 }
 0x9b2   : > { %v3974_v28 = vmul.f32 -1.442695, %v3703_v39 }
 0x9b4   : > { %5074 = vpow2.f32 %v3974_v28 }
 0x9c1   : > { %v5075_v2 = vpop.eup %5074 }
 0x9c2   : > { %v3709_v58 = vadd.f32 1.0, %v5075_v2 }
 0x9c4   : > { %5076 = vrcp.f32 %v3709_v58 }
 0x9d1   : > { %v5077_v0 = vpop.eup %5076 }
 0x9d2   : > { %3713 = vst.msk [vmem:[#allocation10] sm:$0x1] %vm3712_vm10, %v5077_v0 }
 0x9d3 PF: > { %p4266_p13 = scmp.eq.s32.totalorder %s5304_s6, 1  ;;  %s5241_s15 = smov [#allocation10]  }
 0x9d4   : > { %s3721_s19 = sshll.u32 %s5241_s15, 4  ;;  %s3722_s19 = int_to_ptr.vmem [resolvable:$true] %s3721_s19 }
 0x9d5   : > { %s5158_s16 = scalar_lea.vmem %s3722_s19, 16  ;;  %s5164_s26 = scalar_lea.vmem %s3722_s19, 32 }
 0x9d6   : > { %p5159_p2 = scmp.ne.s32.totalorder %s3722_s19, %s5158_s16  ;;  %p5165_p3 = scmp.lt.s32.totalorder %s3722_s19, %s3722_s19 }
 0x9d7   : > { %p5166_p6 = scmp.lt.s32.totalorder %s5164_s26, %s5158_s16 }
 0x9d8   : > { %p5160_p9 = pnand %p5159_p2, %p4266_p13 }
 0x9d9   : > { %p5167_p12 = por %p5166_p6, %p5165_p3 }
 0x9da   : > { %p5161_p5 = pneg %p5160_p9 }
 0x9dc   : > { %p5168_p7 = pnand %p5167_p12, %p5161_p5 }
 0x9de   : > { %5171 = shalt.err (!%p5168_p7)
}
 0x9df   : > { %4247 = dma.vmem_to_hbm [thread:$0]  (%p4266_p13), %s3722_s19, 16, %s6636_s7, [#allocation6]  }
 0x9e0   : > { %5207 = dma.done.wait (%p4266_p13), [#allocation6], 16  }
 0x9e1   : > { %5209 = vsyncadd (%p4266_p13), [#allocation6], 4294967280 }
 0x9e2 PF: > { %p21_p1 = scmp.ge.s32.totalorder %s5307_s30, 4   ;;  %s6866_s26 = smov %s5216_s27 }
 0x9e3   : > { %s6867_s27 = smov %s5220_s28  ;;  %s6868_s28 = smov %s5317_s10 }
 0x9e4   : > { %s6869_s29 = smov %s5307_s30  ;;  %23 = sbr.rel (!%p21_p1) target bundleno = 8 (0x8), region = 101 }
 0x9e9   :  { %3734 = vsyncpa [#allocation5], 1 }
 0x9ea   :  { %3736 = vsyncpa [#allocation5 + $0x1], 1 }
 0x9eb   :  { %3737 = vsyncpa [#allocation8], 1 }
 0x9ec   :  { %3738 = vsyncpa [#allocation6], 1 }
 0x9ed   :  { %3740 = vsyncpa [#allocation6 + $0x1], 1 }

</bundles_post_ra>
